<compile_context>
chip_gen: v7x
topology: tpu7x:2x2x1
jax: 0.10.0
libtpu: 0.0.40
codegen_flags: <defaults>
</compile_context>

<pallas_src>
import math

import jax
import jax.numpy as jnp
from jax.experimental import pallas as pl
from jax.experimental.pallas import tpu as pltpu

# ----------------------------- model config ---------------------------------
VOCAB = 64
V_PAD = 128                  # vocab padded to a full lane group (lane-dense I/O)
D_MODEL = 32
N_HEADS = 4
D_KV = 8                     # per-head dim (N_HEADS * D_KV == D_MODEL here)
D_FF = 64
NUM_BUCKETS = 32
MAX_DISTANCE = 128
LN_EPS = 1e-6
NEG_INF = -1e9

# ------------------ packed weight slab layout (rows, width=D_MODEL) ----------
OFF_E = 0                                   # embedding, padded to (V_PAD, D)
OFF_ATT = OFF_E + V_PAD                     # 3 attentions x (4 QK + 4 VO) blocks
ATT_ROWS = 2 * N_HEADS * D_MODEL            # 256 rows per attention
OFF_WI = OFF_ATT + 3 * ATT_ROWS             # wi^T for enc, dec   (D_FF, D) each
OFF_WFF = OFF_WI + 2 * D_FF                 # wff  for enc, dec   (D_FF, D) each
OFF_LN = OFF_WFF + 2 * D_FF                 # 7 RMSNorm rows (padded to 8)
N_W_ROWS = OFF_LN + 8


# --------------------------- fused forward kernel ----------------------------

def _ligt_kernel(g4_ref,      # SMEM (1,) f32 : sigmoid(scalar2d) / 4
                 ids_ref,     # VMEM (2*BS, 5) int32 :
                              #   rows 0..BS-1   -> [input_id, h1, h2, h3, h4]
                              #   rows BS..2BS-1 -> [label_id, -1, -1, -1, -1]
                 bias_ref,    # VMEM (2H+1, BS, BS) f32 additive attention bias
                 w_ref,       # VMEM (N_W_ROWS, D) packed weight slab
                 out_ref):    # VMEM (BS, V_PAD) logits (lane-dense)
    f32 = jnp.float32
    n2 = ids_ref.shape[0]                     # 2 * B * S
    BS = n2 // 2
    NT = (((1,), (1,)), ((), ()))             # contract last dims of both operands

    ids = ids_ref[...]                                        # (2BS, 5)
    E = w_ref[OFF_E:OFF_E + V_PAD, :]                         # (V_PAD, D)
    lnw = w_ref[OFF_LN:OFF_LN + 8, :]                         # (8, D), rows 0..6 used

    # ---- fused embedding gather + hashed-2D mixing: ONE one-hot MXU matmul ---
    # mix rows 0..BS-1  = onehot(input) + sigmoid(s)/4 * sum_j onehot(hash_j)
    # mix rows BS..2BS-1 = onehot(label)        (hash ids are -1 -> all-zero)
    viota = jax.lax.broadcasted_iota(jnp.int32, (n2, V_PAD), 1)
    oh = (viota == ids[:, 0:1]).astype(f32)
    cnt = ((viota == ids[:, 1:2]).astype(f32) + (viota == ids[:, 2:3]).astype(f32)
           + (viota == ids[:, 3:4]).astype(f32) + (viota == ids[:, 4:5]).astype(f32))
    mix = oh + cnt * g4_ref[0]
    emb = jnp.dot(mix, E, preferred_element_type=f32)          # (2BS, D)
    x_enc = emb[:BS]                                           # sublane slice, free
    dec_in = emb[BS:]

    # ------------------------------ sub-blocks -------------------------------
    def rmsnorm(x, i):
        # T5LayerNorm: x * rsqrt(mean(x^2) + eps) * w  (no mean-sub, no bias)
        w = lnw[i:i + 1, :]
        var = jnp.mean(x * x, axis=-1, keepdims=True)
        return x * jax.lax.rsqrt(var + LN_EPS) * w

    def attention(x_q, x_kv, a, bias_rows):
        # Weights were folded at init: QK_h = Wq_h Wk_h^T, VO_h = Wv_h Wo_h,
        # both (D, D), stacked along slab rows -> per-head static row slices,
        # zero lane slices, zero concats, per-head accumulation of the output.
        base = OFF_ATT + a * ATT_ROWS
        acc = jnp.zeros((x_q.shape[0], D_MODEL), f32)
        for h in range(N_HEADS):                       # static, fully unrolled
            qk = w_ref[base + h * D_MODEL: base + (h + 1) * D_MODEL, :]
            vo = w_ref[base + (N_HEADS + h) * D_MODEL:
                       base + (N_HEADS + h + 1) * D_MODEL, :]
            qm = jnp.dot(x_q, qk, preferred_element_type=f32)           # (Nq, D)
            vv = jnp.dot(x_kv, vo, preferred_element_type=f32)          # (Nk, D)
            # T5 attention: NO 1/sqrt(d) scaling; additive bias already holds
            # rel-pos + key-padding + causal + batch-block terms.
            s = jax.lax.dot_general(qm, x_kv, NT, preferred_element_type=f32)
            s = s + bias_ref[bias_rows[h]]
            s = s - jnp.max(s, axis=-1, keepdims=True)
            p = jnp.exp(s)
            p = p * pl.reciprocal(jnp.sum(p, axis=-1, keepdims=True), approx=True)
            acc = acc + jnp.dot(p, vv, preferred_element_type=f32)      # (Nq, D)
        return acc

    def ffn(x, f):
        wi_t = w_ref[OFF_WI + f * D_FF: OFF_WI + (f + 1) * D_FF, :]      # wi^T
        wff = w_ref[OFF_WFF + f * D_FF: OFF_WFF + (f + 1) * D_FF, :]
        h = jax.lax.dot_general(x, wi_t, NT, preferred_element_type=f32)  # (N, Dff)
        h = jnp.maximum(h, 0.0)
        return jnp.dot(h, wff, preferred_element_type=f32)

    # -------------------------------- encoder --------------------------------
    h_enc = x_enc
    n = rmsnorm(h_enc, 0)
    h_enc = h_enc + attention(n, n, 0, (0, 1, 2, 3))
    n = rmsnorm(h_enc, 1)
    h_enc = h_enc + ffn(n, 0)
    enc_out = rmsnorm(h_enc, 2)

    # -------------------------------- decoder --------------------------------
    h_dec = dec_in
    n = rmsnorm(h_dec, 3)
    h_dec = h_dec + attention(n, n, 1, (4, 5, 6, 7))
    n = rmsnorm(h_dec, 4)
    # cross-attn: original forward passes no encoder mask -> only the
    # batch-block bias (row 8), shared by all heads, no rel-pos bias.
    h_dec = h_dec + attention(n, enc_out, 2, (8, 8, 8, 8))
    n = rmsnorm(h_dec, 5)
    h_dec = h_dec + ffn(n, 1)
    dec_out = rmsnorm(h_dec, 6)

    # Tied lm_head: T5's d_model**-0.5 rescale folded in; contraction over E's
    # dim 1 (no transpose); output is (BS, V_PAD=128) -> lane-dense stores.
    out_ref[...] = jax.lax.dot_general(dec_out * (D_MODEL ** -0.5), E, NT,
                                       preferred_element_type=f32)


# --------------------- T5 relative position bias (glue) ----------------------

def _relative_position_bucket(rel_pos, bidirectional, num_buckets, max_distance):
    rel_buckets = jnp.zeros_like(rel_pos)
    if bidirectional:
        num_buckets = num_buckets // 2
        rel_buckets = rel_buckets + (rel_pos > 0).astype(jnp.int32) * num_buckets
        rel_pos = jnp.abs(rel_pos)
    else:
        rel_pos = -jnp.minimum(rel_pos, 0)
    max_exact = num_buckets // 2
    is_small = rel_pos < max_exact
    rp = jnp.maximum(rel_pos, 1).astype(jnp.float32)
    rp_large = max_exact + (
        jnp.log(rp / max_exact) / math.log(max_distance / max_exact)
        * (num_buckets - max_exact)
    ).astype(jnp.int32)
    rp_large = jnp.minimum(rp_large, num_buckets - 1)
    return rel_buckets + jnp.where(is_small, rel_pos, rp_large)


def compute_position_bias(table, q_len, k_len, bidirectional):
    ctx = jnp.arange(q_len)[:, None]
    mem = jnp.arange(k_len)[None, :]
    buckets = _relative_position_bucket(mem - ctx, bidirectional,
                                        NUM_BUCKETS, MAX_DISTANCE)
    values = table[buckets]                              # (q, k, H)
    return jnp.transpose(values, (2, 0, 1))              # (H, q, k)


def build_attention_bias(enc_table, dec_table, src_mask, lbl_mask):
    # TODO(synk): the bucket lookup + tiny bias assembly (a few KiB) stays in
    # plain JAX; everything else runs inside the single fused Pallas kernel.
    f32 = jnp.float32
    B, S = src_mask.shape
    BS = B * S
    pos_enc = compute_position_bias(enc_table, S, S, bidirectional=True)    # (H,S,S)
    pos_dec = compute_position_bias(dec_table, S, S, bidirectional=False)
    idx = jnp.arange(BS)
    same_batch = (idx[:, None] // S) == (idx[None, :] // S)
    block = jnp.where(same_batch, 0.0, NEG_INF).astype(f32)                 # (BS,BS)
    key_src = (1.0 - src_mask.reshape(BS).astype(f32)) * NEG_INF            # (BS,)
    key_lbl = (1.0 - lbl_mask.reshape(BS).astype(f32)) * NEG_INF
    causal = (1.0 - jnp.tile(jnp.tril(jnp.ones((S, S), f32)), (B, B))) * NEG_INF
    enc_b = jnp.tile(pos_enc, (1, B, B)) + key_src[None, None, :] + block[None]
    dec_b = (jnp.tile(pos_dec, (1, B, B)) + key_lbl[None, None, :]
             + causal[None] + block[None])
    cross_b = block[None]
    return jnp.concatenate([enc_b, dec_b, cross_b], axis=0)      # (2H+1, BS, BS)


# ------------------------------- LiGT forward ---------------------------------

def ligt_forward(packed, hashed_2d_l1, hashed_2d_l2, hashed_2d_l3, hashed_2d_l4,
                 input_ids, label_ids, src_attention_mask, label_attention_mask):
    B, S = input_ids.shape
    BS = B * S

    # Integer id table for the fused one-hot embedding matmul.
    ids_top = jnp.stack([input_ids.reshape(BS), hashed_2d_l1.reshape(BS),
                         hashed_2d_l2.reshape(BS), hashed_2d_l3.reshape(BS),
                         hashed_2d_l4.reshape(BS)], axis=-1).astype(jnp.int32)
    ids_bot = jnp.concatenate([label_ids.reshape(BS, 1).astype(jnp.int32),
                               jnp.full((BS, 4), -1, jnp.int32)], axis=-1)
    ids_all = jnp.concatenate([ids_top, ids_bot], axis=0)                 # (2BS, 5)

    bias_all = build_attention_bias(packed["enc_rel_bias"], packed["dec_rel_bias"],
                                    src_attention_mask, label_attention_mask)
    g4 = (jax.nn.sigmoid(packed["scalar2d"]) * 0.25).reshape(1).astype(jnp.float32)

    vmem = lambda: pl.BlockSpec(memory_space=pltpu.MemorySpace.VMEM)
    out = pl.pallas_call(
        _ligt_kernel,
        out_shape=jax.ShapeDtypeStruct((BS, V_PAD), jnp.float32),
        in_specs=[pl.BlockSpec(memory_space=pltpu.MemorySpace.SMEM),
                  vmem(), vmem(), vmem()],
        out_specs=vmem(),
    )(g4, ids_all, bias_all, packed["w_slab"])
    return out[:, :VOCAB].reshape(B, S, VOCAB)


# ------------------------------- parameters -----------------------------------

def init_params(key):
    keys = iter(jax.random.split(key, 32))

    def nrm(shape, scale=0.05):
        return (scale * jax.random.normal(next(keys), shape)).astype(jnp.float32)

    def attn():
        return {"wq": nrm((D_MODEL, N_HEADS * D_KV)),
                "wk": nrm((D_MODEL, N_HEADS * D_KV)),
                "wv": nrm((D_MODEL, N_HEADS * D_KV)),
                "wo": nrm((N_HEADS * D_KV, D_MODEL))}

    return {
        "embedding": nrm((VOCAB, D_MODEL), 0.1),
        "scalar2d": jnp.float32(0.5),
        "enc_rel_bias": nrm((NUM_BUCKETS, N_HEADS)),
        "dec_rel_bias": nrm((NUM_BUCKETS, N_HEADS)),
        "enc_sa": attn(), "dec_sa": attn(), "dec_ca": attn(),
        "enc_wi": nrm((D_MODEL, D_FF)), "enc_wff": nrm((D_FF, D_MODEL)),
        "dec_wi": nrm((D_MODEL, D_FF)), "dec_wff": nrm((D_FF, D_MODEL)),
        # RMSNorm rows: enc_sa, enc_ff, enc_final, dec_sa, dec_ca, dec_ff, dec_final
        "ln": jnp.ones((7, D_MODEL), jnp.float32),
    }


def _fold_attention(att):
    # QK_h = Wq_h Wk_h^T and VO_h = Wv_h Wo_h  (math-equivalent weight folding:
    # scores = x_q QK_h x_k^T, output contribution = P (x_k VO_h)).
    blocks = []
    for h in range(N_HEADS):
        sl = slice(h * D_KV, (h + 1) * D_KV)
        blocks.append(att["wq"][:, sl] @ att["wk"][:, sl].T)      # (D, D)
    for h in range(N_HEADS):
        sl = slice(h * D_KV, (h + 1) * D_KV)
        blocks.append(att["wv"][:, sl] @ att["wo"][sl, :])        # (D, D)
    return jnp.concatenate(blocks, axis=0)                        # (2*H*D, D)


def pack_params(params):
    """One-time packing of every weight into a single row-stacked VMEM slab."""
    emb_pad = jnp.zeros((V_PAD, D_MODEL), jnp.float32).at[:VOCAB].set(
        params["embedding"])
    rows = [emb_pad]
    for name in ("enc_sa", "dec_sa", "dec_ca"):
        rows.append(_fold_attention(params[name]))
    rows.append(params["enc_wi"].T)            # wi stored transposed -> NT matmul
    rows.append(params["dec_wi"].T)
    rows.append(params["enc_wff"])
    rows.append(params["dec_wff"])
    ln_pad = jnp.zeros((8, D_MODEL), jnp.float32).at[:7].set(params["ln"])
    rows.append(ln_pad)
    w_slab = jnp.concatenate(rows, axis=0)
    assert w_slab.shape == (N_W_ROWS, D_MODEL), w_slab.shape
    return {
        "w_slab": w_slab,
        "scalar2d": params["scalar2d"],
        "enc_rel_bias": params["enc_rel_bias"],
        "dec_rel_bias": params["dec_rel_bias"],
    }


# ----------------------------------- main --------------------------------------

if __name__ == "__main__":
    B, S = 2, 8
    root = jax.random.PRNGKey(0)
    kp, k1, k2, k3, k4, k5, k6 = jax.random.split(root, 7)

    params = init_params(kp)
    packed = pack_params(params)          # weight folding / slab packing: once

    input_ids = jax.random.randint(k1, (B, S), 0, VOCAB, jnp.int32)
    label_ids = jax.random.randint(k2, (B, S), 0, VOCAB, jnp.int32)
    hashed_2d_l1 = jax.random.randint(k3, (B, S), 0, VOCAB, jnp.int32)
    hashed_2d_l2 = jax.random.randint(k4, (B, S), 0, VOCAB, jnp.int32)
    hashed_2d_l3 = jax.random.randint(k5, (B, S), 0, VOCAB, jnp.int32)
    hashed_2d_l4 = jax.random.randint(k6, (B, S), 0, VOCAB, jnp.int32)

    src_attention_mask = jnp.ones((B, S), jnp.int32).at[1, -2:].set(0)
    label_attention_mask = jnp.ones((B, S), jnp.int32).at[1, -1:].set(0)

    fwd = jax.jit(ligt_forward)
    logits = fwd(packed, hashed_2d_l1, hashed_2d_l2, hashed_2d_l3, hashed_2d_l4,
                 input_ids, label_ids, src_attention_mask, label_attention_mask)
    jax.block_until_ready(logits)

    assert logits.shape == (B, S, VOCAB), logits.shape
    assert bool(jnp.all(jnp.isfinite(logits)))
    print("KERNEL_OK")
</pallas_src>

<mosaic_0001>
module attributes {stable_mosaic.version = 11 : i64} {
  func.func @_ligt_kernel(%arg0: memref<1xf32, #tpu.memory_space<smem>>, %arg1: memref<32x5xi32, #tpu.memory_space<vmem>>, %arg2: memref<9x16x16xf32, #tpu.memory_space<vmem>>, %arg3: memref<1160x32xf32, #tpu.memory_space<vmem>>, %arg4: memref<16x128xf32, #tpu.memory_space<vmem>>) attributes {dimension_semantics = [], scalar_prefetch = 0 : i64, scratch_operands = 0 : i64, tpu.core_type = #tpu.core_type<tc>} {
    %c0 = arith.constant 0 : index
    %c0_0 = arith.constant 0 : index
    %0 = vector.load %arg1[%c0, %c0_0] : memref<32x5xi32, #tpu.memory_space<vmem>>, vector<32x5xi32>
    %c0_1 = arith.constant 0 : index
    %c0_2 = arith.constant 0 : index
    %1 = vector.load %arg3[%c0_1, %c0_2] : memref<1160x32xf32, #tpu.memory_space<vmem>>, vector<128x32xf32>
    %c1152 = arith.constant 1152 : index
    %c0_3 = arith.constant 0 : index
    %2 = vector.load %arg3[%c1152, %c0_3] : memref<1160x32xf32, #tpu.memory_space<vmem>>, vector<8x32xf32>
    %3 = tpu.iota {dimensions = array<i32: 1>} : vector<32x128xi32>
    %4 = vector.extract_strided_slice %0 {offsets = [0, 0], sizes = [32, 1], strides = [1, 1]} : vector<32x5xi32> to vector<32x1xi32>
    %5 = vector.broadcast %4 : vector<32x1xi32> to vector<32x128xi32>
    %6 = arith.cmpi eq, %3, %5 : vector<32x128xi32>
    %7 = arith.extui %6 : vector<32x128xi1> to vector<32x128xi32>
    %8 = arith.sitofp %7 : vector<32x128xi32> to vector<32x128xf32>
    %9 = vector.extract_strided_slice %0 {offsets = [0, 1], sizes = [32, 1], strides = [1, 1]} : vector<32x5xi32> to vector<32x1xi32>
    %10 = vector.broadcast %9 : vector<32x1xi32> to vector<32x128xi32>
    %11 = arith.cmpi eq, %3, %10 : vector<32x128xi32>
    %12 = arith.extui %11 : vector<32x128xi1> to vector<32x128xi32>
    %13 = arith.sitofp %12 : vector<32x128xi32> to vector<32x128xf32>
    %14 = vector.extract_strided_slice %0 {offsets = [0, 2], sizes = [32, 1], strides = [1, 1]} : vector<32x5xi32> to vector<32x1xi32>
    %15 = vector.broadcast %14 : vector<32x1xi32> to vector<32x128xi32>
    %16 = arith.cmpi eq, %3, %15 : vector<32x128xi32>
    %17 = arith.extui %16 : vector<32x128xi1> to vector<32x128xi32>
    %18 = arith.sitofp %17 : vector<32x128xi32> to vector<32x128xf32>
    %19 = arith.addf %13, %18 : vector<32x128xf32>
    %20 = vector.extract_strided_slice %0 {offsets = [0, 3], sizes = [32, 1], strides = [1, 1]} : vector<32x5xi32> to vector<32x1xi32>
    %21 = vector.broadcast %20 : vector<32x1xi32> to vector<32x128xi32>
    %22 = arith.cmpi eq, %3, %21 : vector<32x128xi32>
    %23 = arith.extui %22 : vector<32x128xi1> to vector<32x128xi32>
    %24 = arith.sitofp %23 : vector<32x128xi32> to vector<32x128xf32>
    %25 = arith.addf %19, %24 : vector<32x128xf32>
    %26 = vector.extract_strided_slice %0 {offsets = [0, 4], sizes = [32, 1], strides = [1, 1]} : vector<32x5xi32> to vector<32x1xi32>
    %27 = vector.broadcast %26 : vector<32x1xi32> to vector<32x128xi32>
    %28 = arith.cmpi eq, %3, %27 : vector<32x128xi32>
    %29 = arith.extui %28 : vector<32x128xi1> to vector<32x128xi32>
    %30 = arith.sitofp %29 : vector<32x128xi32> to vector<32x128xf32>
    %31 = arith.addf %25, %30 : vector<32x128xf32>
    %c0_4 = arith.constant 0 : index
    %32 = memref.load %arg0[%c0_4] : memref<1xf32, #tpu.memory_space<smem>>
    %33 = vector.broadcast %32 : f32 to vector<32x128xf32>
    %34 = arith.mulf %31, %33 : vector<32x128xf32>
    %35 = arith.addf %8, %34 : vector<32x128xf32>
    %cst = arith.constant dense<0.000000e+00> : vector<32x32xf32>
    %36 = tpu.matmul %35, %1, %cst {dimension_numbers = #tpu.dot_dimension_numbers<[1], [0], [0], [1], [0, 0, 1, 1], [], []>} : vector<32x128xf32>, vector<128x32xf32>, vector<32x32xf32> -> vector<32x32xf32>
    %37 = vector.extract_strided_slice %36 {offsets = [0, 0], sizes = [16, 32], strides = [1, 1]} : vector<32x32xf32> to vector<16x32xf32>
    %38 = vector.extract_strided_slice %36 {offsets = [16, 0], sizes = [16, 32], strides = [1, 1]} : vector<32x32xf32> to vector<16x32xf32>
    %39 = vector.extract_strided_slice %2 {offsets = [0, 0], sizes = [1, 32], strides = [1, 1]} : vector<8x32xf32> to vector<1x32xf32>
    %40 = arith.mulf %37, %37 : vector<16x32xf32>
    %cst_5 = arith.constant dense<0.000000e+00> : vector<16xf32>
    %41 = vector.multi_reduction <add>, %40, %cst_5 [1] : vector<16x32xf32> to vector<16xf32>
    %42 = vector.shape_cast %41 : vector<16xf32> to vector<16x1xf32>
    %cst_6 = arith.constant 3.200000e+01 : f32
    %43 = vector.broadcast %cst_6 : f32 to vector<16x1xf32>
    %44 = arith.divf %42, %43 : vector<16x1xf32>
    %cst_7 = arith.constant 9.99999997E-7 : f32
    %45 = vector.broadcast %cst_7 : f32 to vector<16x1xf32>
    %46 = arith.addf %44, %45 : vector<16x1xf32>
    %47 = math.rsqrt %46 : vector<16x1xf32>
    %48 = vector.broadcast %47 : vector<16x1xf32> to vector<16x32xf32>
    %49 = arith.mulf %37, %48 : vector<16x32xf32>
    %50 = vector.broadcast %39 : vector<1x32xf32> to vector<16x32xf32>
    %51 = arith.mulf %49, %50 : vector<16x32xf32>
    %cst_8 = arith.constant 0.000000e+00 : f32
    %52 = vector.broadcast %cst_8 : f32 to vector<16x32xf32>
    %c128 = arith.constant 128 : index
    %c0_9 = arith.constant 0 : index
    %53 = vector.load %arg3[%c128, %c0_9] : memref<1160x32xf32, #tpu.memory_space<vmem>>, vector<32x32xf32>
    %c256 = arith.constant 256 : index
    %c0_10 = arith.constant 0 : index
    %54 = vector.load %arg3[%c256, %c0_10] : memref<1160x32xf32, #tpu.memory_space<vmem>>, vector<32x32xf32>
    %cst_11 = arith.constant dense<0.000000e+00> : vector<16x32xf32>
    %55 = tpu.matmul %51, %53, %cst_11 {dimension_numbers = #tpu.dot_dimension_numbers<[1], [0], [0], [1], [0, 0, 1, 1], [], []>} : vector<16x32xf32>, vector<32x32xf32>, vector<16x32xf32> -> vector<16x32xf32>
    %cst_12 = arith.constant dense<0.000000e+00> : vector<16x32xf32>
    %56 = tpu.matmul %51, %54, %cst_12 {dimension_numbers = #tpu.dot_dimension_numbers<[1], [0], [0], [1], [0, 0, 1, 1], [], []>} : vector<16x32xf32>, vector<32x32xf32>, vector<16x32xf32> -> vector<16x32xf32>
    %cst_13 = arith.constant dense<0.000000e+00> : vector<16x16xf32>
    %57 = tpu.matmul %55, %51, %cst_13 {dimension_numbers = #tpu.dot_dimension_numbers<[1], [1], [0], [0], [0, 0, 1, 0], [], []>} : vector<16x32xf32>, vector<16x32xf32>, vector<16x16xf32> -> vector<16x16xf32>
    %c0_14 = arith.constant 0 : index
    %c0_15 = arith.constant 0 : index
    %c0_16 = arith.constant 0 : index
    %58 = vector.load %arg2[%c0_14, %c0_15, %c0_16] : memref<9x16x16xf32, #tpu.memory_space<vmem>>, vector<1x16x16xf32>
    %59 = vector.shape_cast %58 : vector<1x16x16xf32> to vector<16x16xf32>
    %60 = arith.addf %57, %59 : vector<16x16xf32>
    %cst_17 = arith.constant dense<0xFF800000> : vector<16xf32>
    %61 = vector.multi_reduction <maximumf>, %60, %cst_17 [1] : vector<16x16xf32> to vector<16xf32>
    %62 = vector.shape_cast %61 : vector<16xf32> to vector<16x1xf32>
    %63 = vector.broadcast %62 : vector<16x1xf32> to vector<16x16xf32>
    %64 = arith.subf %60, %63 : vector<16x16xf32>
    %65 = math.exp %64 : vector<16x16xf32>
    %cst_18 = arith.constant dense<0.000000e+00> : vector<16xf32>
    %66 = vector.multi_reduction <add>, %65, %cst_18 [1] : vector<16x16xf32> to vector<16xf32>
    %67 = vector.shape_cast %66 : vector<16xf32> to vector<16x1xf32>
    %68 = tpu.reciprocal %67 {approx = true} : vector<16x1xf32> -> vector<16x1xf32>
    %69 = vector.broadcast %68 : vector<16x1xf32> to vector<16x16xf32>
    %70 = arith.mulf %65, %69 : vector<16x16xf32>
    %cst_19 = arith.constant dense<0.000000e+00> : vector<16x32xf32>
    %71 = tpu.matmul %70, %56, %cst_19 {dimension_numbers = #tpu.dot_dimension_numbers<[1], [0], [0], [1], [0, 0, 1, 1], [], []>} : vector<16x16xf32>, vector<16x32xf32>, vector<16x32xf32> -> vector<16x32xf32>
    %72 = arith.addf %52, %71 : vector<16x32xf32>
    %c160 = arith.constant 160 : index
    %c0_20 = arith.constant 0 : index
    %73 = vector.load %arg3[%c160, %c0_20] : memref<1160x32xf32, #tpu.memory_space<vmem>>, vector<32x32xf32>
    %c288 = arith.constant 288 : index
    %c0_21 = arith.constant 0 : index
    %74 = vector.load %arg3[%c288, %c0_21] : memref<1160x32xf32, #tpu.memory_space<vmem>>, vector<32x32xf32>
    %cst_22 = arith.constant dense<0.000000e+00> : vector<16x32xf32>
    %75 = tpu.matmul %51, %73, %cst_22 {dimension_numbers = #tpu.dot_dimension_numbers<[1], [0], [0], [1], [0, 0, 1, 1], [], []>} : vector<16x32xf32>, vector<32x32xf32>, vector<16x32xf32> -> vector<16x32xf32>
    %cst_23 = arith.constant dense<0.000000e+00> : vector<16x32xf32>
    %76 = tpu.matmul %51, %74, %cst_23 {dimension_numbers = #tpu.dot_dimension_numbers<[1], [0], [0], [1], [0, 0, 1, 1], [], []>} : vector<16x32xf32>, vector<32x32xf32>, vector<16x32xf32> -> vector<16x32xf32>
    %cst_24 = arith.constant dense<0.000000e+00> : vector<16x16xf32>
    %77 = tpu.matmul %75, %51, %cst_24 {dimension_numbers = #tpu.dot_dimension_numbers<[1], [1], [0], [0], [0, 0, 1, 0], [], []>} : vector<16x32xf32>, vector<16x32xf32>, vector<16x16xf32> -> vector<16x16xf32>
    %c1 = arith.constant 1 : index
    %c0_25 = arith.constant 0 : index
    %c0_26 = arith.constant 0 : index
    %78 = vector.load %arg2[%c1, %c0_25, %c0_26] : memref<9x16x16xf32, #tpu.memory_space<vmem>>, vector<1x16x16xf32>
    %79 = vector.shape_cast %78 : vector<1x16x16xf32> to vector<16x16xf32>
    %80 = arith.addf %77, %79 : vector<16x16xf32>
    %cst_27 = arith.constant dense<0xFF800000> : vector<16xf32>
    %81 = vector.multi_reduction <maximumf>, %80, %cst_27 [1] : vector<16x16xf32> to vector<16xf32>
    %82 = vector.shape_cast %81 : vector<16xf32> to vector<16x1xf32>
    %83 = vector.broadcast %82 : vector<16x1xf32> to vector<16x16xf32>
    %84 = arith.subf %80, %83 : vector<16x16xf32>
    %85 = math.exp %84 : vector<16x16xf32>
    %cst_28 = arith.constant dense<0.000000e+00> : vector<16xf32>
    %86 = vector.multi_reduction <add>, %85, %cst_28 [1] : vector<16x16xf32> to vector<16xf32>
    %87 = vector.shape_cast %86 : vector<16xf32> to vector<16x1xf32>
    %88 = tpu.reciprocal %87 {approx = true} : vector<16x1xf32> -> vector<16x1xf32>
    %89 = vector.broadcast %88 : vector<16x1xf32> to vector<16x16xf32>
    %90 = arith.mulf %85, %89 : vector<16x16xf32>
    %cst_29 = arith.constant dense<0.000000e+00> : vector<16x32xf32>
    %91 = tpu.matmul %90, %76, %cst_29 {dimension_numbers = #tpu.dot_dimension_numbers<[1], [0], [0], [1], [0, 0, 1, 1], [], []>} : vector<16x16xf32>, vector<16x32xf32>, vector<16x32xf32> -> vector<16x32xf32>
    %92 = arith.addf %72, %91 : vector<16x32xf32>
    %c192 = arith.constant 192 : index
    %c0_30 = arith.constant 0 : index
    %93 = vector.load %arg3[%c192, %c0_30] : memref<1160x32xf32, #tpu.memory_space<vmem>>, vector<32x32xf32>
    %c320 = arith.constant 320 : index
    %c0_31 = arith.constant 0 : index
    %94 = vector.load %arg3[%c320, %c0_31] : memref<1160x32xf32, #tpu.memory_space<vmem>>, vector<32x32xf32>
    %cst_32 = arith.constant dense<0.000000e+00> : vector<16x32xf32>
    %95 = tpu.matmul %51, %93, %cst_32 {dimension_numbers = #tpu.dot_dimension_numbers<[1], [0], [0], [1], [0, 0, 1, 1], [], []>} : vector<16x32xf32>, vector<32x32xf32>, vector<16x32xf32> -> vector<16x32xf32>
    %cst_33 = arith.constant dense<0.000000e+00> : vector<16x32xf32>
    %96 = tpu.matmul %51, %94, %cst_33 {dimension_numbers = #tpu.dot_dimension_numbers<[1], [0], [0], [1], [0, 0, 1, 1], [], []>} : vector<16x32xf32>, vector<32x32xf32>, vector<16x32xf32> -> vector<16x32xf32>
    %cst_34 = arith.constant dense<0.000000e+00> : vector<16x16xf32>
    %97 = tpu.matmul %95, %51, %cst_34 {dimension_numbers = #tpu.dot_dimension_numbers<[1], [1], [0], [0], [0, 0, 1, 0], [], []>} : vector<16x32xf32>, vector<16x32xf32>, vector<16x16xf32> -> vector<16x16xf32>
    %c2 = arith.constant 2 : index
    %c0_35 = arith.constant 0 : index
    %c0_36 = arith.constant 0 : index
    %98 = vector.load %arg2[%c2, %c0_35, %c0_36] : memref<9x16x16xf32, #tpu.memory_space<vmem>>, vector<1x16x16xf32>
    %99 = vector.shape_cast %98 : vector<1x16x16xf32> to vector<16x16xf32>
    %100 = arith.addf %97, %99 : vector<16x16xf32>
    %cst_37 = arith.constant dense<0xFF800000> : vector<16xf32>
    %101 = vector.multi_reduction <maximumf>, %100, %cst_37 [1] : vector<16x16xf32> to vector<16xf32>
    %102 = vector.shape_cast %101 : vector<16xf32> to vector<16x1xf32>
    %103 = vector.broadcast %102 : vector<16x1xf32> to vector<16x16xf32>
    %104 = arith.subf %100, %103 : vector<16x16xf32>
    %105 = math.exp %104 : vector<16x16xf32>
    %cst_38 = arith.constant dense<0.000000e+00> : vector<16xf32>
    %106 = vector.multi_reduction <add>, %105, %cst_38 [1] : vector<16x16xf32> to vector<16xf32>
    %107 = vector.shape_cast %106 : vector<16xf32> to vector<16x1xf32>
    %108 = tpu.reciprocal %107 {approx = true} : vector<16x1xf32> -> vector<16x1xf32>
    %109 = vector.broadcast %108 : vector<16x1xf32> to vector<16x16xf32>
    %110 = arith.mulf %105, %109 : vector<16x16xf32>
    %cst_39 = arith.constant dense<0.000000e+00> : vector<16x32xf32>
    %111 = tpu.matmul %110, %96, %cst_39 {dimension_numbers = #tpu.dot_dimension_numbers<[1], [0], [0], [1], [0, 0, 1, 1], [], []>} : vector<16x16xf32>, vector<16x32xf32>, vector<16x32xf32> -> vector<16x32xf32>
    %112 = arith.addf %92, %111 : vector<16x32xf32>
    %c224 = arith.constant 224 : index
    %c0_40 = arith.constant 0 : index
    %113 = vector.load %arg3[%c224, %c0_40] : memref<1160x32xf32, #tpu.memory_space<vmem>>, vector<32x32xf32>
    %c352 = arith.constant 352 : index
    %c0_41 = arith.constant 0 : index
    %114 = vector.load %arg3[%c352, %c0_41] : memref<1160x32xf32, #tpu.memory_space<vmem>>, vector<32x32xf32>
    %cst_42 = arith.constant dense<0.000000e+00> : vector<16x32xf32>
    %115 = tpu.matmul %51, %113, %cst_42 {dimension_numbers = #tpu.dot_dimension_numbers<[1], [0], [0], [1], [0, 0, 1, 1], [], []>} : vector<16x32xf32>, vector<32x32xf32>, vector<16x32xf32> -> vector<16x32xf32>
    %cst_43 = arith.constant dense<0.000000e+00> : vector<16x32xf32>
    %116 = tpu.matmul %51, %114, %cst_43 {dimension_numbers = #tpu.dot_dimension_numbers<[1], [0], [0], [1], [0, 0, 1, 1], [], []>} : vector<16x32xf32>, vector<32x32xf32>, vector<16x32xf32> -> vector<16x32xf32>
    %cst_44 = arith.constant dense<0.000000e+00> : vector<16x16xf32>
    %117 = tpu.matmul %115, %51, %cst_44 {dimension_numbers = #tpu.dot_dimension_numbers<[1], [1], [0], [0], [0, 0, 1, 0], [], []>} : vector<16x32xf32>, vector<16x32xf32>, vector<16x16xf32> -> vector<16x16xf32>
    %c3 = arith.constant 3 : index
    %c0_45 = arith.constant 0 : index
    %c0_46 = arith.constant 0 : index
    %118 = vector.load %arg2[%c3, %c0_45, %c0_46] : memref<9x16x16xf32, #tpu.memory_space<vmem>>, vector<1x16x16xf32>
    %119 = vector.shape_cast %118 : vector<1x16x16xf32> to vector<16x16xf32>
    %120 = arith.addf %117, %119 : vector<16x16xf32>
    %cst_47 = arith.constant dense<0xFF800000> : vector<16xf32>
    %121 = vector.multi_reduction <maximumf>, %120, %cst_47 [1] : vector<16x16xf32> to vector<16xf32>
    %122 = vector.shape_cast %121 : vector<16xf32> to vector<16x1xf32>
    %123 = vector.broadcast %122 : vector<16x1xf32> to vector<16x16xf32>
    %124 = arith.subf %120, %123 : vector<16x16xf32>
    %125 = math.exp %124 : vector<16x16xf32>
    %cst_48 = arith.constant dense<0.000000e+00> : vector<16xf32>
    %126 = vector.multi_reduction <add>, %125, %cst_48 [1] : vector<16x16xf32> to vector<16xf32>
    %127 = vector.shape_cast %126 : vector<16xf32> to vector<16x1xf32>
    %128 = tpu.reciprocal %127 {approx = true} : vector<16x1xf32> -> vector<16x1xf32>
    %129 = vector.broadcast %128 : vector<16x1xf32> to vector<16x16xf32>
    %130 = arith.mulf %125, %129 : vector<16x16xf32>
    %cst_49 = arith.constant dense<0.000000e+00> : vector<16x32xf32>
    %131 = tpu.matmul %130, %116, %cst_49 {dimension_numbers = #tpu.dot_dimension_numbers<[1], [0], [0], [1], [0, 0, 1, 1], [], []>} : vector<16x16xf32>, vector<16x32xf32>, vector<16x32xf32> -> vector<16x32xf32>
    %132 = arith.addf %112, %131 : vector<16x32xf32>
    %133 = arith.addf %37, %132 : vector<16x32xf32>
    %134 = vector.extract_strided_slice %2 {offsets = [1, 0], sizes = [1, 32], strides = [1, 1]} : vector<8x32xf32> to vector<1x32xf32>
    %135 = arith.mulf %133, %133 : vector<16x32xf32>
    %cst_50 = arith.constant dense<0.000000e+00> : vector<16xf32>
    %136 = vector.multi_reduction <add>, %135, %cst_50 [1] : vector<16x32xf32> to vector<16xf32>
    %137 = vector.shape_cast %136 : vector<16xf32> to vector<16x1xf32>
    %cst_51 = arith.constant 3.200000e+01 : f32
    %138 = vector.broadcast %cst_51 : f32 to vector<16x1xf32>
    %139 = arith.divf %137, %138 : vector<16x1xf32>
    %cst_52 = arith.constant 9.99999997E-7 : f32
    %140 = vector.broadcast %cst_52 : f32 to vector<16x1xf32>
    %141 = arith.addf %139, %140 : vector<16x1xf32>
    %142 = math.rsqrt %141 : vector<16x1xf32>
    %143 = vector.broadcast %142 : vector<16x1xf32> to vector<16x32xf32>
    %144 = arith.mulf %133, %143 : vector<16x32xf32>
    %145 = vector.broadcast %134 : vector<1x32xf32> to vector<16x32xf32>
    %146 = arith.mulf %144, %145 : vector<16x32xf32>
    %c896 = arith.constant 896 : index
    %c0_53 = arith.constant 0 : index
    %147 = vector.load %arg3[%c896, %c0_53] : memref<1160x32xf32, #tpu.memory_space<vmem>>, vector<64x32xf32>
    %c1024 = arith.constant 1024 : index
    %c0_54 = arith.constant 0 : index
    %148 = vector.load %arg3[%c1024, %c0_54] : memref<1160x32xf32, #tpu.memory_space<vmem>>, vector<64x32xf32>
    %cst_55 = arith.constant dense<0.000000e+00> : vector<16x64xf32>
    %149 = tpu.matmul %146, %147, %cst_55 {dimension_numbers = #tpu.dot_dimension_numbers<[1], [1], [0], [0], [0, 0, 1, 0], [], []>} : vector<16x32xf32>, vector<64x32xf32>, vector<16x64xf32> -> vector<16x64xf32>
    %cst_56 = arith.constant 0.000000e+00 : f32
    %150 = vector.broadcast %cst_56 : f32 to vector<16x64xf32>
    %151 = arith.maximumf %149, %150 : vector<16x64xf32>
    %cst_57 = arith.constant dense<0.000000e+00> : vector<16x32xf32>
    %152 = tpu.matmul %151, %148, %cst_57 {dimension_numbers = #tpu.dot_dimension_numbers<[1], [0], [0], [1], [0, 0, 1, 1], [], []>} : vector<16x64xf32>, vector<64x32xf32>, vector<16x32xf32> -> vector<16x32xf32>
    %153 = arith.addf %133, %152 : vector<16x32xf32>
    %154 = vector.extract_strided_slice %2 {offsets = [2, 0], sizes = [1, 32], strides = [1, 1]} : vector<8x32xf32> to vector<1x32xf32>
    %155 = arith.mulf %153, %153 : vector<16x32xf32>
    %cst_58 = arith.constant dense<0.000000e+00> : vector<16xf32>
    %156 = vector.multi_reduction <add>, %155, %cst_58 [1] : vector<16x32xf32> to vector<16xf32>
    %157 = vector.shape_cast %156 : vector<16xf32> to vector<16x1xf32>
    %cst_59 = arith.constant 3.200000e+01 : f32
    %158 = vector.broadcast %cst_59 : f32 to vector<16x1xf32>
    %159 = arith.divf %157, %158 : vector<16x1xf32>
    %cst_60 = arith.constant 9.99999997E-7 : f32
    %160 = vector.broadcast %cst_60 : f32 to vector<16x1xf32>
    %161 = arith.addf %159, %160 : vector<16x1xf32>
    %162 = math.rsqrt %161 : vector<16x1xf32>
    %163 = vector.broadcast %162 : vector<16x1xf32> to vector<16x32xf32>
    %164 = arith.mulf %153, %163 : vector<16x32xf32>
    %165 = vector.broadcast %154 : vector<1x32xf32> to vector<16x32xf32>
    %166 = arith.mulf %164, %165 : vector<16x32xf32>
    %167 = vector.extract_strided_slice %2 {offsets = [3, 0], sizes = [1, 32], strides = [1, 1]} : vector<8x32xf32> to vector<1x32xf32>
    %168 = arith.mulf %38, %38 : vector<16x32xf32>
    %cst_61 = arith.constant dense<0.000000e+00> : vector<16xf32>
    %169 = vector.multi_reduction <add>, %168, %cst_61 [1] : vector<16x32xf32> to vector<16xf32>
    %170 = vector.shape_cast %169 : vector<16xf32> to vector<16x1xf32>
    %cst_62 = arith.constant 3.200000e+01 : f32
    %171 = vector.broadcast %cst_62 : f32 to vector<16x1xf32>
    %172 = arith.divf %170, %171 : vector<16x1xf32>
    %cst_63 = arith.constant 9.99999997E-7 : f32
    %173 = vector.broadcast %cst_63 : f32 to vector<16x1xf32>
    %174 = arith.addf %172, %173 : vector<16x1xf32>
    %175 = math.rsqrt %174 : vector<16x1xf32>
    %176 = vector.broadcast %175 : vector<16x1xf32> to vector<16x32xf32>
    %177 = arith.mulf %38, %176 : vector<16x32xf32>
    %178 = vector.broadcast %167 : vector<1x32xf32> to vector<16x32xf32>
    %179 = arith.mulf %177, %178 : vector<16x32xf32>
    %cst_64 = arith.constant 0.000000e+00 : f32
    %180 = vector.broadcast %cst_64 : f32 to vector<16x32xf32>
    %c384 = arith.constant 384 : index
    %c0_65 = arith.constant 0 : index
    %181 = vector.load %arg3[%c384, %c0_65] : memref<1160x32xf32, #tpu.memory_space<vmem>>, vector<32x32xf32>
    %c512 = arith.constant 512 : index
    %c0_66 = arith.constant 0 : index
    %182 = vector.load %arg3[%c512, %c0_66] : memref<1160x32xf32, #tpu.memory_space<vmem>>, vector<32x32xf32>
    %cst_67 = arith.constant dense<0.000000e+00> : vector<16x32xf32>
    %183 = tpu.matmul %179, %181, %cst_67 {dimension_numbers = #tpu.dot_dimension_numbers<[1], [0], [0], [1], [0, 0, 1, 1], [], []>} : vector<16x32xf32>, vector<32x32xf32>, vector<16x32xf32> -> vector<16x32xf32>
    %cst_68 = arith.constant dense<0.000000e+00> : vector<16x32xf32>
    %184 = tpu.matmul %179, %182, %cst_68 {dimension_numbers = #tpu.dot_dimension_numbers<[1], [0], [0], [1], [0, 0, 1, 1], [], []>} : vector<16x32xf32>, vector<32x32xf32>, vector<16x32xf32> -> vector<16x32xf32>
    %cst_69 = arith.constant dense<0.000000e+00> : vector<16x16xf32>
    %185 = tpu.matmul %183, %179, %cst_69 {dimension_numbers = #tpu.dot_dimension_numbers<[1], [1], [0], [0], [0, 0, 1, 0], [], []>} : vector<16x32xf32>, vector<16x32xf32>, vector<16x16xf32> -> vector<16x16xf32>
    %c4 = arith.constant 4 : index
    %c0_70 = arith.constant 0 : index
    %c0_71 = arith.constant 0 : index
    %186 = vector.load %arg2[%c4, %c0_70, %c0_71] : memref<9x16x16xf32, #tpu.memory_space<vmem>>, vector<1x16x16xf32>
    %187 = vector.shape_cast %186 : vector<1x16x16xf32> to vector<16x16xf32>
    %188 = arith.addf %185, %187 : vector<16x16xf32>
    %cst_72 = arith.constant dense<0xFF800000> : vector<16xf32>
    %189 = vector.multi_reduction <maximumf>, %188, %cst_72 [1] : vector<16x16xf32> to vector<16xf32>
    %190 = vector.shape_cast %189 : vector<16xf32> to vector<16x1xf32>
    %191 = vector.broadcast %190 : vector<16x1xf32> to vector<16x16xf32>
    %192 = arith.subf %188, %191 : vector<16x16xf32>
    %193 = math.exp %192 : vector<16x16xf32>
    %cst_73 = arith.constant dense<0.000000e+00> : vector<16xf32>
    %194 = vector.multi_reduction <add>, %193, %cst_73 [1] : vector<16x16xf32> to vector<16xf32>
    %195 = vector.shape_cast %194 : vector<16xf32> to vector<16x1xf32>
    %196 = tpu.reciprocal %195 {approx = true} : vector<16x1xf32> -> vector<16x1xf32>
    %197 = vector.broadcast %196 : vector<16x1xf32> to vector<16x16xf32>
    %198 = arith.mulf %193, %197 : vector<16x16xf32>
    %cst_74 = arith.constant dense<0.000000e+00> : vector<16x32xf32>
    %199 = tpu.matmul %198, %184, %cst_74 {dimension_numbers = #tpu.dot_dimension_numbers<[1], [0], [0], [1], [0, 0, 1, 1], [], []>} : vector<16x16xf32>, vector<16x32xf32>, vector<16x32xf32> -> vector<16x32xf32>
    %200 = arith.addf %180, %199 : vector<16x32xf32>
    %c416 = arith.constant 416 : index
    %c0_75 = arith.constant 0 : index
    %201 = vector.load %arg3[%c416, %c0_75] : memref<1160x32xf32, #tpu.memory_space<vmem>>, vector<32x32xf32>
    %c544 = arith.constant 544 : index
    %c0_76 = arith.constant 0 : index
    %202 = vector.load %arg3[%c544, %c0_76] : memref<1160x32xf32, #tpu.memory_space<vmem>>, vector<32x32xf32>
    %cst_77 = arith.constant dense<0.000000e+00> : vector<16x32xf32>
    %203 = tpu.matmul %179, %201, %cst_77 {dimension_numbers = #tpu.dot_dimension_numbers<[1], [0], [0], [1], [0, 0, 1, 1], [], []>} : vector<16x32xf32>, vector<32x32xf32>, vector<16x32xf32> -> vector<16x32xf32>
    %cst_78 = arith.constant dense<0.000000e+00> : vector<16x32xf32>
    %204 = tpu.matmul %179, %202, %cst_78 {dimension_numbers = #tpu.dot_dimension_numbers<[1], [0], [0], [1], [0, 0, 1, 1], [], []>} : vector<16x32xf32>, vector<32x32xf32>, vector<16x32xf32> -> vector<16x32xf32>
    %cst_79 = arith.constant dense<0.000000e+00> : vector<16x16xf32>
    %205 = tpu.matmul %203, %179, %cst_79 {dimension_numbers = #tpu.dot_dimension_numbers<[1], [1], [0], [0], [0, 0, 1, 0], [], []>} : vector<16x32xf32>, vector<16x32xf32>, vector<16x16xf32> -> vector<16x16xf32>
    %c5 = arith.constant 5 : index
    %c0_80 = arith.constant 0 : index
    %c0_81 = arith.constant 0 : index
    %206 = vector.load %arg2[%c5, %c0_80, %c0_81] : memref<9x16x16xf32, #tpu.memory_space<vmem>>, vector<1x16x16xf32>
    %207 = vector.shape_cast %206 : vector<1x16x16xf32> to vector<16x16xf32>
    %208 = arith.addf %205, %207 : vector<16x16xf32>
    %cst_82 = arith.constant dense<0xFF800000> : vector<16xf32>
    %209 = vector.multi_reduction <maximumf>, %208, %cst_82 [1] : vector<16x16xf32> to vector<16xf32>
    %210 = vector.shape_cast %209 : vector<16xf32> to vector<16x1xf32>
    %211 = vector.broadcast %210 : vector<16x1xf32> to vector<16x16xf32>
    %212 = arith.subf %208, %211 : vector<16x16xf32>
    %213 = math.exp %212 : vector<16x16xf32>
    %cst_83 = arith.constant dense<0.000000e+00> : vector<16xf32>
    %214 = vector.multi_reduction <add>, %213, %cst_83 [1] : vector<16x16xf32> to vector<16xf32>
    %215 = vector.shape_cast %214 : vector<16xf32> to vector<16x1xf32>
    %216 = tpu.reciprocal %215 {approx = true} : vector<16x1xf32> -> vector<16x1xf32>
    %217 = vector.broadcast %216 : vector<16x1xf32> to vector<16x16xf32>
    %218 = arith.mulf %213, %217 : vector<16x16xf32>
    %cst_84 = arith.constant dense<0.000000e+00> : vector<16x32xf32>
    %219 = tpu.matmul %218, %204, %cst_84 {dimension_numbers = #tpu.dot_dimension_numbers<[1], [0], [0], [1], [0, 0, 1, 1], [], []>} : vector<16x16xf32>, vector<16x32xf32>, vector<16x32xf32> -> vector<16x32xf32>
    %220 = arith.addf %200, %219 : vector<16x32xf32>
    %c448 = arith.constant 448 : index
    %c0_85 = arith.constant 0 : index
    %221 = vector.load %arg3[%c448, %c0_85] : memref<1160x32xf32, #tpu.memory_space<vmem>>, vector<32x32xf32>
    %c576 = arith.constant 576 : index
    %c0_86 = arith.constant 0 : index
    %222 = vector.load %arg3[%c576, %c0_86] : memref<1160x32xf32, #tpu.memory_space<vmem>>, vector<32x32xf32>
    %cst_87 = arith.constant dense<0.000000e+00> : vector<16x32xf32>
    %223 = tpu.matmul %179, %221, %cst_87 {dimension_numbers = #tpu.dot_dimension_numbers<[1], [0], [0], [1], [0, 0, 1, 1], [], []>} : vector<16x32xf32>, vector<32x32xf32>, vector<16x32xf32> -> vector<16x32xf32>
    %cst_88 = arith.constant dense<0.000000e+00> : vector<16x32xf32>
    %224 = tpu.matmul %179, %222, %cst_88 {dimension_numbers = #tpu.dot_dimension_numbers<[1], [0], [0], [1], [0, 0, 1, 1], [], []>} : vector<16x32xf32>, vector<32x32xf32>, vector<16x32xf32> -> vector<16x32xf32>
    %cst_89 = arith.constant dense<0.000000e+00> : vector<16x16xf32>
    %225 = tpu.matmul %223, %179, %cst_89 {dimension_numbers = #tpu.dot_dimension_numbers<[1], [1], [0], [0], [0, 0, 1, 0], [], []>} : vector<16x32xf32>, vector<16x32xf32>, vector<16x16xf32> -> vector<16x16xf32>
    %c6 = arith.constant 6 : index
    %c0_90 = arith.constant 0 : index
    %c0_91 = arith.constant 0 : index
    %226 = vector.load %arg2[%c6, %c0_90, %c0_91] : memref<9x16x16xf32, #tpu.memory_space<vmem>>, vector<1x16x16xf32>
    %227 = vector.shape_cast %226 : vector<1x16x16xf32> to vector<16x16xf32>
    %228 = arith.addf %225, %227 : vector<16x16xf32>
    %cst_92 = arith.constant dense<0xFF800000> : vector<16xf32>
    %229 = vector.multi_reduction <maximumf>, %228, %cst_92 [1] : vector<16x16xf32> to vector<16xf32>
    %230 = vector.shape_cast %229 : vector<16xf32> to vector<16x1xf32>
    %231 = vector.broadcast %230 : vector<16x1xf32> to vector<16x16xf32>
    %232 = arith.subf %228, %231 : vector<16x16xf32>
    %233 = math.exp %232 : vector<16x16xf32>
    %cst_93 = arith.constant dense<0.000000e+00> : vector<16xf32>
    %234 = vector.multi_reduction <add>, %233, %cst_93 [1] : vector<16x16xf32> to vector<16xf32>
    %235 = vector.shape_cast %234 : vector<16xf32> to vector<16x1xf32>
    %236 = tpu.reciprocal %235 {approx = true} : vector<16x1xf32> -> vector<16x1xf32>
    %237 = vector.broadcast %236 : vector<16x1xf32> to vector<16x16xf32>
    %238 = arith.mulf %233, %237 : vector<16x16xf32>
    %cst_94 = arith.constant dense<0.000000e+00> : vector<16x32xf32>
    %239 = tpu.matmul %238, %224, %cst_94 {dimension_numbers = #tpu.dot_dimension_numbers<[1], [0], [0], [1], [0, 0, 1, 1], [], []>} : vector<16x16xf32>, vector<16x32xf32>, vector<16x32xf32> -> vector<16x32xf32>
    %240 = arith.addf %220, %239 : vector<16x32xf32>
    %c480 = arith.constant 480 : index
    %c0_95 = arith.constant 0 : index
    %241 = vector.load %arg3[%c480, %c0_95] : memref<1160x32xf32, #tpu.memory_space<vmem>>, vector<32x32xf32>
    %c608 = arith.constant 608 : index
    %c0_96 = arith.constant 0 : index
    %242 = vector.load %arg3[%c608, %c0_96] : memref<1160x32xf32, #tpu.memory_space<vmem>>, vector<32x32xf32>
    %cst_97 = arith.constant dense<0.000000e+00> : vector<16x32xf32>
    %243 = tpu.matmul %179, %241, %cst_97 {dimension_numbers = #tpu.dot_dimension_numbers<[1], [0], [0], [1], [0, 0, 1, 1], [], []>} : vector<16x32xf32>, vector<32x32xf32>, vector<16x32xf32> -> vector<16x32xf32>
    %cst_98 = arith.constant dense<0.000000e+00> : vector<16x32xf32>
    %244 = tpu.matmul %179, %242, %cst_98 {dimension_numbers = #tpu.dot_dimension_numbers<[1], [0], [0], [1], [0, 0, 1, 1], [], []>} : vector<16x32xf32>, vector<32x32xf32>, vector<16x32xf32> -> vector<16x32xf32>
    %cst_99 = arith.constant dense<0.000000e+00> : vector<16x16xf32>
    %245 = tpu.matmul %243, %179, %cst_99 {dimension_numbers = #tpu.dot_dimension_numbers<[1], [1], [0], [0], [0, 0, 1, 0], [], []>} : vector<16x32xf32>, vector<16x32xf32>, vector<16x16xf32> -> vector<16x16xf32>
    %c7 = arith.constant 7 : index
    %c0_100 = arith.constant 0 : index
    %c0_101 = arith.constant 0 : index
    %246 = vector.load %arg2[%c7, %c0_100, %c0_101] : memref<9x16x16xf32, #tpu.memory_space<vmem>>, vector<1x16x16xf32>
    %247 = vector.shape_cast %246 : vector<1x16x16xf32> to vector<16x16xf32>
    %248 = arith.addf %245, %247 : vector<16x16xf32>
    %cst_102 = arith.constant dense<0xFF800000> : vector<16xf32>
    %249 = vector.multi_reduction <maximumf>, %248, %cst_102 [1] : vector<16x16xf32> to vector<16xf32>
    %250 = vector.shape_cast %249 : vector<16xf32> to vector<16x1xf32>
    %251 = vector.broadcast %250 : vector<16x1xf32> to vector<16x16xf32>
    %252 = arith.subf %248, %251 : vector<16x16xf32>
    %253 = math.exp %252 : vector<16x16xf32>
    %cst_103 = arith.constant dense<0.000000e+00> : vector<16xf32>
    %254 = vector.multi_reduction <add>, %253, %cst_103 [1] : vector<16x16xf32> to vector<16xf32>
    %255 = vector.shape_cast %254 : vector<16xf32> to vector<16x1xf32>
    %256 = tpu.reciprocal %255 {approx = true} : vector<16x1xf32> -> vector<16x1xf32>
    %257 = vector.broadcast %256 : vector<16x1xf32> to vector<16x16xf32>
    %258 = arith.mulf %253, %257 : vector<16x16xf32>
    %cst_104 = arith.constant dense<0.000000e+00> : vector<16x32xf32>
    %259 = tpu.matmul %258, %244, %cst_104 {dimension_numbers = #tpu.dot_dimension_numbers<[1], [0], [0], [1], [0, 0, 1, 1], [], []>} : vector<16x16xf32>, vector<16x32xf32>, vector<16x32xf32> -> vector<16x32xf32>
    %260 = arith.addf %240, %259 : vector<16x32xf32>
    %261 = arith.addf %38, %260 : vector<16x32xf32>
    %262 = vector.extract_strided_slice %2 {offsets = [4, 0], sizes = [1, 32], strides = [1, 1]} : vector<8x32xf32> to vector<1x32xf32>
    %263 = arith.mulf %261, %261 : vector<16x32xf32>
    %cst_105 = arith.constant dense<0.000000e+00> : vector<16xf32>
    %264 = vector.multi_reduction <add>, %263, %cst_105 [1] : vector<16x32xf32> to vector<16xf32>
    %265 = vector.shape_cast %264 : vector<16xf32> to vector<16x1xf32>
    %cst_106 = arith.constant 3.200000e+01 : f32
    %266 = vector.broadcast %cst_106 : f32 to vector<16x1xf32>
    %267 = arith.divf %265, %266 : vector<16x1xf32>
    %cst_107 = arith.constant 9.99999997E-7 : f32
    %268 = vector.broadcast %cst_107 : f32 to vector<16x1xf32>
    %269 = arith.addf %267, %268 : vector<16x1xf32>
    %270 = math.rsqrt %269 : vector<16x1xf32>
    %271 = vector.broadcast %270 : vector<16x1xf32> to vector<16x32xf32>
    %272 = arith.mulf %261, %271 : vector<16x32xf32>
    %273 = vector.broadcast %262 : vector<1x32xf32> to vector<16x32xf32>
    %274 = arith.mulf %272, %273 : vector<16x32xf32>
    %cst_108 = arith.constant 0.000000e+00 : f32
    %275 = vector.broadcast %cst_108 : f32 to vector<16x32xf32>
    %c640 = arith.constant 640 : index
    %c0_109 = arith.constant 0 : index
    %276 = vector.load %arg3[%c640, %c0_109] : memref<1160x32xf32, #tpu.memory_space<vmem>>, vector<32x32xf32>
    %c768 = arith.constant 768 : index
    %c0_110 = arith.constant 0 : index
    %277 = vector.load %arg3[%c768, %c0_110] : memref<1160x32xf32, #tpu.memory_space<vmem>>, vector<32x32xf32>
    %cst_111 = arith.constant dense<0.000000e+00> : vector<16x32xf32>
    %278 = tpu.matmul %274, %276, %cst_111 {dimension_numbers = #tpu.dot_dimension_numbers<[1], [0], [0], [1], [0, 0, 1, 1], [], []>} : vector<16x32xf32>, vector<32x32xf32>, vector<16x32xf32> -> vector<16x32xf32>
    %cst_112 = arith.constant dense<0.000000e+00> : vector<16x32xf32>
    %279 = tpu.matmul %166, %277, %cst_112 {dimension_numbers = #tpu.dot_dimension_numbers<[1], [0], [0], [1], [0, 0, 1, 1], [], []>} : vector<16x32xf32>, vector<32x32xf32>, vector<16x32xf32> -> vector<16x32xf32>
    %cst_113 = arith.constant dense<0.000000e+00> : vector<16x16xf32>
    %280 = tpu.matmul %278, %166, %cst_113 {dimension_numbers = #tpu.dot_dimension_numbers<[1], [1], [0], [0], [0, 0, 1, 0], [], []>} : vector<16x32xf32>, vector<16x32xf32>, vector<16x16xf32> -> vector<16x16xf32>
    %c8 = arith.constant 8 : index
    %c0_114 = arith.constant 0 : index
    %c0_115 = arith.constant 0 : index
    %281 = vector.load %arg2[%c8, %c0_114, %c0_115] : memref<9x16x16xf32, #tpu.memory_space<vmem>>, vector<1x16x16xf32>
    %282 = vector.shape_cast %281 : vector<1x16x16xf32> to vector<16x16xf32>
    %283 = arith.addf %280, %282 : vector<16x16xf32>
    %cst_116 = arith.constant dense<0xFF800000> : vector<16xf32>
    %284 = vector.multi_reduction <maximumf>, %283, %cst_116 [1] : vector<16x16xf32> to vector<16xf32>
    %285 = vector.shape_cast %284 : vector<16xf32> to vector<16x1xf32>
    %286 = vector.broadcast %285 : vector<16x1xf32> to vector<16x16xf32>
    %287 = arith.subf %283, %286 : vector<16x16xf32>
    %288 = math.exp %287 : vector<16x16xf32>
    %cst_117 = arith.constant dense<0.000000e+00> : vector<16xf32>
    %289 = vector.multi_reduction <add>, %288, %cst_117 [1] : vector<16x16xf32> to vector<16xf32>
    %290 = vector.shape_cast %289 : vector<16xf32> to vector<16x1xf32>
    %291 = tpu.reciprocal %290 {approx = true} : vector<16x1xf32> -> vector<16x1xf32>
    %292 = vector.broadcast %291 : vector<16x1xf32> to vector<16x16xf32>
    %293 = arith.mulf %288, %292 : vector<16x16xf32>
    %cst_118 = arith.constant dense<0.000000e+00> : vector<16x32xf32>
    %294 = tpu.matmul %293, %279, %cst_118 {dimension_numbers = #tpu.dot_dimension_numbers<[1], [0], [0], [1], [0, 0, 1, 1], [], []>} : vector<16x16xf32>, vector<16x32xf32>, vector<16x32xf32> -> vector<16x32xf32>
    %295 = arith.addf %275, %294 : vector<16x32xf32>
    %c672 = arith.constant 672 : index
    %c0_119 = arith.constant 0 : index
    %296 = vector.load %arg3[%c672, %c0_119] : memref<1160x32xf32, #tpu.memory_space<vmem>>, vector<32x32xf32>
    %c800 = arith.constant 800 : index
    %c0_120 = arith.constant 0 : index
    %297 = vector.load %arg3[%c800, %c0_120] : memref<1160x32xf32, #tpu.memory_space<vmem>>, vector<32x32xf32>
    %cst_121 = arith.constant dense<0.000000e+00> : vector<16x32xf32>
    %298 = tpu.matmul %274, %296, %cst_121 {dimension_numbers = #tpu.dot_dimension_numbers<[1], [0], [0], [1], [0, 0, 1, 1], [], []>} : vector<16x32xf32>, vector<32x32xf32>, vector<16x32xf32> -> vector<16x32xf32>
    %cst_122 = arith.constant dense<0.000000e+00> : vector<16x32xf32>
    %299 = tpu.matmul %166, %297, %cst_122 {dimension_numbers = #tpu.dot_dimension_numbers<[1], [0], [0], [1], [0, 0, 1, 1], [], []>} : vector<16x32xf32>, vector<32x32xf32>, vector<16x32xf32> -> vector<16x32xf32>
    %cst_123 = arith.constant dense<0.000000e+00> : vector<16x16xf32>
    %300 = tpu.matmul %298, %166, %cst_123 {dimension_numbers = #tpu.dot_dimension_numbers<[1], [1], [0], [0], [0, 0, 1, 0], [], []>} : vector<16x32xf32>, vector<16x32xf32>, vector<16x16xf32> -> vector<16x16xf32>
    %c8_124 = arith.constant 8 : index
    %c0_125 = arith.constant 0 : index
    %c0_126 = arith.constant 0 : index
    %301 = vector.load %arg2[%c8_124, %c0_125, %c0_126] : memref<9x16x16xf32, #tpu.memory_space<vmem>>, vector<1x16x16xf32>
    %302 = vector.shape_cast %301 : vector<1x16x16xf32> to vector<16x16xf32>
    %303 = arith.addf %300, %302 : vector<16x16xf32>
    %cst_127 = arith.constant dense<0xFF800000> : vector<16xf32>
    %304 = vector.multi_reduction <maximumf>, %303, %cst_127 [1] : vector<16x16xf32> to vector<16xf32>
    %305 = vector.shape_cast %304 : vector<16xf32> to vector<16x1xf32>
    %306 = vector.broadcast %305 : vector<16x1xf32> to vector<16x16xf32>
    %307 = arith.subf %303, %306 : vector<16x16xf32>
    %308 = math.exp %307 : vector<16x16xf32>
    %cst_128 = arith.constant dense<0.000000e+00> : vector<16xf32>
    %309 = vector.multi_reduction <add>, %308, %cst_128 [1] : vector<16x16xf32> to vector<16xf32>
    %310 = vector.shape_cast %309 : vector<16xf32> to vector<16x1xf32>
    %311 = tpu.reciprocal %310 {approx = true} : vector<16x1xf32> -> vector<16x1xf32>
    %312 = vector.broadcast %311 : vector<16x1xf32> to vector<16x16xf32>
    %313 = arith.mulf %308, %312 : vector<16x16xf32>
    %cst_129 = arith.constant dense<0.000000e+00> : vector<16x32xf32>
    %314 = tpu.matmul %313, %299, %cst_129 {dimension_numbers = #tpu.dot_dimension_numbers<[1], [0], [0], [1], [0, 0, 1, 1], [], []>} : vector<16x16xf32>, vector<16x32xf32>, vector<16x32xf32> -> vector<16x32xf32>
    %315 = arith.addf %295, %314 : vector<16x32xf32>
    %c704 = arith.constant 704 : index
    %c0_130 = arith.constant 0 : index
    %316 = vector.load %arg3[%c704, %c0_130] : memref<1160x32xf32, #tpu.memory_space<vmem>>, vector<32x32xf32>
    %c832 = arith.constant 832 : index
    %c0_131 = arith.constant 0 : index
    %317 = vector.load %arg3[%c832, %c0_131] : memref<1160x32xf32, #tpu.memory_space<vmem>>, vector<32x32xf32>
    %cst_132 = arith.constant dense<0.000000e+00> : vector<16x32xf32>
    %318 = tpu.matmul %274, %316, %cst_132 {dimension_numbers = #tpu.dot_dimension_numbers<[1], [0], [0], [1], [0, 0, 1, 1], [], []>} : vector<16x32xf32>, vector<32x32xf32>, vector<16x32xf32> -> vector<16x32xf32>
    %cst_133 = arith.constant dense<0.000000e+00> : vector<16x32xf32>
    %319 = tpu.matmul %166, %317, %cst_133 {dimension_numbers = #tpu.dot_dimension_numbers<[1], [0], [0], [1], [0, 0, 1, 1], [], []>} : vector<16x32xf32>, vector<32x32xf32>, vector<16x32xf32> -> vector<16x32xf32>
    %cst_134 = arith.constant dense<0.000000e+00> : vector<16x16xf32>
    %320 = tpu.matmul %318, %166, %cst_134 {dimension_numbers = #tpu.dot_dimension_numbers<[1], [1], [0], [0], [0, 0, 1, 0], [], []>} : vector<16x32xf32>, vector<16x32xf32>, vector<16x16xf32> -> vector<16x16xf32>
    %c8_135 = arith.constant 8 : index
    %c0_136 = arith.constant 0 : index
    %c0_137 = arith.constant 0 : index
    %321 = vector.load %arg2[%c8_135, %c0_136, %c0_137] : memref<9x16x16xf32, #tpu.memory_space<vmem>>, vector<1x16x16xf32>
    %322 = vector.shape_cast %321 : vector<1x16x16xf32> to vector<16x16xf32>
    %323 = arith.addf %320, %322 : vector<16x16xf32>
    %cst_138 = arith.constant dense<0xFF800000> : vector<16xf32>
    %324 = vector.multi_reduction <maximumf>, %323, %cst_138 [1] : vector<16x16xf32> to vector<16xf32>
    %325 = vector.shape_cast %324 : vector<16xf32> to vector<16x1xf32>
    %326 = vector.broadcast %325 : vector<16x1xf32> to vector<16x16xf32>
    %327 = arith.subf %323, %326 : vector<16x16xf32>
    %328 = math.exp %327 : vector<16x16xf32>
    %cst_139 = arith.constant dense<0.000000e+00> : vector<16xf32>
    %329 = vector.multi_reduction <add>, %328, %cst_139 [1] : vector<16x16xf32> to vector<16xf32>
    %330 = vector.shape_cast %329 : vector<16xf32> to vector<16x1xf32>
    %331 = tpu.reciprocal %330 {approx = true} : vector<16x1xf32> -> vector<16x1xf32>
    %332 = vector.broadcast %331 : vector<16x1xf32> to vector<16x16xf32>
    %333 = arith.mulf %328, %332 : vector<16x16xf32>
    %cst_140 = arith.constant dense<0.000000e+00> : vector<16x32xf32>
    %334 = tpu.matmul %333, %319, %cst_140 {dimension_numbers = #tpu.dot_dimension_numbers<[1], [0], [0], [1], [0, 0, 1, 1], [], []>} : vector<16x16xf32>, vector<16x32xf32>, vector<16x32xf32> -> vector<16x32xf32>
    %335 = arith.addf %315, %334 : vector<16x32xf32>
    %c736 = arith.constant 736 : index
    %c0_141 = arith.constant 0 : index
    %336 = vector.load %arg3[%c736, %c0_141] : memref<1160x32xf32, #tpu.memory_space<vmem>>, vector<32x32xf32>
    %c864 = arith.constant 864 : index
    %c0_142 = arith.constant 0 : index
    %337 = vector.load %arg3[%c864, %c0_142] : memref<1160x32xf32, #tpu.memory_space<vmem>>, vector<32x32xf32>
    %cst_143 = arith.constant dense<0.000000e+00> : vector<16x32xf32>
    %338 = tpu.matmul %274, %336, %cst_143 {dimension_numbers = #tpu.dot_dimension_numbers<[1], [0], [0], [1], [0, 0, 1, 1], [], []>} : vector<16x32xf32>, vector<32x32xf32>, vector<16x32xf32> -> vector<16x32xf32>
    %cst_144 = arith.constant dense<0.000000e+00> : vector<16x32xf32>
    %339 = tpu.matmul %166, %337, %cst_144 {dimension_numbers = #tpu.dot_dimension_numbers<[1], [0], [0], [1], [0, 0, 1, 1], [], []>} : vector<16x32xf32>, vector<32x32xf32>, vector<16x32xf32> -> vector<16x32xf32>
    %cst_145 = arith.constant dense<0.000000e+00> : vector<16x16xf32>
    %340 = tpu.matmul %338, %166, %cst_145 {dimension_numbers = #tpu.dot_dimension_numbers<[1], [1], [0], [0], [0, 0, 1, 0], [], []>} : vector<16x32xf32>, vector<16x32xf32>, vector<16x16xf32> -> vector<16x16xf32>
    %c8_146 = arith.constant 8 : index
    %c0_147 = arith.constant 0 : index
    %c0_148 = arith.constant 0 : index
    %341 = vector.load %arg2[%c8_146, %c0_147, %c0_148] : memref<9x16x16xf32, #tpu.memory_space<vmem>>, vector<1x16x16xf32>
    %342 = vector.shape_cast %341 : vector<1x16x16xf32> to vector<16x16xf32>
    %343 = arith.addf %340, %342 : vector<16x16xf32>
    %cst_149 = arith.constant dense<0xFF800000> : vector<16xf32>
    %344 = vector.multi_reduction <maximumf>, %343, %cst_149 [1] : vector<16x16xf32> to vector<16xf32>
    %345 = vector.shape_cast %344 : vector<16xf32> to vector<16x1xf32>
    %346 = vector.broadcast %345 : vector<16x1xf32> to vector<16x16xf32>
    %347 = arith.subf %343, %346 : vector<16x16xf32>
    %348 = math.exp %347 : vector<16x16xf32>
    %cst_150 = arith.constant dense<0.000000e+00> : vector<16xf32>
    %349 = vector.multi_reduction <add>, %348, %cst_150 [1] : vector<16x16xf32> to vector<16xf32>
    %350 = vector.shape_cast %349 : vector<16xf32> to vector<16x1xf32>
    %351 = tpu.reciprocal %350 {approx = true} : vector<16x1xf32> -> vector<16x1xf32>
    %352 = vector.broadcast %351 : vector<16x1xf32> to vector<16x16xf32>
    %353 = arith.mulf %348, %352 : vector<16x16xf32>
    %cst_151 = arith.constant dense<0.000000e+00> : vector<16x32xf32>
    %354 = tpu.matmul %353, %339, %cst_151 {dimension_numbers = #tpu.dot_dimension_numbers<[1], [0], [0], [1], [0, 0, 1, 1], [], []>} : vector<16x16xf32>, vector<16x32xf32>, vector<16x32xf32> -> vector<16x32xf32>
    %355 = arith.addf %335, %354 : vector<16x32xf32>
    %356 = arith.addf %261, %355 : vector<16x32xf32>
    %357 = vector.extract_strided_slice %2 {offsets = [5, 0], sizes = [1, 32], strides = [1, 1]} : vector<8x32xf32> to vector<1x32xf32>
    %358 = arith.mulf %356, %356 : vector<16x32xf32>
    %cst_152 = arith.constant dense<0.000000e+00> : vector<16xf32>
    %359 = vector.multi_reduction <add>, %358, %cst_152 [1] : vector<16x32xf32> to vector<16xf32>
    %360 = vector.shape_cast %359 : vector<16xf32> to vector<16x1xf32>
    %cst_153 = arith.constant 3.200000e+01 : f32
    %361 = vector.broadcast %cst_153 : f32 to vector<16x1xf32>
    %362 = arith.divf %360, %361 : vector<16x1xf32>
    %cst_154 = arith.constant 9.99999997E-7 : f32
    %363 = vector.broadcast %cst_154 : f32 to vector<16x1xf32>
    %364 = arith.addf %362, %363 : vector<16x1xf32>
    %365 = math.rsqrt %364 : vector<16x1xf32>
    %366 = vector.broadcast %365 : vector<16x1xf32> to vector<16x32xf32>
    %367 = arith.mulf %356, %366 : vector<16x32xf32>
    %368 = vector.broadcast %357 : vector<1x32xf32> to vector<16x32xf32>
    %369 = arith.mulf %367, %368 : vector<16x32xf32>
    %c960 = arith.constant 960 : index
    %c0_155 = arith.constant 0 : index
    %370 = vector.load %arg3[%c960, %c0_155] : memref<1160x32xf32, #tpu.memory_space<vmem>>, vector<64x32xf32>
    %c1088 = arith.constant 1088 : index
    %c0_156 = arith.constant 0 : index
    %371 = vector.load %arg3[%c1088, %c0_156] : memref<1160x32xf32, #tpu.memory_space<vmem>>, vector<64x32xf32>
    %cst_157 = arith.constant dense<0.000000e+00> : vector<16x64xf32>
    %372 = tpu.matmul %369, %370, %cst_157 {dimension_numbers = #tpu.dot_dimension_numbers<[1], [1], [0], [0], [0, 0, 1, 0], [], []>} : vector<16x32xf32>, vector<64x32xf32>, vector<16x64xf32> -> vector<16x64xf32>
    %cst_158 = arith.constant 0.000000e+00 : f32
    %373 = vector.broadcast %cst_158 : f32 to vector<16x64xf32>
    %374 = arith.maximumf %372, %373 : vector<16x64xf32>
    %cst_159 = arith.constant dense<0.000000e+00> : vector<16x32xf32>
    %375 = tpu.matmul %374, %371, %cst_159 {dimension_numbers = #tpu.dot_dimension_numbers<[1], [0], [0], [1], [0, 0, 1, 1], [], []>} : vector<16x64xf32>, vector<64x32xf32>, vector<16x32xf32> -> vector<16x32xf32>
    %376 = arith.addf %356, %375 : vector<16x32xf32>
    %377 = vector.extract_strided_slice %2 {offsets = [6, 0], sizes = [1, 32], strides = [1, 1]} : vector<8x32xf32> to vector<1x32xf32>
    %378 = arith.mulf %376, %376 : vector<16x32xf32>
    %cst_160 = arith.constant dense<0.000000e+00> : vector<16xf32>
    %379 = vector.multi_reduction <add>, %378, %cst_160 [1] : vector<16x32xf32> to vector<16xf32>
    %380 = vector.shape_cast %379 : vector<16xf32> to vector<16x1xf32>
    %cst_161 = arith.constant 3.200000e+01 : f32
    %381 = vector.broadcast %cst_161 : f32 to vector<16x1xf32>
    %382 = arith.divf %380, %381 : vector<16x1xf32>
    %cst_162 = arith.constant 9.99999997E-7 : f32
    %383 = vector.broadcast %cst_162 : f32 to vector<16x1xf32>
    %384 = arith.addf %382, %383 : vector<16x1xf32>
    %385 = math.rsqrt %384 : vector<16x1xf32>
    %386 = vector.broadcast %385 : vector<16x1xf32> to vector<16x32xf32>
    %387 = arith.mulf %376, %386 : vector<16x32xf32>
    %388 = vector.broadcast %377 : vector<1x32xf32> to vector<16x32xf32>
    %389 = arith.mulf %387, %388 : vector<16x32xf32>
    %cst_163 = arith.constant 0.176776692 : f32
    %390 = vector.broadcast %cst_163 : f32 to vector<16x32xf32>
    %391 = arith.mulf %389, %390 : vector<16x32xf32>
    %cst_164 = arith.constant dense<0.000000e+00> : vector<16x128xf32>
    %392 = tpu.matmul %391, %1, %cst_164 {dimension_numbers = #tpu.dot_dimension_numbers<[1], [1], [0], [0], [0, 0, 1, 0], [], []>} : vector<16x32xf32>, vector<128x32xf32>, vector<16x128xf32> -> vector<16x128xf32>
    %c0_165 = arith.constant 0 : index
    %c0_166 = arith.constant 0 : index
    %393 = vector.load %arg4[%c0_165, %c0_166] : memref<16x128xf32, #tpu.memory_space<vmem>>, vector<16x128xf32>
    tpu.vector_store %arg4[%c0_165, %c0_166], %392 {strides = array<i32>} : memref<16x128xf32, #tpu.memory_space<vmem>>, vector<16x128xf32>,
    return
  }
}

</mosaic_0001>

<bundles_post_ra>
// kernel: tile.24
= control target key start
LH: loop header
LB: loop body
LE: loop exit
PB: predicated region body
PF: predicated region fallthrough
CT: control target
= control target key end

     0   :  { %vm322_vm0 = vcmask 1047556   ;;  %s616_s10 = smov 8   ;;  %vm324_vm1 = vcmask 64512   ;;  %vm397_vm2 = vcmask 130112   ;;  %s907_s0 = inlined_call_operand.vmem [shape: f32[4,2,8,2,8], index: 0, kind: input, shape index: {}]   ;;  %s908_s1 = inlined_call_operand.vmem [shape: f32[4,16,16], index: 1, kind: output, shape index: {}]  }
   0x1   :  { %v594_v0 = vld [vmem:[%s907_s0 + $0xe] sm:$0x3]  ;;  %v595_v1 = vld [vmem:[%s907_s0 + $0xc] sm:$0x3]  ;;  %v596_v2 = vld [vmem:[%s907_s0 + $0xa] sm:$0x3] }
   0x2   :  { %288 = vst [vmem:[#allocation0 + $0x38] sm:$0x3] %v594_v0  ;;  %293 = vst [vmem:[#allocation0 + $0x30] sm:$0x3] %v595_v1  ;;  %v597_v3 = vld [vmem:[%s907_s0 + $0x8] sm:$0x3] }
   0x3   :  { %298 = vst [vmem:[#allocation0 + $0x28] sm:$0x3] %v596_v2  ;;  %v598_v4 = vld [vmem:[%s907_s0 + $0x6] sm:$0x3]  ;;  %v599_v5 = vld [vmem:[%s907_s0 + $0x4] sm:$0x3] }
   0x4   :  { %303 = vst [vmem:[#allocation0 + $0x20] sm:$0x3] %v597_v3  ;;  %308 = vst [vmem:[#allocation0 + $0x18] sm:$0x3] %v598_v4  ;;  %v600_v6 = vld [vmem:[%s907_s0 + $0x2] sm:$0x3] }
   0x5   :  { %313 = vst [vmem:[#allocation0 + $0x10] sm:$0x3] %v599_v5  ;;  %v318_v7 = vld [vmem:[%s907_s0] sm:$0x3]  ;;  %317 = vst [vmem:[#allocation0 + $0x8] sm:$0x3] %v600_v6 }
   0x6   :  { %319 = vst [vmem:[#allocation0] sm:$0x3] %v318_v7  ;;  %v586_v8 = vld [vmem:[%s907_s0 + $0x1e] sm:$0x3]  ;;  %v587_v9 = vld [vmem:[%s907_s0 + $0x1c] sm:$0x3] }
   0x7   :  { %v588_v10 = vld [vmem:[%s907_s0 + $0x1a] sm:$0x3]  ;;  %248 = vst [vmem:[#allocation0 + $0x78] sm:$0x3] %v586_v8  ;;  %253 = vst [vmem:[#allocation0 + $0x70] sm:$0x3] %v587_v9 }
   0x8   :  { %258 = vst [vmem:[#allocation0 + $0x68] sm:$0x3] %v588_v10  ;;  %v589_v11 = vld [vmem:[%s907_s0 + $0x18] sm:$0x3]  ;;  %v590_v12 = vld [vmem:[%s907_s0 + $0x16] sm:$0x3] }
   0x9   :  { %v591_v13 = vld [vmem:[%s907_s0 + $0x14] sm:$0x3]  ;;  %263 = vst [vmem:[#allocation0 + $0x60] sm:$0x3] %v589_v11  ;;  %268 = vst [vmem:[#allocation0 + $0x58] sm:$0x3] %v590_v12 }
   0xa   :  { %273 = vst [vmem:[#allocation0 + $0x50] sm:$0x3] %v591_v13  ;;  %v592_v14 = vld [vmem:[%s907_s0 + $0x12] sm:$0x3]  ;;  %v593_v15 = vld [vmem:[%s907_s0 + $0x10] sm:$0x3] }
   0xb   :  { %v562_v16 = vld [vmem:[%s907_s0 + $0x4e] sm:$0x3]  ;;  %278 = vst [vmem:[#allocation0 + $0x48] sm:$0x3] %v592_v14  ;;  %283 = vst [vmem:[#allocation0 + $0x40] sm:$0x3] %v593_v15 }
   0xc   :  { %128 = vst [vmem:[#allocation0 + $0x138] sm:$0x3] %v562_v16  ;;  %v563_v17 = vld [vmem:[%s907_s0 + $0x4c] sm:$0x3]  ;;  %v564_v18 = vld [vmem:[%s907_s0 + $0x4a] sm:$0x3] }
   0xd   :  { %v565_v19 = vld [vmem:[%s907_s0 + $0x48] sm:$0x3]  ;;  %133 = vst [vmem:[#allocation0 + $0x130] sm:$0x3] %v563_v17  ;;  %138 = vst [vmem:[#allocation0 + $0x128] sm:$0x3] %v564_v18 }
   0xe   :  { %143 = vst [vmem:[#allocation0 + $0x120] sm:$0x3] %v565_v19  ;;  %v566_v20 = vld [vmem:[%s907_s0 + $0x46] sm:$0x3]  ;;  %v567_v21 = vld [vmem:[%s907_s0 + $0x44] sm:$0x3] }
   0xf   :  { %v568_v22 = vld [vmem:[%s907_s0 + $0x42] sm:$0x3]  ;;  %148 = vst [vmem:[#allocation0 + $0x118] sm:$0x3] %v566_v20  ;;  %153 = vst [vmem:[#allocation0 + $0x110] sm:$0x3] %v567_v21 }
  0x10   :  { %158 = vst [vmem:[#allocation0 + $0x108] sm:$0x3] %v568_v22  ;;  %v569_v23 = vld [vmem:[%s907_s0 + $0x40] sm:$0x3]  ;;  %v554_v24 = vld [vmem:[%s907_s0 + $0x5e] sm:$0x3] }
  0x11   :  { %v555_v25 = vld [vmem:[%s907_s0 + $0x5c] sm:$0x3]  ;;  %v392_v26 = vld [vmem:[#allocation0 + $0x1] ss:$8 sm:$0xf0]  }
  0x12   :  { %163 = vst [vmem:[#allocation0 + $0x100] sm:$0x3] %v569_v23  ;;  %88 = vst [vmem:[#allocation0 + $0x178] sm:$0x3] %v554_v24  ;;  %v556_v27 = vld [vmem:[%s907_s0 + $0x5a] sm:$0x3] }
  0x13   :  { %93 = vst [vmem:[#allocation0 + $0x170] sm:$0x3] %v555_v25  ;;  %v390_v28 = vld [vmem:[#allocation0 + $0x1] ss:$8 sm:$0xf]  }
  0x14   :  { %98 = vst [vmem:[#allocation0 + $0x168] sm:$0x3] %v556_v27  ;;  %v557_v29 = vld [vmem:[%s907_s0 + $0x58] sm:$0x3]  ;;  %v394_v30 = vsel %vm322_vm0, %v392_v26, %v390_v28  ;;  %v558_v31 = vld [vmem:[%s907_s0 + $0x56] sm:$0x3] }
  0x15   :  { %103 = vst [vmem:[#allocation0 + $0x160] sm:$0x3] %v557_v29  ;;  %v559_v32 = vld [vmem:[%s907_s0 + $0x54] sm:$0x3]  ;;  %v560_v33 = vld [vmem:[%s907_s0 + $0x52] sm:$0x3]  ;;  %395 = vrot.lane.b32.xlu0 %v394_v30, %s616_s10 }
  0x16   :  { %v413_v34 = vld [vmem:[#allocation0 + $0x41] ss:$8 sm:$0xf0]   ;;  %108 = vst [vmem:[#allocation0 + $0x158] sm:$0x3] %v558_v31 }
  0x17   :  { %113 = vst [vmem:[#allocation0 + $0x150] sm:$0x3] %v559_v32  ;;  %118 = vst [vmem:[#allocation0 + $0x148] sm:$0x3] %v560_v33  ;;  %v561_v35 = vld [vmem:[%s907_s0 + $0x50] sm:$0x3] }
  0x18   :  { %v411_v36 = vld [vmem:[#allocation0 + $0x41] ss:$8 sm:$0xf]   ;;  %123 = vst [vmem:[#allocation0 + $0x140] sm:$0x3] %v561_v35 }
  0x19   :  { %v578_v37 = vld [vmem:[%s907_s0 + $0x2e] sm:$0x3]  ;;  %v415_v38 = vsel %vm322_vm0, %v413_v34, %v411_v36  ;;  %v402_v39 = vld [vmem:[#allocation0 + $0x101] ss:$8 sm:$0xf0]  }
  0x1a   :  { %208 = vst [vmem:[#allocation0 + $0xb8] sm:$0x3] %v578_v37  ;;  %v579_v40 = vld [vmem:[%s907_s0 + $0x2c] sm:$0x3]  ;;  %416 = vrot.lane.b32.xlu1 %v415_v38, %s616_s10  ;;  %v580_v41 = vld [vmem:[%s907_s0 + $0x2a] sm:$0x3] }
  0x1b   :  { %213 = vst [vmem:[#allocation0 + $0xb0] sm:$0x3] %v579_v40  ;;  %v581_v42 = vld [vmem:[%s907_s0 + $0x28] sm:$0x3]  ;;  %v582_v43 = vld [vmem:[%s907_s0 + $0x26] sm:$0x3] }
  0x1c   :  { %v400_v44 = vld [vmem:[#allocation0 + $0x101] ss:$8 sm:$0xf]   ;;  %218 = vst [vmem:[#allocation0 + $0xa8] sm:$0x3] %v580_v41 }
  0x1d   :  { %223 = vst [vmem:[#allocation0 + $0xa0] sm:$0x3] %v581_v42  ;;  %228 = vst [vmem:[#allocation0 + $0x98] sm:$0x3] %v582_v43  ;;  %v583_v45 = vld [vmem:[%s907_s0 + $0x24] sm:$0x3]  ;;  %v404_v46 = vsel %vm322_vm0, %v402_v39, %v400_v44 }
  0x1e   :  { %233 = vst [vmem:[#allocation0 + $0x90] sm:$0x3] %v583_v45  ;;  %v584_v47 = vld [vmem:[%s907_s0 + $0x22] sm:$0x3]  ;;  %v585_v48 = vld [vmem:[%s907_s0 + $0x20] sm:$0x3]  ;;  %405 = vrot.lane.b32.xlu0 %v404_v46, %s616_s10 }
  0x1f   :  { %v546_v49 = vld [vmem:[%s907_s0 + $0x6e] sm:$0x3]  ;;  %v424_v50 = vld [vmem:[#allocation0 + $0x141] ss:$8 sm:$0xf0]  }
  0x20   :  { %238 = vst [vmem:[#allocation0 + $0x88] sm:$0x3] %v584_v47  ;;  %243 = vst [vmem:[#allocation0 + $0x80] sm:$0x3] %v585_v48  ;;  %v547_v51 = vld [vmem:[%s907_s0 + $0x6c] sm:$0x3] }
  0x21   :  { %48 = vst [vmem:[#allocation0 + $0x1b8] sm:$0x3] %v546_v49  ;;  %53 = vst [vmem:[#allocation0 + $0x1b0] sm:$0x3] %v547_v51  ;;  %v548_v52 = vld [vmem:[%s907_s0 + $0x6a] sm:$0x3] }
  0x22   :  { %v549_v53 = vld [vmem:[%s907_s0 + $0x68] sm:$0x3]  ;;  %v550_v54 = vld [vmem:[%s907_s0 + $0x66] sm:$0x3]  ;;  %58 = vst [vmem:[#allocation0 + $0x1a8] sm:$0x3] %v548_v52 }
  0x23   :  { %v422_v55 = vld [vmem:[#allocation0 + $0x141] ss:$8 sm:$0xf]   ;;  %63 = vst [vmem:[#allocation0 + $0x1a0] sm:$0x3] %v549_v53 }
  0x24   :  { %68 = vst [vmem:[#allocation0 + $0x198] sm:$0x3] %v550_v54  ;;  %v551_v56 = vld [vmem:[%s907_s0 + $0x64] sm:$0x3]  ;;  %v426_v57 = vsel %vm322_vm0, %v424_v50, %v422_v55  ;;  %v552_v58 = vld [vmem:[%s907_s0 + $0x62] sm:$0x3] }
  0x25   :  { %73 = vst [vmem:[#allocation0 + $0x190] sm:$0x3] %v551_v56  ;;  %v553_v59 = vld [vmem:[%s907_s0 + $0x60] sm:$0x3]  ;;  %v570_v60 = vld [vmem:[%s907_s0 + $0x3e] sm:$0x3]  ;;  %427 = vrot.lane.b32.xlu1 %v426_v57, %s616_s10 }
  0x26   :  { %78 = vst [vmem:[#allocation0 + $0x188] sm:$0x3] %v552_v58  ;;  %83 = vst [vmem:[#allocation0 + $0x180] sm:$0x3] %v553_v59  ;;  %v571_v61 = vld [vmem:[%s907_s0 + $0x3c] sm:$0x3] }
  0x27   :  { %168 = vst [vmem:[#allocation0 + $0xf8] sm:$0x3] %v570_v60  ;;  %v572_v62 = vld [vmem:[%s907_s0 + $0x3a] sm:$0x3]  ;;  %v573_v63 = vld [vmem:[%s907_s0 + $0x38] sm:$0x3] }
  0x28   :  { %v435_v0 = vld [vmem:[#allocation0 + $0x81] ss:$8 sm:$0xf0]   ;;  %173 = vst [vmem:[#allocation0 + $0xf0] sm:$0x3] %v571_v61 }
  0x29   :  { %178 = vst [vmem:[#allocation0 + $0xe8] sm:$0x3] %v572_v62  ;;  %183 = vst [vmem:[#allocation0 + $0xe0] sm:$0x3] %v573_v63  ;;  %v574_v1 = vld [vmem:[%s907_s0 + $0x36] sm:$0x3] }
  0x2a   :  { %188 = vst [vmem:[#allocation0 + $0xd8] sm:$0x3] %v574_v1  ;;  %v575_v2 = vld [vmem:[%s907_s0 + $0x34] sm:$0x3]  ;;  %v576_v3 = vld [vmem:[%s907_s0 + $0x32] sm:$0x3] }
  0x2b   :  { %v577_v4 = vld [vmem:[%s907_s0 + $0x30] sm:$0x3]  ;;  %193 = vst [vmem:[#allocation0 + $0xd0] sm:$0x3] %v575_v2  ;;  %198 = vst [vmem:[#allocation0 + $0xc8] sm:$0x3] %v576_v3 }
  0x2c   :  { %v433_v5 = vld [vmem:[#allocation0 + $0x81] ss:$8 sm:$0xf]   ;;  %203 = vst [vmem:[#allocation0 + $0xc0] sm:$0x3] %v577_v4 }
  0x2d   :  { %v538_v6 = vld [vmem:[%s907_s0 + $0x7e] sm:$0x3]  ;;  %v437_v7 = vsel %vm322_vm0, %v435_v0, %v433_v5  ;;  %v539_v8 = vld [vmem:[%s907_s0 + $0x7c] sm:$0x3]  ;;  %v540_v9 = vld [vmem:[%s907_s0 + $0x7a] sm:$0x3] }
  0x2e   :  { %8 = vst [vmem:[#allocation0 + $0x1f8] sm:$0x3] %v538_v6  ;;  %v541_v10 = vld [vmem:[%s907_s0 + $0x78] sm:$0x3]  ;;  %438 = vrot.lane.b32.xlu0 %v437_v7, %s616_s10  ;;  %13 = vst [vmem:[#allocation0 + $0x1f0] sm:$0x3] %v539_v8 }
  0x2f   :  { %v446_v11 = vld [vmem:[#allocation0 + $0x181] ss:$8 sm:$0xf0]   ;;  %18 = vst [vmem:[#allocation0 + $0x1e8] sm:$0x3] %v540_v9 }
  0x30   :  { %23 = vst [vmem:[#allocation0 + $0x1e0] sm:$0x3] %v541_v10  ;;  %v542_v12 = vld [vmem:[%s907_s0 + $0x76] sm:$0x3]  ;;  %v543_v13 = vld [vmem:[%s907_s0 + $0x74] sm:$0x3] }
  0x31   :  { %28 = vst [vmem:[#allocation0 + $0x1d8] sm:$0x3] %v542_v12  ;;  %v544_v14 = vld [vmem:[%s907_s0 + $0x72] sm:$0x3]  ;;  %v545_v15 = vld [vmem:[%s907_s0 + $0x70] sm:$0x3] }
  0x32   :  { %v444_v16 = vld [vmem:[#allocation0 + $0x181] ss:$8 sm:$0xf]   ;;  %33 = vst [vmem:[#allocation0 + $0x1d0] sm:$0x3] %v543_v13 }
  0x33   :  { %38 = vst [vmem:[#allocation0 + $0x1c8] sm:$0x3] %v544_v14  ;;  %43 = vst [vmem:[#allocation0 + $0x1c0] sm:$0x3] %v545_v15  ;;  %v448_v18 = vsel %vm322_vm0, %v446_v11, %v444_v16 }
  0x34   :  { %v320_v17 = vld [vmem:[#allocation0] ss:$8 sm:$0xf]   ;;  %v457_v19 = vld [vmem:[#allocation0 + $0xc1] ss:$8 sm:$0xf0]   ;;  %449 = vrot.lane.b32.xlu1 %v448_v18, %s616_s10 }
  0x35   :  { %v321_v20 = vld [vmem:[#allocation0] ss:$8 sm:$0xf0]   ;;  %v455_v24 = vld [vmem:[#allocation0 + $0xc1] ss:$8 sm:$0xf]  }
  0x36   :  { %v323_v21 = vsel %vm322_vm0, %v321_v20, %v320_v17  ;;  %v327_v22 = vld [vmem:[#allocation0 + $0x40] ss:$8 sm:$0xf]   ;;  %v459_v27 = vsel %vm322_vm0, %v457_v19, %v455_v24 }
  0x37   :  { %v329_v23 = vld [vmem:[#allocation0 + $0x40] ss:$8 sm:$0xf0]   ;;  %325 = vst.msk [vmem:[%s908_s1] sm:$0xff] %vm324_vm1, %v323_v21   ;;  %460 = vrot.lane.b32.xlu0 %v459_v27, %s616_s10 }
  0x38   :  { %v331_v25 = vsel %vm322_vm0, %v329_v23, %v327_v22  ;;  %v354_v26 = vld [vmem:[#allocation0 + $0x100] ss:$8 sm:$0xf]   ;;  %v468_v30 = vld [vmem:[#allocation0 + $0x1c1] ss:$8 sm:$0xf0]  }
  0x39   :  { %601 = vst.msk [vmem:[%s908_s1 + $0x8] sm:$0xff] %vm324_vm1, %v331_v25   ;;  %v356_v28 = vld [vmem:[#allocation0 + $0x100] ss:$8 sm:$0xf0]  }
  0x3a   :  { %v363_v29 = vld [vmem:[#allocation0 + $0x140] ss:$8 sm:$0xf]   ;;  %v358_v31 = vsel %vm322_vm0, %v356_v28, %v354_v26  ;;  %v466_v36 = vld [vmem:[#allocation0 + $0x1c1] ss:$8 sm:$0xf]  }
  0x3b   :  { %v365_v32 = vld [vmem:[#allocation0 + $0x140] ss:$8 sm:$0xf0]   ;;  %604 = vst.msk [vmem:[%s908_s1 + $0x20] sm:$0xff] %vm324_vm1, %v358_v31   ;;  %v470_v39 = vsel %vm322_vm0, %v468_v30, %v466_v36 }
  0x3c   :  { %v367_v33 = vsel %vm322_vm0, %v365_v32, %v363_v29  ;;  %v336_v34 = vld [vmem:[#allocation0 + $0x80] ss:$8 sm:$0xf]   ;;  %471 = vrot.lane.b32.xlu1 %v470_v39, %s616_s10 }
  0x3d   :  { %v338_v35 = vld [vmem:[#allocation0 + $0x80] ss:$8 sm:$0xf0]   ;;  %605 = vst.msk [vmem:[%s908_s1 + $0x28] sm:$0xff] %vm324_vm1, %v367_v33  }
  0x3e   :  { %v340_v37 = vsel %vm322_vm0, %v338_v35, %v336_v34  ;;  %v372_v38 = vld [vmem:[#allocation0 + $0x180] ss:$8 sm:$0xf]  }
  0x3f   :  { %602 = vst.msk [vmem:[%s908_s1 + $0x10] sm:$0xff] %vm324_vm1, %v340_v37   ;;  %v374_v40 = vld [vmem:[#allocation0 + $0x180] ss:$8 sm:$0xf0]  }
  0x40   :  { %v345_v41 = vld [vmem:[#allocation0 + $0xc0] ss:$8 sm:$0xf]   ;;  %v376_v42 = vsel %vm322_vm0, %v374_v40, %v372_v38 }
  0x41   :  { %v347_v43 = vld [vmem:[#allocation0 + $0xc0] ss:$8 sm:$0xf0]   ;;  %606 = vst.msk [vmem:[%s908_s1 + $0x30] sm:$0xff] %vm324_vm1, %v376_v42  }
  0x42   :  { %v381_v44 = vld [vmem:[#allocation0 + $0x1c0] ss:$8 sm:$0xf]   ;;  %v349_v45 = vsel %vm322_vm0, %v347_v43, %v345_v41 }
  0x43   :  { %v383_v46 = vld [vmem:[#allocation0 + $0x1c0] ss:$8 sm:$0xf0]   ;;  %603 = vst.msk [vmem:[%s908_s1 + $0x18] sm:$0xff] %vm324_vm1, %v349_v45  }
  0x44   :  { %v385_v47 = vsel %vm322_vm0, %v383_v46, %v381_v44 }
  0x45   :  { %607 = vst.msk [vmem:[%s908_s1 + $0x38] sm:$0xff] %vm324_vm1, %v385_v47  }
  0x87   :  { %v396_v48 = vpop.permute.xlu0 %395  }
  0x88   :  { %398 = vst.msk [vmem:[%s908_s1] sm:$0xff] %vm397_vm2, %v396_v48  }
  0x8c   :  { %v417_v49 = vpop.permute.xlu1 %416  }
  0x8d   :  { %609 = vst.msk [vmem:[%s908_s1 + $0x8] sm:$0xff] %vm397_vm2, %v417_v49  }
  0x90   :  { %v406_v50 = vpop.permute.xlu0 %405  }
  0x91   :  { %608 = vst.msk [vmem:[%s908_s1 + $0x20] sm:$0xff] %vm397_vm2, %v406_v50  }
  0x97   :  { %v428_v51 = vpop.permute.xlu1 %427  }
  0x98   :  { %610 = vst.msk [vmem:[%s908_s1 + $0x28] sm:$0xff] %vm397_vm2, %v428_v51  }
  0xa0   :  { %v439_v52 = vpop.permute.xlu0 %438  }
  0xa1   :  { %611 = vst.msk [vmem:[%s908_s1 + $0x10] sm:$0xff] %vm397_vm2, %v439_v52  }
  0xa6   :  { %v450_v53 = vpop.permute.xlu1 %449  }
  0xa7   :  { %612 = vst.msk [vmem:[%s908_s1 + $0x30] sm:$0xff] %vm397_vm2, %v450_v53  }
  0xa9   :  { %v461_v54 = vpop.permute.xlu0 %460  }
  0xaa   :  { %613 = vst.msk [vmem:[%s908_s1 + $0x18] sm:$0xff] %vm397_vm2, %v461_v54  }
  0xae   :  { %v472_v55 = vpop.permute.xlu1 %471  }
  0xaf   :  { %614 = vst.msk [vmem:[%s908_s1 + $0x38] sm:$0xff] %vm397_vm2, %v472_v55  }

// kernel: ligt_forward.1
= control target key start
LH: loop header
LB: loop body
LE: loop exit
PB: predicated region body
PF: predicated region fallthrough
CT: control target
= control target key end

     0   :  { %v6883_v0 = vmov 1   ;;  %v6884_v9 = vmov 2   ;;  %v6885_v13 = vmov 3   ;;  %v6886_v17 = vmov 4   ;;  %s8080_s1 = inlined_call_operand.vmem [shape: s32[32,5], index: 1, kind: input, shape index: {}]   ;;  %s8081_s3 = inlined_call_operand.vmem [shape: f32[1160,32], index: 3, kind: input, shape index: {}]   ;;  %s8082_s0 = inlined_call_operand.<no memory space> [shape: f32[1], index: 0, kind: input, shape index: {}]   ;;  %s8083_s2 = inlined_call_operand.vmem [shape: f32[9,16,16], index: 2, kind: input, shape index: {}]   ;;  %s8084_s4 = inlined_call_operand.vmem [shape: f32[16,128], index: 4, kind: output, shape index: {}]  }
   0x1   :  { %6742 = vset.pattern.permute.xlu1 %v6883_v0  ;;  %6740 = vset.pattern.permute.xlu0 %v6883_v0  ;;  %v19_v1 = vld [vmem:[%s8080_s1 + $0x8] sm:$0xff]  ;;  %v18_v2 = vld [vmem:[%s8080_s1] sm:$0xff]  ;;  %v24_v5 = vld [vmem:[%s8081_s3 + $0x10] sm:$0xff]  ;;  %v6887_v18 = vmov 0   ;;  %v39_v33 = vlaneseq  ;;  %v6888_v39 = vmov 0.0   ;;  %v7045_v53 = vstv %s8082_s0 }
   0x2   :  { %v22_v3 = vld [vmem:[%s8081_s3] sm:$0xff]  ;;  %69 = vperm.xlu1 %6742, %v19_v1   ;;  %66 = vperm.xlu0 %6740, %v18_v2   ;;  %v23_v4 = vld [vmem:[%s8081_s3 + $0x8] sm:$0xff]  ;;  %v25_v6 = vld [vmem:[%s8081_s3 + $0x18] sm:$0xff]  ;;  %vm270_vm10 = vcmask 261120  }
   0x3   :  { %v6934_v7 = vpack.c.bf16 %v23_v4, %v22_v3  ;;  %v6937_v8 = vpack.c.bf16 %v25_v6, %v24_v5  ;;  %v26_v10 = vld [vmem:[%s8081_s3 + $0x20] sm:$0xff]  ;;  %v27_v11 = vld [vmem:[%s8081_s3 + $0x28] sm:$0xff]  ;;  %v28_v14 = vld [vmem:[%s8081_s3 + $0x30] sm:$0xff]  ;;  %v7025_v36 = vand.u32 127, %v39_v33 }
   0x4   :  { %v6947_v12 = vpack.c.bf16 %v27_v11, %v26_v10  ;;  %v29_v15 = vld [vmem:[%s8081_s3 + $0x38] sm:$0xff]  ;;  %v30_v19 = vld [vmem:[%s8081_s3 + $0x40] sm:$0xff]  ;;  %v31_v20 = vld [vmem:[%s8081_s3 + $0x48] sm:$0xff] }
   0x5   :  { %6245 = vmatprep.subr.bf16.mxu0 %v6934_v7  ;;  %v6957_v16 = vpack.c.bf16 %v29_v15, %v28_v14  ;;  %v6968_v21 = vpack.c.bf16 %v31_v20, %v30_v19  ;;  %v32_v22 = vld [vmem:[%s8081_s3 + $0x50] sm:$0xff]  ;;  %v33_v23 = vld [vmem:[%s8081_s3 + $0x58] sm:$0xff]  ;;  %v34_v25 = vld [vmem:[%s8081_s3 + $0x60] sm:$0xff] }
   0x6   :  { %6743 = vset.pattern.permute.xlu1 %v6884_v9  ;;  %6741 = vset.pattern.permute.xlu0 %v6884_v9  ;;  %v6979_v24 = vpack.c.bf16 %v33_v23, %v32_v22  ;;  %v35_v26 = vld [vmem:[%s8081_s3 + $0x68] sm:$0xff]  ;;  %v36_v28 = vld [vmem:[%s8081_s3 + $0x70] sm:$0xff]  ;;  %v37_v29 = vld [vmem:[%s8081_s3 + $0x78] sm:$0xff] }
   0x7   :  { %93 = vperm.xlu1 %6743, %v19_v1   ;;  %90 = vperm.xlu0 %6741, %v18_v2   ;;  %v6989_v27 = vpack.c.bf16 %v35_v26, %v34_v25  ;;  %v7001_v30 = vld [vmem:[%s8080_s1 + $0x10] sm:$0xff]  ;;  %v7004_v31 = vpack.c.bf16 %v37_v29, %v36_v28  ;;  %v7011_v32 = vld [vmem:[%s8080_s1 + $0x18] sm:$0xff]  ;;  %v296_v11 = vld [vmem:[%s8081_s3 + $0x100] sm:$0xff] }
   0x8   :  { %6247 = vmatpush3.bf16.msra.mxu0 %v6934_v7  ;;  %v292_v15 = vld [vmem:[%s8081_s3 + $0x80] sm:$0xff]  ;;  %v298_v20 = vld [vmem:[%s8081_s3 + $0x110] sm:$0xff]  ;;  %v299_v22 = vld [vmem:[%s8081_s3 + $0x118] sm:$0xff] }
   0x9   :  { %6249 = vmatprep.subr.bf16.mxu0 %v6937_v8  ;;  %v6288_v23 = vpack.c.bf16 %v299_v22, %v298_v20  ;;  %v294_v25 = vld [vmem:[%s8081_s3 + $0x90] sm:$0xff]  ;;  %v295_v26 = vld [vmem:[%s8081_s3 + $0x98] sm:$0xff]  ;;  %v566_v29 = vld [vmem:[%s8081_s3 + $0x120] sm:$0xff] }
   0xa   :  { %v6280_v28 = vpack.c.bf16 %v295_v26, %v294_v25  ;;  %v569_v22 = vld [vmem:[%s8081_s3 + $0x138] sm:$0xff] }
   0xb   :  { %6744 = vset.pattern.permute.xlu1 %v6885_v13  ;;  %6745 = vset.pattern.permute.xlu0 %v6885_v13 }
   0xc   :  { %118 = vperm.xlu1 %6744, %v18_v2   ;;  %121 = vperm.xlu0 %6745, %v19_v1  }
   0xd   :  { %6251 = vmatpush3.bf16.msra.mxu0 %v6937_v8 }
   0xe   :  { %6253 = vmatprep.subr.bf16.mxu0 %v6947_v12 }
  0x10   :  { %6746 = vset.pattern.permute.xlu1 %v6886_v17  ;;  %6747 = vset.pattern.permute.xlu0 %v6887_v18 }
  0x11   :  { %146 = vperm.xlu1 %6746, %v18_v2   ;;  %42 = vperm.xlu0 %6747, %v18_v2  }
  0x12   :  { %6255 = vmatpush3.bf16.msra.mxu0 %v6947_v12 }
  0x13   :  { %6257 = vmatprep.subr.bf16.mxu0 %v6957_v16 }
  0x15   :  { %149 = vperm.xlu1 %6746, %v19_v1   ;;  %6749 = vset.pattern.permute.xlu0 %v6883_v0 }
  0x16   :  { %6259 = vmatpush3.bf16.msra.mxu0 %v6957_v16  ;;  %72 = vperm.xlu0 %6749, %v7001_v30  }
  0x17   :  { %6261 = vmatprep.subr.bf16.mxu0 %v6968_v21 }
  0x19   :  { %6748 = vset.pattern.permute.xlu1 %v6887_v18 }
  0x1a   :  { %45 = vperm.xlu1 %6748, %v19_v1   ;;  %6263 = vmatpush3.bf16.msra.mxu0 %v6968_v21 }
  0x1b   :  { %6265 = vmatprep.subr.bf16.mxu0 %v6979_v24  ;;  %6756 = vset.pattern.permute.xlu0 %v6887_v18 }
  0x1e   :  { %6267 = vmatpush3.bf16.msra.mxu0 %v6979_v24  ;;  %6750 = vset.pattern.permute.xlu1 %v6884_v9 }
  0x1f   :  { %6269 = vmatprep.subr.bf16.mxu0 %v6989_v27  ;;  %96 = vperm.xlu1 %6750, %v7001_v30  }
  0x22   :  { %6271 = vmatpush3.bf16.msra.mxu0 %v6989_v27 }
  0x23   :  { %6273 = vmatprep.subr.bf16.mxu0 %v7004_v31  ;;  %6751 = vset.pattern.permute.xlu1 %v6883_v0 }
  0x24   :  { %75 = vperm.xlu1 %6751, %v7011_v32  }
  0x26   :  { %6275 = vmatpush3.bf16.msra.mxu0 %v7004_v31 }
  0x28   :  { %6752 = vset.pattern.permute.xlu1 %v6884_v9 }
  0x29   :  { %99 = vperm.xlu1 %6752, %v7011_v32  }
  0x2d   :  { %6753 = vset.pattern.permute.xlu1 %v6885_v13  ;;  %v297_v13 = vld [vmem:[%s8081_s3 + $0x108] sm:$0xff] }
  0x2e   :  { %124 = vperm.xlu1 %6753, %v7001_v30   ;;  %v6284_v14 = vpack.c.bf16 %v297_v13, %v296_v11 }
  0x30   :  { %6285 = vmatprep.subr.bf16.mxu1 %v6284_v14 }
  0x31   :  { %6287 = vmatpush3.bf16.msra.mxu1 %v6284_v14 }
  0x32   :  { %127 = vperm.xlu1 %6753, %v7011_v32   ;;  %6289 = vmatprep.subr.bf16.mxu1 %v6288_v23 }
  0x35   :  { %6291 = vmatpush3.bf16.msra.mxu1 %v6288_v23 }
  0x36   :  { %6754 = vset.pattern.permute.xlu1 %v6886_v17 }
  0x37   :  { %152 = vperm.xlu1 %6754, %v7001_v30  }
  0x3b   :  { %155 = vperm.xlu1 %6754, %v7011_v32  }
  0x3f   :  { %6755 = vset.pattern.permute.xlu1 %v6887_v18  ;;  %v293_v18 = vld [vmem:[%s8081_s3 + $0x88] sm:$0xff] }
  0x40   :  { %v6276_v19 = vpack.c.bf16 %v293_v18, %v292_v15 }
  0x42   :  { %6277 = vmatprep.subr.bf16.mxu0 %v6276_v19 }
  0x81   :  { %v70_v34 = vpop.permute.xlu1 %69  ;;  %v67_v35 = vpop.permute.xlu0 %66 }
  0x82   :  { %vm77_vm0 = vcmp.eq.s32.totalorder %v7025_v36, %v67_v35  ;;  %vm78_vm4 = vcmp.eq.s32.totalorder %v7025_v36, %v70_v34 }
  0x83   :  { %v5151_v40 = vsel %vm77_vm0, 1.0, %v6888_v39  ;;  %v5152_v50 = vsel %vm78_vm4, 1.0, %v6888_v39 }
  0x86   :  { %v94_v37 = vpop.permute.xlu1 %93  ;;  %v91_v38 = vpop.permute.xlu0 %90 }
  0x87   :  { %vm101_vm1 = vcmp.eq.s32.totalorder %v7025_v36, %v91_v38  ;;  %vm102_vm3 = vcmp.eq.s32.totalorder %v7025_v36, %v94_v37 }
  0x88   :  { %v5155_v41 = vsel %vm101_vm1, 1.0, %v6888_v39  ;;  %v5156_v46 = vsel %vm102_vm3, 1.0, %v6888_v39 }
  0x89   :  { %v113_v44 = vadd.f32 %v5155_v41, %v5151_v40  ;;  %v114_v54 = vadd.f32 %v5156_v46, %v5152_v50 }
  0x8b   :  { %v119_v42 = vpop.permute.xlu1 %118  ;;  %v122_v43 = vpop.permute.xlu0 %121 }
  0x8c   :  { %vm129_vm2 = vcmp.eq.s32.totalorder %v7025_v36, %v119_v42  ;;  %vm130_vm5 = vcmp.eq.s32.totalorder %v7025_v36, %v122_v43 }
  0x8d   :  { %v5159_v45 = vsel %vm129_vm2, 1.0, %v6888_v39  ;;  %v5160_v51 = vsel %vm130_vm5, 1.0, %v6888_v39  ;;  %vm7146_vm5 = vmpackc.low %vm270_vm10, %vm270_vm10 }
  0x8e   :  { %v141_v49 = vadd.f32 %v5159_v45, %v113_v44  ;;  %v142_v58 = vadd.f32 %v5160_v51, %v114_v54 }
  0x90   :  { %v147_v47 = vpop.permute.xlu1 %146  ;;  %v43_v48 = vpop.permute.xlu0 %42 }
  0x91   :  { %vm157_vm6 = vcmp.eq.s32.totalorder %v7025_v36, %v147_v47  ;;  %vm53_vm7 = vcmp.eq.s32.totalorder %v7025_v36, %v43_v48 }
  0x92   :  { %v5163_v52 = vsel %vm157_vm6, 1.0, %v6888_v39  ;;  %v5147_v57 = vsel %vm53_vm7, 1.0, %v6888_v39  ;;  %vm539_vm6 = vcmask 130048   ;;  %vm1829_vm7 = vcmask 523264  }
  0x93   :  { %v169_v55 = vadd.f32 %v5163_v52, %v141_v49 }
  0x94   :  { %v150_v56 = vpop.permute.xlu1 %149 }
  0x95   :  { %vm158_vm8 = vcmp.eq.s32.totalorder %v7025_v36, %v150_v56  ;;  %v175_v59 = vmul.f32 %v7045_v53, %v169_v55  ;;  %v73_v40 = vpop.permute.xlu0 %72 }
  0x96   :  { %v5164_v60 = vsel %vm158_vm8, 1.0, %v6888_v39  ;;  %vm79_vm12 = vcmp.eq.s32.totalorder %v7025_v36, %v73_v40 }
  0x97   :  { %v170_v61 = vadd.f32 %v5164_v60, %v142_v58  ;;  %v179_v62 = vadd.f32 %v5147_v57, %v175_v59  ;;  %v5153_v43 = vsel %vm79_vm12, 1.0, %v6888_v39 }
  0x99   :  { %v46_v63 = vpop.permute.xlu1 %45  ;;  %v176_v0 = vmul.f32 %v7045_v53, %v170_v61  ;;  %5695 = vmatprep.mubr.f32.mxu0 %v179_v62 }
  0x9a   :  { %vm54_vm9 = vcmp.eq.s32.totalorder %v7025_v36, %v46_v63 }
  0x9b   :  { %v5148_v1 = vsel %vm54_vm9, 1.0, %v6888_v39 }
  0x9c   :  { %v180_v2 = vadd.f32 %v5148_v1, %v176_v0  ;;  %v7117_v1 = vshrl.u32 %v39_v33, 7  ;;  %v7129_v33 = vld [vmem:[%s8081_s3 + $0x480] sm:$0xff] }
  0x9e   :  { %5696 = vmatmul.mubr.f32.vlgmr.msra.gmra.mrb[0].mxu0 %v180_v2  ;;  %v288_v11 = vsub.s32 0, %v7117_v1 }
  0x9f   :  { %6279 = vmatpush3.bf16.msra.mxu0 %v6276_v19 }
  0xa0   :  { %6281 = vmatprep.subr.bf16.mxu0 %v6280_v28  ;;  %v289_v15 = vrot.slane %v7129_v33, %v288_v11 }
  0xa3   :  { %6283 = vmatpush3.bf16.msra.mxu0 %v6280_v28 }
 0x171   :  { %v7054_v3 = vpop.f32.mrb[0].mxu0 }
 0x172   :  { %v7056_v4 = vpop.f32.mrb[1].mxu0  ;;  %v269_v5 = vmul.f32 %v7054_v3, %v7054_v3 }
 0x173   :  { %v268_v6 = vmul.f32 %v7056_v4, %v7056_v4 }
 0x174   :  { %v274_v9 = vsel %vm270_vm10, %v269_v5, 0.0 }
 0x175   :  { %275 = vadd.xlane.f32.xlu0 %v274_v9  ;;  %v271_v10 = vsel %vm270_vm10, %v268_v6, 0.0 }
 0x176   :  { %272 = vadd.xlane.f32.xlu1 %v271_v10 }
 0x187   :  { %48 = vperm.xlu1 %6755, %v7001_v30  }
 0x18b   :  { %51 = vperm.xlu0 %6756, %v7011_v32   ;;  %v97_v32 = vpop.permute.xlu1 %96 }
 0x18c   :  { %vm103_vm11 = vcmp.eq.s32.totalorder %v7025_v36, %v97_v32 }
 0x18d   :  { %v5157_v42 = vsel %vm103_vm11, 1.0, %v6888_v39 }
 0x18e   :  { %v115_v46 = vadd.f32 %v5157_v42, %v5153_v43 }
 0x18f   :  { %6757 = vset.pattern.permute.xlu0 %v6886_v17  ;;  %v567_v17 = vld [vmem:[%s8081_s3 + $0x128] sm:$0xff]  ;;  %v76_v34 = vpop.permute.xlu1 %75 }
 0x190   :  { %v7097_v30 = vpack.c.bf16 %v567_v17, %v566_v29  ;;  %vm80_vm13 = vcmp.eq.s32.totalorder %v7025_v36, %v76_v34  ;;  %v562_v29 = vld [vmem:[%s8081_s3 + $0xa0] sm:$0xff]  ;;  %v563_v17 = vld [vmem:[%s8081_s3 + $0xa8] sm:$0xff] }
 0x191   :  { %v5154_v44 = vsel %vm80_vm13, 1.0, %v6888_v39 }
 0x192   :  { %6307 = vmatprep.subr.bf16.mxu0 %v7097_v30 }
 0x193   :  { %v100_v35 = vpop.permute.xlu1 %99 }
 0x194   :  { %vm104_vm14 = vcmp.eq.s32.totalorder %v7025_v36, %v100_v35  ;;  %v564_v35 = vld [vmem:[%s8081_s3 + $0xb0] sm:$0xff] }
 0x195   :  { %v5158_v45 = vsel %vm104_vm14, 1.0, %v6888_v39 }
 0x196   :  { %v116_v49 = vadd.f32 %v5158_v45, %v5154_v44 }
 0x197   :  { %v125_v37 = vpop.permute.xlu1 %124 }
 0x198   :  { %vm131_vm15 = vcmp.eq.s32.totalorder %v7025_v36, %v125_v37  ;;  %v565_v37 = vld [vmem:[%s8081_s3 + $0xb8] sm:$0xff] }
 0x199   :  { %v5161_v47 = vsel %vm131_vm15, 1.0, %v6888_v39  ;;  %v6302_v43 = vpack.c.bf16 %v565_v37, %v564_v35 }
 0x19a   :  { %v143_v51 = vadd.f32 %v5161_v47, %v115_v46 }
 0x19b   :  { %v128_v38 = vpop.permute.xlu1 %127 }
 0x19c   :  { %vm132_vm0 = vcmp.eq.s32.totalorder %v7025_v36, %v128_v38 }
 0x19d   :  { %v5162_v50 = vsel %vm132_vm0, 1.0, %v6888_v39 }
 0x19e   :  { %v144_v55 = vadd.f32 %v5162_v50, %v116_v49  ;;  %v989_v49 = vld [vmem:[%s8081_s3 + $0xc8] sm:$0xff] }
 0x19f   :  { %v153_v41 = vpop.permute.xlu1 %152 }
 0x1a0   :  { %vm159_vm1 = vcmp.eq.s32.totalorder %v7025_v36, %v153_v41 }
 0x1a1   :  { %v5165_v52 = vsel %vm159_vm1, 1.0, %v6888_v39 }
 0x1a2   :  { %v171_v58 = vadd.f32 %v5165_v52, %v143_v51 }
 0x1a3   :  { %v156_v48 = vpop.permute.xlu1 %155 }
 0x1a4   :  { %vm160_vm2 = vcmp.eq.s32.totalorder %v7025_v36, %v156_v48  ;;  %v177_v2 = vmul.f32 %v7045_v53, %v171_v58  ;;  %v988_v48 = vld [vmem:[%s8081_s3 + $0xc0] sm:$0xff] }
 0x1a5   :  { %v5166_v59 = vsel %vm160_vm2, 1.0, %v6888_v39  ;;  %v6328_v50 = vpack.c.bf16 %v989_v49, %v988_v48 }
 0x1a6   :  { %v172_v63 = vadd.f32 %v5166_v59, %v144_v55  ;;  %v991_v55 = vld [vmem:[%s8081_s3 + $0xd8] sm:$0xff]  ;;  %v1335_v59 = vld [vmem:[%s8081_s3 + $0xe0] sm:$0xff] }
 0x1a8   :  { %v178_v10 = vmul.f32 %v7045_v53, %v172_v63  ;;  %v5179_v63 = vld [vmem:[%s8083_s2 + $0x10] sm:$0xff] }
 0x202   :  { %v276_v54 = vpop.xlane.xlu0 %275 }
 0x203   :  { %v279_v56 = vmul.f32 0.03125, %v276_v54  ;;  %v273_v57 = vpop.xlane.xlu1 %272  ;;  %v990_v54 = vld [vmem:[%s8081_s3 + $0xd0] sm:$0xff] }
 0x204   :  { %v278_v60 = vmul.f32 0.03125, %v273_v57  ;;  %v6332_v58 = vpack.c.bf16 %v991_v55, %v990_v54  ;;  %v5194_v55 = vld [vmem:[%s8083_s2 + $0x28] sm:$0xff] }
 0x205   :  { %v281_v61 = vadd.f32 1e-06, %v279_v56 }
 0x206   :  { %v280_v62 = vadd.f32 1e-06, %v278_v60  ;;  %v1336_v60 = vld [vmem:[%s8081_s3 + $0xe8] sm:$0xff] }
 0x207   :  { %6758 = vrsqrt.f32 %v281_v61  ;;  %v49_v0 = vpop.permute.xlu1 %48  ;;  %v6354_v61 = vpack.c.bf16 %v1336_v60, %v1335_v59 }
 0x208   :  { %6760 = vrsqrt.f32 %v280_v62  ;;  %vm55_vm3 = vcmp.eq.s32.totalorder %v7025_v36, %v49_v0  ;;  %v5180_v62 = vld [vmem:[%s8083_s2 + $0x18] sm:$0xff]  ;;  %v457_v0 = vld [vmem:[%s8083_s2 + $0x8] sm:$0xff] }
 0x209   :  { %v5149_v5 = vsel %vm55_vm3, 1.0, %v6888_v39 }
 0x20a   :  { %v181_v6 = vadd.f32 %v5149_v5, %v177_v2  ;;  %v52_v9 = vpop.permute.xlu0 %51  ;;  %v456_v5 = vld [vmem:[%s8083_s2] sm:$0xff] }
 0x20b   :  { %vm56_vm4 = vcmp.eq.s32.totalorder %v7025_v36, %v52_v9 }
 0x20c   :  { %v5150_v13 = vsel %vm56_vm4, 1.0, %v6888_v39  ;;  %5698 = vmatprep.mubr.f32.mxu0 %v181_v6  ;;  %v568_v39 = vld [vmem:[%s8081_s3 + $0x130] sm:$0xff] }
 0x20d   :  { %v182_v14 = vadd.f32 %v5150_v13, %v178_v10  ;;  %v6310_v28 = vpack.c.bf16 %v569_v22, %v568_v39 }
 0x20f   :  { %5699 = vmatmul.mubr.f32.gmra.mrb[2].mxu0 %v182_v14 }
 0x211   :  { %v6759_v18 = vpop.eup %6758 }
 0x212   :  { %v6761_v19 = vpop.eup %6760  ;;  %v285_v53 = vmul.f32 %v6759_v18, %v7054_v3  ;;  %v1337_v18 = vld [vmem:[%s8081_s3 + $0xf0] sm:$0xff] }
 0x213   :  { %v284_v36 = vmul.f32 %v6761_v19, %v7056_v4  ;;  %v1338_v19 = vld [vmem:[%s8081_s3 + $0xf8] sm:$0xff] }
 0x214   :  { %v7134_v20 = vmul.f32 %v289_v15, %v285_v53 }
 0x215   :  { %v7142_v23 = vmul.f32 %v289_v15, %v284_v36 }
 0x217   :  { %5709 = vmatprep.mubr.msk.f32.mxu0 %vm270_vm10, %v7142_v23  ;;  %5720 = vmatprep.mubr.msk.f32.mxu1 %vm270_vm10, %v7142_v23  ;;  %v7156_v26 = vpack.c.bf16 %v7134_v20, %v7142_v23 }
 0x218   :  { %5710 = vmatmul.mubr.msk.f32.vlgmr.msra.gmra.mrb[4].mxu0 %vm270_vm10, %v7134_v20  ;;  %5721 = vmatmul.mubr.msk.f32.vlgmr.msra.gmra.mrb[0].mxu1 %vm270_vm10, %v7134_v20 }
 0x219   :  { %6309 = vmatpush3.bf16.msra.mxu0 %v7097_v30  ;;  %6294 = vmatprep.subr.msk.bf16.mxu1 %vm7146_vm5, %v7156_v26  ;;  %v6298_v30 = vpack.c.bf16 %v563_v17, %v562_v29 }
 0x21a   :  { %5749 = vmatprep.mubr.msk.f32.mxu0 %vm270_vm10, %v7142_v23  ;;  %6297 = vmatpush3.bf16.xpose.msk.msra.mxu1 %vm7146_vm5, %v7156_v26 }
 0x21b   :  { %6311 = vmatprep.subr.bf16.mxu0 %v6310_v28  ;;  %6299 = vmatprep.subr.bf16.mxu1 %v6298_v30 }
 0x21d   :  { %6313 = vmatpush3.bf16.msra.mxu0 %v6310_v28  ;;  %v6358_v28 = vpack.c.bf16 %v1338_v19, %v1337_v18 }
 0x220   :  { %5750 = vmatmul.mubr.msk.f32.vlgmr.msra.gmra.mrb[6].mxu0 %vm270_vm10, %v7134_v20 }
 0x2e2   :  { %v7179_v32 = vpop.f32.mrb[2].mxu0 }
 0x2e3   :  { %v7181_v34 = vpop.f32.mrb[3].mxu0 }
 0x2eb   :  { %v5711_v38 = vpop.f32.mrb[4].mxu0  ;;  %v5722_v40 = vpop.f32.mrb[0].mxu1 }
 0x2ec   :  { %v372_v41 = vpop.f32.mrb[5].mxu0  ;;  %v447_v42 = vpop.f32.mrb[1].mxu1 }
 0x2ed   :  { %v7189_v44 = vpack.c.bf16 %v5722_v40, %v447_v42  ;;  %5727 = vmatprep.mubr.msk.f32.mxu1 %vm270_vm10, %v372_v41 }
 0x2ee   :  { %5728 = vmatmul.mubr.msk.f32.vlgmr.msra.gmra.mrb[2].mxu1 %vm270_vm10, %v5711_v38 }
 0x2ef   :  { %6301 = vmatpush3.bf16.msra.mxu1 %v6298_v30  ;;  %5738 = vmatprep.mubr.msk.f32.mxu1 %vm270_vm10, %v7142_v23 }
 0x2f0   :  { %6303 = vmatprep.subr.bf16.mxu1 %v6302_v43 }
 0x2f3   :  { %6305 = vmatpush3.bf16.msra.mxu1 %v6302_v43  ;;  %v5751_v45 = vpop.f32.mrb[6].mxu0 }
 0x2f4   :  { %v711_v46 = vpop.f32.mrb[7].mxu0  ;;  %6316 = vmatprep.subr.msk.bf16.mxu1 %vm7146_vm5, %v7156_v26 }
 0x2f5   :  { %v6320_v47 = vpack.c.bf16 %v5751_v45, %v711_v46 }
 0x2f6   :  { %5739 = vmatmul.mubr.msk.f32.vlgmr.msra.gmra.mrb[4].mxu1 %vm270_vm10, %v7134_v20 }
 0x2f7   :  { %6321 = vmatprep.subr.bf16.mxu0 %v6320_v47 }
 0x2f8   :  { %6323 = vmatpush3.bf16.msra.mxu0 %v6320_v47 }
 0x2f9   :  { %6325 = vmatprep.subr.bf16.mxu0 %v7189_v44 }
 0x2fc   :  { %6319 = vmatpush3.bf16.xpose.msk.msra.mxu1 %vm7146_vm5, %v7156_v26 }
 0x2fd   :  { %6329 = vmatprep.subr.bf16.mxu1 %v6328_v50 }
 0x3c1   :  { %v5729_v51 = vpop.f32.mrb[2].mxu1 }
 0x3c2   :  { %v530_v52 = vpop.f32.mrb[3].mxu1  ;;  %v536_v11 = vadd.f32 %v5729_v51, %v457_v0 }
 0x3c3   :  { %v531_v14 = vadd.f32 %v530_v52, %v456_v5 }
 0x3c4   :  { %v543_v53 = vsel %vm539_vm6, %v536_v11, -inf }
 0x3c5   :  { %v540_v39 = vsel %vm539_vm6, %v531_v14, -inf }
 0x3c9   :  { %v5740_v56 = vpop.f32.mrb[4].mxu1 }
 0x3ca   :  { %v636_v57 = vpop.f32.mrb[5].mxu1 }
 0x3cb   :  { %5756 = vmatprep.mubr.msk.f32.mxu1 %vm270_vm10, %v636_v57 }
 0x3cc   :  { %5757 = vmatmul.mubr.msk.f32.vlgmr.msra.gmra.mrb[6].mxu1 %vm270_vm10, %v5740_v56  ;;  %v5193_v56 = vld [vmem:[%s8083_s2 + $0x20] sm:$0xff] }
 0x3cd   :  { %6331 = vmatpush3.bf16.msra.mxu1 %v6328_v50  ;;  %5781 = vmatprep.mubr.msk.f32.mxu1 %vm270_vm10, %v7142_v23 }
 0x3ce   :  { %6333 = vmatprep.subr.bf16.mxu1 %v6332_v58 }
 0x3d1   :  { %6335 = vmatpush3.bf16.msra.mxu1 %v6332_v58 }
 0x3d2   :  { %6346 = vmatprep.subr.msk.bf16.mxu1 %vm7146_vm5, %v7156_v26 }
 0x3d4   :  { %5782 = vmatmul.mubr.msk.f32.vlgmr.msra.gmra.mrb[8].mxu1 %vm270_vm10, %v7134_v20 }
 0x3da   :  { %6349 = vmatpush3.bf16.xpose.msk.msra.mxu1 %vm7146_vm5, %v7156_v26 }
 0x3db   :  { %6355 = vmatprep.subr.bf16.mxu1 %v6354_v61 }
 0x49f   :  { %v5758_v2 = vpop.f32.mrb[6].mxu1 }
 0x4a0   :  { %v801_v6 = vadd.f32 %v5758_v2, %v5180_v62  ;;  %v795_v9 = vpop.f32.mrb[7].mxu1 }
 0x4a1   :  { %v796_v10 = vadd.f32 %v5179_v63, %v795_v9 }
 0x4a2   :  { %v807_v13 = vsel %vm539_vm6, %v801_v6, -inf }
 0x4a3   :  { %808 = vmax.xlane.f32.xlu0 %v807_v13  ;;  %v804_v15 = vsel %vm539_vm6, %v796_v10, -inf  ;;  %v993_v13 = vld [vmem:[%s8081_s3 + $0x148] sm:$0xff] }
 0x4a4   :  { %805 = vmax.xlane.f32.xlu1 %v804_v15 }
 0x4a7   :  { %v5783_v36 = vpop.f32.mrb[8].mxu1  ;;  %544 = vmax.xlane.f32.xlu0 %v543_v53 }
 0x4a8   :  { %v1062_v22 = vpop.f32.mrb[9].mxu1  ;;  %541 = vmax.xlane.f32.xlu1 %v540_v39 }
 0x4a9   :  { %5799 = vmatprep.mubr.msk.f32.mxu1 %vm270_vm10, %v1062_v22  ;;  %v994_v22 = vld [vmem:[%s8081_s3 + $0x150] sm:$0xff] }
 0x4aa   :  { %5800 = vmatmul.mubr.msk.f32.vlgmr.msra.gmra.mrb[10].mxu1 %vm270_vm10, %v5783_v36 }
 0x4ab   :  { %6357 = vmatpush3.bf16.msra.mxu1 %v6354_v61  ;;  %5817 = vmatprep.mubr.msk.f32.mxu1 %vm270_vm10, %v7142_v23 }
 0x4ac   :  { %6359 = vmatprep.subr.bf16.mxu1 %v6358_v28 }
 0x4af   :  { %6361 = vmatpush3.bf16.msra.mxu1 %v6358_v28  ;;  %v995_v28 = vld [vmem:[%s8081_s3 + $0x158] sm:$0xff] }
 0x4b0   :  { %6372 = vmatprep.subr.msk.bf16.mxu1 %vm7146_vm5, %v7156_v26 }
 0x4b2   :  { %5818 = vmatmul.mubr.msk.f32.vlgmr.msra.gmra.mrb[12].mxu1 %vm270_vm10, %v7134_v20 }
 0x4b8   :  { %6375 = vmatpush3.bf16.xpose.msk.msra.mxu1 %vm7146_vm5, %v7156_v26 }
 0x530   :  { %v809_v29 = vpop.xlane.xlu0 %808 }
 0x531   :  { %v811_v17 = vsub.f32 %v801_v6, %v809_v29  ;;  %v806_v30 = vpop.xlane.xlu1 %805 }
 0x532   :  { %v810_v35 = vsub.f32 %v796_v10, %v806_v30 }
 0x533   :  { %v814_v37 = vmul.f32 1.442695, %v811_v17  ;;  %v6340_v17 = vpack.c.bf16 %v995_v28, %v994_v22 }
 0x534   :  { %v812_v38 = vmul.f32 1.442695, %v810_v35  ;;  %v545_v40 = vpop.xlane.xlu0 %544 }
 0x535   :  { %6762 = vpow2.f32 %v814_v37  ;;  %v547_v41 = vsub.f32 %v536_v11, %v545_v40  ;;  %v542_v42 = vpop.xlane.xlu1 %541  ;;  %v992_v11 = vld [vmem:[%s8081_s3 + $0x140] sm:$0xff] }
 0x536   :  { %6764 = vpow2.f32 %v812_v38  ;;  %v546_v43 = vsub.f32 %v531_v14, %v542_v42  ;;  %v6336_v19 = vpack.c.bf16 %v993_v13, %v992_v11 }
 0x537   :  { %v550_v45 = vmul.f32 1.442695, %v547_v41 }
 0x538   :  { %v548_v46 = vmul.f32 1.442695, %v546_v43 }
 0x539   :  { %6766 = vpow2.f32 %v550_v45 }
 0x53a   :  { %6768 = vpow2.f32 %v548_v46  ;;  %v5206_v46 = vld [vmem:[%s8083_s2 + $0x38] sm:$0xff] }
 0x53f   :  { %v6763_v47 = vpop.eup %6762 }
 0x540   :  { %v6765_v48 = vpop.eup %6764  ;;  %v819_v26 = vsel %vm539_vm6, %v6763_v47, 0.0 }
 0x541   :  { %820 = vadd.xlane.f32.xlu0 %v819_v26  ;;  %v816_v49 = vsel %vm539_vm6, %v6765_v48, 0.0 }
 0x542   :  { %817 = vadd.xlane.f32.xlu1 %v816_v49 }
 0x543   :  { %v6767_v50 = vpop.eup %6766 }
 0x544   :  { %v6769_v51 = vpop.eup %6768  ;;  %v555_v52 = vsel %vm539_vm6, %v6767_v50, 0.0 }
 0x545   :  { %556 = vadd.xlane.f32.xlu0 %v555_v52  ;;  %v552_v54 = vsel %vm539_vm6, %v6769_v51, 0.0 }
 0x546   :  { %553 = vadd.xlane.f32.xlu1 %v552_v54 }
 0x57d   :  { %v5801_v57 = vpop.f32.mrb[10].mxu1 }
 0x57e   :  { %v1227_v58 = vadd.f32 %v5801_v57, %v5194_v55  ;;  %v1221_v59 = vpop.f32.mrb[11].mxu1 }
 0x57f   :  { %v1222_v60 = vadd.f32 %v5193_v56, %v1221_v59  ;;  %v1340_v59 = vld [vmem:[%s8081_s3 + $0x168] sm:$0xff] }
 0x580   :  { %v1233_v61 = vsel %vm539_vm6, %v1227_v58, -inf }
 0x581   :  { %1234 = vmax.xlane.f32.xlu0 %v1233_v61  ;;  %v1230_v62 = vsel %vm539_vm6, %v1222_v60, -inf }
 0x582   :  { %1231 = vmax.xlane.f32.xlu1 %v1230_v62 }
 0x585   :  { %v5819_v63 = vpop.f32.mrb[12].mxu1 }
 0x586   :  { %v1409_v0 = vpop.f32.mrb[13].mxu1 }
 0x587   :  { %5835 = vmatprep.mubr.msk.f32.mxu1 %vm270_vm10, %v1409_v0 }
 0x588   :  { %5836 = vmatmul.mubr.msk.f32.vlgmr.msra.gmra.mrb[14].mxu1 %vm270_vm10, %v5819_v63 }
 0x5ce   :  { %v821_v2 = vpop.xlane.xlu0 %820 }
 0x5cf   :  { %6770 = vrcp.f32 %v821_v2  ;;  %v818_v5 = vpop.xlane.xlu1 %817  ;;  %v1341_v2 = vld [vmem:[%s8081_s3 + $0x170] sm:$0xff] }
 0x5d0   :  { %6772 = vrcp.f32 %v818_v5  ;;  %v1342_v5 = vld [vmem:[%s8081_s3 + $0x178] sm:$0xff] }
 0x5d2   :  { %v557_v9 = vpop.xlane.xlu0 %556 }
 0x5d3   :  { %v554_v6 = vpop.xlane.xlu1 %553 }
 0x5d4   :  { %6774 = vrcp.f32 %v554_v6 }
 0x5d5   :  { %6776 = vrcp.f32 %v557_v9  ;;  %v6366_v9 = vpack.c.bf16 %v1342_v5, %v1341_v2  ;;  %v2228_v2 = vld [vmem:[%s8081_s3 + $0x1a8] sm:$0xff] }
 0x5d9   :  { %v6771_v10 = vpop.eup %6770 }
 0x5da   :  { %v6773_v14 = vpop.eup %6772  ;;  %v825_v18 = vmul.f32 %v6771_v10, %v6763_v47  ;;  %v5205_v47 = vld [vmem:[%s8083_s2 + $0x30] sm:$0xff] }
 0x5db   :  { %v824_v15 = vmul.f32 %v6773_v14, %v6765_v48 }
 0x5dd   :  { %5763 = vmatprep.mubr.msk.f32.mxu0 %vm539_vm6, %v824_v15 }
 0x5de   :  { %v6775_v53 = vpop.eup %6774  ;;  %5764 = vmatmul.mubr.msk.f32.vlgmr.msra.gmra.mrb[8].mxu0 %vm539_vm6, %v825_v18 }
 0x5df   :  { %6327 = vmatpush3.bf16.msra.mxu0 %v7189_v44  ;;  %v560_v36 = vmul.f32 %v6775_v53, %v6769_v51  ;;  %v6777_v39 = vpop.eup %6776 }
 0x5e0   :  { %6337 = vmatprep.subr.bf16.mxu0 %v6336_v19  ;;  %v561_v29 = vmul.f32 %v6777_v39, %v6767_v50  ;;  %v1935_v39 = vmul.f32 %v7181_v34, %v7181_v34 }
 0x5e1   :  { %5770 = vmatprep.mubr.msk.f32.mxu0 %vm539_vm6, %v560_v36 }
 0x5e2   :  { %v1937_v28 = vsel %vm270_vm10, %v1935_v39, 0.0  ;;  %v1707_v39 = vld [vmem:[%s8081_s3 + $0x388] sm:$0xff] }
 0x5e6   :  { %5771 = vmatmul.mubr.msk.f32.vlgmr.msra.gmra.mrb[8].mxu0 %vm539_vm6, %v561_v29  ;;  %v1957_v29 = vld [vmem:[%s8081_s3 + $0x180] sm:$0xff] }
 0x5e7   :  { %6339 = vmatpush3.bf16.msra.mxu0 %v6336_v19  ;;  %5792 = vmatprep.mubr.msk.f32.mxu0 %vm270_vm10, %v7142_v23 }
 0x5e8   :  { %6341 = vmatprep.subr.bf16.mxu0 %v6340_v17 }
 0x5eb   :  { %6343 = vmatpush3.bf16.msra.mxu0 %v6340_v17  ;;  %v1958_v17 = vld [vmem:[%s8081_s3 + $0x188] sm:$0xff] }
 0x5ee   :  { %5793 = vmatmul.mubr.msk.f32.vlgmr.msra.gmra.mrb[10].mxu0 %vm270_vm10, %v7134_v20 }
 0x60e   :  { %v1235_v44 = vpop.xlane.xlu0 %1234 }
 0x60f   :  { %v1237_v30 = vsub.f32 %v1227_v58, %v1235_v44  ;;  %v1232_v35 = vpop.xlane.xlu1 %1231  ;;  %v1339_v58 = vld [vmem:[%s8081_s3 + $0x160] sm:$0xff]  ;;  %v6420_v44 = vpack.c.bf16 %v1958_v17, %v1957_v29  ;;  %v1709_v29 = vld [vmem:[%s8081_s3 + $0x398] sm:$0xff] }
 0x610   :  { %v1236_v37 = vsub.f32 %v1222_v60, %v1232_v35  ;;  %v6362_v63 = vpack.c.bf16 %v1340_v59, %v1339_v58  ;;  %v1960_v35 = vld [vmem:[%s8081_s3 + $0x198] sm:$0xff]  ;;  %v1963_v59 = vld [vmem:[%s8081_s3 + $0x210] sm:$0xff] }
 0x611   :  { %v1240_v38 = vmul.f32 1.442695, %v1237_v30  ;;  %6421 = vmatprep.subr.bf16.mxu1 %v6420_v44  ;;  %v1959_v30 = vld [vmem:[%s8081_s3 + $0x190] sm:$0xff] }
 0x612   :  { %v1238_v40 = vmul.f32 1.442695, %v1236_v37  ;;  %6423 = vmatpush3.bf16.msra.mxu1 %v6420_v44  ;;  %v6424_v37 = vpack.c.bf16 %v1960_v35, %v1959_v30 }
 0x613   :  { %6778 = vpow2.f32 %v1240_v38  ;;  %v1961_v38 = vld [vmem:[%s8081_s3 + $0x200] sm:$0xff] }
 0x614   :  { %6780 = vpow2.f32 %v1238_v40  ;;  %6425 = vmatprep.subr.bf16.mxu1 %v6424_v37  ;;  %v1962_v40 = vld [vmem:[%s8081_s3 + $0x208] sm:$0xff] }
 0x616   :  { %6427 = vmatpush3.bf16.msra.mxu1 %v6424_v37 }
 0x61d   :  { %v6779_v41 = vpop.eup %6778 }
 0x61e   :  { %v6781_v42 = vpop.eup %6780  ;;  %v1245_v43 = vsel %vm539_vm6, %v6779_v41, 0.0 }
 0x61f   :  { %1246 = vadd.xlane.f32.xlu0 %v1245_v43  ;;  %v1242_v45 = vsel %vm539_vm6, %v6781_v42, 0.0 }
 0x620   :  { %1243 = vadd.xlane.f32.xlu1 %v1242_v45 }
 0x65b   :  { %v5837_v48 = vpop.f32.mrb[14].mxu1 }
 0x65c   :  { %v1574_v26 = vadd.f32 %v5837_v48, %v5206_v46  ;;  %v1568_v49 = vpop.f32.mrb[15].mxu1 }
 0x65d   :  { %v1569_v50 = vadd.f32 %v5205_v47, %v1568_v49 }
 0x65e   :  { %v1580_v51 = vsel %vm539_vm6, %v1574_v26, -inf }
 0x65f   :  { %1581 = vmax.xlane.f32.xlu0 %v1580_v51  ;;  %v1577_v52 = vsel %vm539_vm6, %v1569_v50, -inf }
 0x660   :  { %1578 = vmax.xlane.f32.xlu1 %v1577_v52  ;;  %v1953_v52 = vsub.s32 3, %v7117_v1 }
 0x6ac   :  { %v1247_v55 = vpop.xlane.xlu0 %1246 }
 0x6ad   :  { %v1244_v54 = vpop.xlane.xlu1 %1243 }
 0x6ae   :  { %6782 = vrcp.f32 %v1244_v54 }
 0x6af   :  { %6784 = vrcp.f32 %v1247_v55  ;;  %v1954_v55 = vrot.slane %v7129_v33, %v1953_v52  ;;  %v1711_v52 = vld [vmem:[%s8081_s3 + $0x3a8] sm:$0xff] }
 0x6b8   :  { %v6783_v56 = vpop.eup %6782 }
 0x6b9   :  { %v1250_v57 = vmul.f32 %v6783_v56, %v6781_v42  ;;  %v6785_v0 = vpop.eup %6784 }
 0x6ba   :  { %v1251_v6 = vmul.f32 %v6785_v0, %v6779_v41  ;;  %v6428_v41 = vpack.c.bf16 %v1962_v40, %v1961_v38  ;;  %v2227_v0 = vld [vmem:[%s8081_s3 + $0x1a0] sm:$0xff] }
 0x6bb   :  { %5806 = vmatprep.mubr.msk.f32.mxu0 %vm539_vm6, %v1250_v57 }
 0x6bc   :  { %6429 = vmatprep.subr.bf16.mxu1 %v6428_v41 }
 0x6c1   :  { %v5794_v60 = vpop.f32.mrb[10].mxu0 }
 0x6c2   :  { %v1137_v61 = vpop.f32.mrb[11].mxu0 }
 0x6c3   :  { %v6350_v62 = vpack.c.bf16 %v5794_v60, %v1137_v61  ;;  %v1964_v60 = vld [vmem:[%s8081_s3 + $0x218] sm:$0xff] }
 0x6c5   :  { %6351 = vmatprep.subr.bf16.mxu0 %v6350_v62 }
 0x6c6   :  { %6353 = vmatpush3.bf16.msra.mxu0 %v6350_v62 }
 0x6c7   :  { %6363 = vmatprep.subr.bf16.mxu0 %v6362_v63 }
 0x6c9   :  { %5807 = vmatmul.mubr.msk.f32.vlgmr.msra.gmra.mrb[8].mxu0 %vm539_vm6, %v1251_v6 }
 0x6ca   :  { %6365 = vmatpush3.bf16.msra.mxu0 %v6362_v63  ;;  %5828 = vmatprep.mubr.msk.f32.mxu0 %vm270_vm10, %v7142_v23  ;;  %v1936_v23 = vmul.f32 %v7179_v32, %v7179_v32  ;;  %v6432_v63 = vpack.c.bf16 %v1964_v60, %v1963_v59  ;;  %v1715_v59 = vld [vmem:[%s8081_s3 + $0x408] sm:$0xff] }
 0x6cb   :  { %6367 = vmatprep.subr.bf16.mxu0 %v6366_v9 }
 0x6cc   :  { %v1940_v22 = vsel %vm270_vm10, %v1936_v23, 0.0 }
 0x6ce   :  { %6369 = vmatpush3.bf16.msra.mxu0 %v6366_v9 }
 0x6d1   :  { %5829 = vmatmul.mubr.msk.f32.vlgmr.msra.gmra.mrb[12].mxu0 %vm270_vm10, %v7134_v20 }
 0x6ec   :  { %v1582_v10 = vpop.xlane.xlu0 %1581 }
 0x6ed   :  { %v1584_v11 = vsub.f32 %v1574_v26, %v1582_v10  ;;  %v1579_v13 = vpop.xlane.xlu1 %1578  ;;  %v6442_v10 = vpack.c.bf16 %v2228_v2, %v2227_v0  ;;  %v3001_v0 = vld [vmem:[%s8081_s3 + $0x1e8] sm:$0xff] }
 0x6ee   :  { %v1583_v14 = vsub.f32 %v1569_v50, %v1579_v13  ;;  %v2229_v13 = vld [vmem:[%s8081_s3 + $0x1b0] sm:$0xff] }
 0x6ef   :  { %v1587_v15 = vmul.f32 1.442695, %v1584_v11 }
 0x6f0   :  { %v1585_v18 = vmul.f32 1.442695, %v1583_v14  ;;  %v2230_v14 = vld [vmem:[%s8081_s3 + $0x1b8] sm:$0xff] }
 0x6f1   :  { %6786 = vpow2.f32 %v1587_v15 }
 0x6f2   :  { %6788 = vpow2.f32 %v1585_v18  ;;  %v6446_v18 = vpack.c.bf16 %v2230_v14, %v2229_v13  ;;  %v1702_v14 = vsub.s32 1, %v7117_v1 }
 0x6fb   :  { %v7331_v19 = vpop.eup %6786 }
 0x6fc   :  { %v6789_v53 = vpop.eup %6788  ;;  %v1592_v36 = vsel %vm539_vm6, %v7331_v19, 0.0 }
 0x6fd   :  { %1593 = vadd.xlane.f32.xlu0 %v1592_v36  ;;  %v1589_v20 = vsel %vm539_vm6, %v6789_v53, 0.0  ;;  %v2654_v36 = vld [vmem:[%s8081_s3 + $0x1c8] sm:$0xff] }
 0x6fe   :  { %1590 = vadd.xlane.f32.xlu1 %v1589_v20  ;;  %v1706_v20 = vld [vmem:[%s8081_s3 + $0x380] sm:$0xff] }
 0x701   :  { %1941 = vadd.xlane.f32.xlu0 %v1940_v22  ;;  %v1708_v22 = vld [vmem:[%s8081_s3 + $0x390] sm:$0xff] }
 0x702   :  { %1938 = vadd.xlane.f32.xlu1 %v1937_v28  ;;  %v6380_v28 = vpack.c.bf16 %v1707_v39, %v1706_v20  ;;  %v6386_v17 = vpack.c.bf16 %v1709_v29, %v1708_v22  ;;  %v1716_v20 = vld [vmem:[%s8081_s3 + $0x410] sm:$0xff]  ;;  %v1717_v39 = vld [vmem:[%s8081_s3 + $0x418] sm:$0xff] }
 0x703   :  { %v6408_v29 = vpack.c.bf16 %v1717_v39, %v1716_v20  ;;  %v5229_v20 = vld [vmem:[%s8083_s2 + $0x40] sm:$0xff] }
 0x78a   :  { %v1594_v42 = vpop.xlane.xlu0 %1593 }
 0x78b   :  { %v1591_v43 = vpop.xlane.xlu1 %1590 }
 0x78c   :  { %6790 = vrcp.f32 %v1591_v43 }
 0x78e   :  { %v1942_v45 = vpop.xlane.xlu0 %1941 }
 0x78f   :  { %v1944_v46 = vmul.f32 0.03125, %v1942_v45  ;;  %v1939_v47 = vpop.xlane.xlu1 %1938 }
 0x790   :  { %v1943_v48 = vmul.f32 0.03125, %v1939_v47 }
 0x791   :  { %v1946_v26 = vadd.f32 1e-06, %v1944_v46 }
 0x792   :  { %v1945_v49 = vadd.f32 1e-06, %v1943_v48 }
 0x793   :  { %6792 = vrsqrt.f32 %v1946_v26 }
 0x794   :  { %6794 = vrsqrt.f32 %v1945_v49 }
 0x795   :  { %6796 = vrcp.f32 %v1594_v42 }
 0x796   :  { %v6791_v50 = vpop.eup %6790 }
 0x797   :  { %v1597_v51 = vmul.f32 %v6791_v50, %v6789_v53 }
 0x799   :  { %5842 = vmatprep.mubr.msk.f32.mxu0 %vm539_vm6, %v1597_v51  ;;  %v1710_v51 = vld [vmem:[%s8081_s3 + $0x3a0] sm:$0xff] }
 0x79d   :  { %v6793_v54 = vpop.eup %6792 }
 0x79e   :  { %v6795_v56 = vpop.eup %6794  ;;  %v1950_v57 = vmul.f32 %v6793_v54, %v7179_v32  ;;  %v6392_v54 = vpack.c.bf16 %v1711_v52, %v1710_v51  ;;  %v3003_v51 = vld [vmem:[%s8081_s3 + $0x1f8] sm:$0xff] }
 0x79f   :  { %v1949_v58 = vmul.f32 %v6795_v56, %v7181_v34  ;;  %v6797_v11 = vpop.eup %6796  ;;  %v1713_v56 = vld [vmem:[%s8081_s3 + $0x3b8] sm:$0xff] }
 0x7a0   :  { %v7373_v62 = vmul.f32 %v1954_v55, %v1950_v57  ;;  %v1598_v15 = vmul.f32 %v6797_v11, %v7331_v19  ;;  %v2653_v19 = vld [vmem:[%s8081_s3 + $0x1c0] sm:$0xff] }
 0x7a1   :  { %v7371_v61 = vmul.f32 %v1954_v55, %v1949_v58  ;;  %v6472_v23 = vpack.c.bf16 %v2654_v36, %v2653_v19  ;;  %v1712_v55 = vld [vmem:[%s8081_s3 + $0x3b0] sm:$0xff]  ;;  %v1714_v58 = vld [vmem:[%s8081_s3 + $0x400] sm:$0xff] }
 0x7a2   :  { %v6398_v57 = vpack.c.bf16 %v1713_v56, %v1712_v55  ;;  %v6404_v60 = vpack.c.bf16 %v1715_v59, %v1714_v58  ;;  %v2232_v58 = vld [vmem:[%s8081_s3 + $0x228] sm:$0xff] }
 0x7a3   :  { %5891 = vmatprep.mubr.msk.f32.mxu1 %vm270_vm10, %v7371_v61  ;;  %v7401_v53 = vpack.c.bf16 %v7373_v62, %v7371_v61 }
 0x7a4   :  { %5892 = vmatmul.mubr.msk.f32.vlgmr.msra.gmra.mrb[16].mxu1 %vm270_vm10, %v7373_v62  ;;  %v5830_v5 = vpop.f32.mrb[12].mxu0 }
 0x7a5   :  { %6431 = vmatpush3.bf16.msra.mxu1 %v6428_v41  ;;  %5902 = vmatprep.mubr.msk.f32.mxu1 %vm270_vm10, %v7371_v61  ;;  %v1484_v6 = vpop.f32.mrb[13].mxu0 }
 0x7a6   :  { %v6376_v9 = vpack.c.bf16 %v5830_v5, %v1484_v6  ;;  %6433 = vmatprep.subr.bf16.mxu1 %v6432_v63 }
 0x7a8   :  { %6377 = vmatprep.subr.bf16.mxu0 %v6376_v9 }
 0x7a9   :  { %6435 = vmatpush3.bf16.msra.mxu1 %v6432_v63  ;;  %6379 = vmatpush3.bf16.msra.mxu0 %v6376_v9  ;;  %v3000_v63 = vld [vmem:[%s8081_s3 + $0x1e0] sm:$0xff] }
 0x7aa   :  { %6443 = vmatprep.subr.bf16.mxu1 %v6442_v10  ;;  %6382 = vmatprep.subr.msk.bf16.mxu0 %vm7146_vm5, %v6380_v28  ;;  %v6498_v2 = vpack.c.bf16 %v3001_v0, %v3000_v63 }
 0x7ac   :  { %5903 = vmatmul.mubr.msk.f32.vlgmr.msra.gmra.mrb[18].mxu1 %vm270_vm10, %v7373_v62  ;;  %5843 = vmatmul.mubr.msk.f32.vlgmr.msra.gmra.mrb[8].mxu0 %vm539_vm6, %v1598_v15 }
 0x7ad   :  { %6445 = vmatpush3.bf16.msra.mxu1 %v6442_v10  ;;  %5920 = vmatprep.mubr.msk.f32.mxu1 %vm270_vm10, %v7371_v61 }
 0x7ae   :  { %6447 = vmatprep.subr.bf16.mxu1 %v6446_v18 }
 0x7b1   :  { %6449 = vmatpush3.bf16.msra.mxu1 %v6446_v18  ;;  %v1703_v18 = vrot.slane %v7129_v33, %v1702_v14  ;;  %v1718_v33 = vld [vmem:[%s8081_s3 + $0x420] sm:$0xff] }
 0x7b2   :  { %6460 = vmatprep.subr.msk.bf16.mxu1 %vm7146_vm5, %v7401_v53  ;;  %6385 = vmatpush3.bf16.xpose.msk.msra.mxu0 %vm7146_vm5, %v6380_v28 }
 0x7b3   :  { %6388 = vmatprep.subr.msk.bf16.mxu0 %vm7146_vm5, %v6386_v17 }
 0x7b4   :  { %5921 = vmatmul.mubr.msk.f32.vlgmr.msra.gmra.mrb[20].mxu1 %vm270_vm10, %v7373_v62 }
 0x7ba   :  { %6463 = vmatpush3.bf16.xpose.msk.msra.mxu1 %vm7146_vm5, %v7401_v53  ;;  %6391 = vmatpush3.bf16.xpose.msk.msra.mxu0 %vm7146_vm5, %v6386_v17  ;;  %v1719_v17 = vld [vmem:[%s8081_s3 + $0x428] sm:$0xff] }
 0x7bb   :  { %6473 = vmatprep.subr.bf16.mxu1 %v6472_v23  ;;  %6394 = vmatprep.subr.msk.bf16.mxu0 %vm7146_vm5, %v6392_v54 }
 0x7c2   :  { %6397 = vmatpush3.bf16.xpose.msk.msra.mxu0 %vm7146_vm5, %v6392_v54 }
 0x7c3   :  { %6400 = vmatprep.subr.msk.bf16.mxu0 %vm7146_vm5, %v6398_v57 }
 0x7ca   :  { %6403 = vmatpush3.bf16.xpose.msk.msra.mxu0 %vm7146_vm5, %v6398_v57  ;;  %v2231_v57 = vld [vmem:[%s8081_s3 + $0x220] sm:$0xff] }
 0x7cb   :  { %6405 = vmatprep.subr.bf16.mxu0 %v6404_v60  ;;  %v6450_v0 = vpack.c.bf16 %v2232_v58, %v2231_v57  ;;  %v5253_v57 = vld [vmem:[%s8083_s2 + $0x60] sm:$0xff] }
 0x877   :  { %v7437_v44 = vpop.f32.mrb[16].mxu1 }
 0x878   :  { %v7439_v30 = vpop.f32.mrb[17].mxu1 }
 0x87f   :  { %v5904_v35 = vpop.f32.mrb[18].mxu1  ;;  %v5844_v37 = vpop.f32.mrb[8].mxu0 }
 0x880   :  { %v2112_v38 = vpop.f32.mrb[19].mxu1  ;;  %v7442_v40 = vadd.f32 %v5844_v37, %v7054_v3  ;;  %v1671_v41 = vpop.f32.mrb[9].mxu0  ;;  %v2655_v3 = vld [vmem:[%s8081_s3 + $0x1d0] sm:$0xff] }
 0x881   :  { %v7444_v42 = vpack.c.bf16 %v5904_v35, %v2112_v38  ;;  %v7447_v43 = vadd.f32 %v1671_v41, %v7056_v4  ;;  %v2656_v4 = vld [vmem:[%s8081_s3 + $0x1d8] sm:$0xff]  ;;  %v6412_v35 = vpack.c.bf16 %v1719_v17, %v1718_v33  ;;  %v1720_v37 = vld [vmem:[%s8081_s3 + $0x430] sm:$0xff] }
 0x882   :  { %v1685_v45 = vmul.f32 %v7442_v40, %v7442_v40  ;;  %v6476_v50 = vpack.c.bf16 %v2656_v4, %v2655_v3  ;;  %v1721_v38 = vld [vmem:[%s8081_s3 + $0x438] sm:$0xff] }
 0x883   :  { %v1684_v46 = vmul.f32 %v7447_v43, %v7447_v43  ;;  %v6416_v41 = vpack.c.bf16 %v1721_v38, %v1720_v37 }
 0x884   :  { %v1689_v47 = vsel %vm270_vm10, %v1685_v45, 0.0  ;;  %v5240_v45 = vld [vmem:[%s8083_s2 + $0x58] sm:$0xff] }
 0x885   :  { %1690 = vadd.xlane.f32.xlu0 %v1689_v47  ;;  %v1686_v48 = vsel %vm270_vm10, %v1684_v46, 0.0  ;;  %v5239_v46 = vld [vmem:[%s8083_s2 + $0x50] sm:$0xff] }
 0x886   :  { %1687 = vadd.xlane.f32.xlu1 %v1686_v48 }
 0x887   :  { %v5922_v26 = vpop.f32.mrb[20].mxu1 }
 0x888   :  { %v2301_v49 = vpop.f32.mrb[21].mxu1 }
 0x889   :  { %5938 = vmatprep.mubr.msk.f32.mxu1 %vm270_vm10, %v2301_v49 }
 0x88a   :  { %5939 = vmatmul.mubr.msk.f32.vlgmr.msra.gmra.mrb[22].mxu1 %vm270_vm10, %v5922_v26 }
 0x88b   :  { %6475 = vmatpush3.bf16.msra.mxu1 %v6472_v23  ;;  %5963 = vmatprep.mubr.msk.f32.mxu1 %vm270_vm10, %v7371_v61 }
 0x88c   :  { %6477 = vmatprep.subr.bf16.mxu1 %v6476_v50 }
 0x88f   :  { %6479 = vmatpush3.bf16.msra.mxu1 %v6476_v50  ;;  %v3002_v50 = vld [vmem:[%s8081_s3 + $0x1f0] sm:$0xff] }
 0x890   :  { %6490 = vmatprep.subr.msk.bf16.mxu1 %vm7146_vm5, %v7401_v53  ;;  %v6502_v55 = vpack.c.bf16 %v3003_v51, %v3002_v50 }
 0x892   :  { %5964 = vmatmul.mubr.msk.f32.vlgmr.msra.gmra.mrb[24].mxu1 %vm270_vm10, %v7373_v62 }
 0x898   :  { %6493 = vmatpush3.bf16.xpose.msk.msra.mxu1 %vm7146_vm5, %v7401_v53 }
 0x899   :  { %6499 = vmatprep.subr.bf16.mxu1 %v6498_v2 }
 0x912   :  { %v1691_v5 = vpop.xlane.xlu0 %1690 }
 0x913   :  { %v1693_v6 = vmul.f32 0.03125, %v1691_v5  ;;  %v1688_v9 = vpop.xlane.xlu1 %1687  ;;  %v2234_v5 = vld [vmem:[%s8081_s3 + $0x238] sm:$0xff] }
 0x914   :  { %v1692_v10 = vmul.f32 0.03125, %v1688_v9 }
 0x915   :  { %v1695_v11 = vadd.f32 1e-06, %v1693_v6 }
 0x916   :  { %v1694_v13 = vadd.f32 1e-06, %v1692_v10 }
 0x917   :  { %6798 = vrsqrt.f32 %v1695_v11 }
 0x918   :  { %6800 = vrsqrt.f32 %v1694_v13 }
 0x921   :  { %v6799_v15 = vpop.eup %6798 }
 0x922   :  { %v6801_v19 = vpop.eup %6800  ;;  %v1699_v36 = vmul.f32 %v6799_v15, %v7442_v40 }
 0x923   :  { %v1698_v23 = vmul.f32 %v6801_v19, %v7447_v43 }
 0x924   :  { %v1705_v28 = vmul.f32 %v1703_v18, %v1699_v36 }
 0x925   :  { %v1704_v22 = vmul.f32 %v1703_v18, %v1698_v23  ;;  %v5230_v23 = vld [vmem:[%s8083_s2 + $0x48] sm:$0xff] }
 0x927   :  { %5861 = vmatprep.mubr.msk.f32.mxu0 %vm270_vm10, %v1704_v22 }
 0x928   :  { %5862 = vmatmul.mubr.msk.f32.vlgmr.msra.gmra.mrb[14].mxu0 %vm270_vm10, %v1705_v28 }
 0x929   :  { %6407 = vmatpush3.bf16.msra.mxu0 %v6404_v60 }
 0x92a   :  { %6409 = vmatprep.subr.bf16.mxu0 %v6408_v29 }
 0x92d   :  { %6411 = vmatpush3.bf16.msra.mxu0 %v6408_v29 }
 0x92e   :  { %6413 = vmatprep.subr.bf16.mxu0 %v6412_v35 }
 0x931   :  { %6415 = vmatpush3.bf16.msra.mxu0 %v6412_v35 }
 0x932   :  { %6417 = vmatprep.subr.bf16.mxu0 %v6416_v41 }
 0x935   :  { %6419 = vmatpush3.bf16.msra.mxu0 %v6416_v41 }
 0x936   :  { %6438 = vmatprep.subr.msk.bf16.mxu0 %vm7146_vm5, %v7401_v53 }
 0x95d   :  { %v5940_v47 = vpop.f32.mrb[22].mxu1 }
 0x95e   :  { %v2466_v48 = vadd.f32 %v5940_v47, %v5240_v45  ;;  %v2460_v3 = vpop.f32.mrb[23].mxu1 }
 0x95f   :  { %v2461_v4 = vadd.f32 %v5239_v46, %v2460_v3 }
 0x960   :  { %v2472_v26 = vsel %vm539_vm6, %v2466_v48, -inf }
 0x961   :  { %2473 = vmax.xlane.f32.xlu0 %v2472_v26  ;;  %v2469_v49 = vsel %vm539_vm6, %v2461_v4, -inf }
 0x962   :  { %2470 = vmax.xlane.f32.xlu1 %v2469_v49 }
 0x965   :  { %v5965_v52 = vpop.f32.mrb[24].mxu1 }
 0x966   :  { %v2727_v54 = vpop.f32.mrb[25].mxu1 }
 0x967   :  { %5981 = vmatprep.mubr.msk.f32.mxu1 %vm270_vm10, %v2727_v54 }
 0x968   :  { %5982 = vmatmul.mubr.msk.f32.vlgmr.msra.gmra.mrb[26].mxu1 %vm270_vm10, %v5965_v52 }
 0x969   :  { %6501 = vmatpush3.bf16.msra.mxu1 %v6498_v2  ;;  %5999 = vmatprep.mubr.msk.f32.mxu1 %vm270_vm10, %v7371_v61  ;;  %v2233_v2 = vld [vmem:[%s8081_s3 + $0x230] sm:$0xff] }
 0x96a   :  { %6503 = vmatprep.subr.bf16.mxu1 %v6502_v55  ;;  %v6454_v6 = vpack.c.bf16 %v2234_v5, %v2233_v2 }
 0x96d   :  { %6505 = vmatpush3.bf16.msra.mxu1 %v6502_v55 }
 0x96e   :  { %6516 = vmatprep.subr.msk.bf16.mxu1 %vm7146_vm5, %v7401_v53 }
 0x970   :  { %6000 = vmatmul.mubr.msk.f32.vlgmr.msra.gmra.mrb[28].mxu1 %vm270_vm10, %v7373_v62 }
 0x976   :  { %6519 = vmatpush3.bf16.xpose.msk.msra.mxu1 %vm7146_vm5, %v7401_v53 }
 0x9ee   :  { %v2474_v11 = vpop.xlane.xlu0 %2473 }
 0x9ef   :  { %v2471_v13 = vpop.xlane.xlu1 %2470 }
 0x9f0   :  { %v2475_v14 = vsub.f32 %v2461_v4, %v2471_v13 }
 0x9f2   :  { %v2477_v18 = vmul.f32 1.442695, %v2475_v14 }
 0x9fb   :  { %v5863_v56 = vpop.f32.mrb[14].mxu0 }
 0x9fc   :  { %v1818_v59 = vpop.f32.mrb[15].mxu0  ;;  %v1828_v63 = vmax.f32 %v5863_v56, 0.0  ;;  %v5254_v56 = vld [vmem:[%s8083_s2 + $0x68] sm:$0xff] }
 0x9fd   :  { %v1827_v60 = vmax.f32 %v1818_v59, 0.0 }
 0x9ff   :  { %5880 = vmatprep.mubr.msk.f32.mxu0 %vm1829_vm7, %v1827_v60 }
 0xa00   :  { %5881 = vmatmul.mubr.msk.f32.vlgmr.msra.gmra.mrb[16].mxu0 %vm1829_vm7, %v1828_v63 }
 0xa01   :  { %6441 = vmatpush3.bf16.xpose.msk.msra.mxu0 %vm7146_vm5, %v7401_v53  ;;  %5909 = vmatprep.mubr.msk.f32.mxu0 %vm270_vm10, %v7439_v30 }
 0xa02   :  { %6451 = vmatprep.subr.bf16.mxu0 %v6450_v0 }
 0xa08   :  { %5910 = vmatmul.mubr.msk.f32.vlgmr.msra.gmra.mrb[18].mxu0 %vm270_vm10, %v7437_v44  ;;  %v2476_v44 = vsub.f32 %v2466_v48, %v2474_v11 }
 0xa09   :  { %6453 = vmatpush3.bf16.msra.mxu0 %v6450_v0  ;;  %5931 = vmatprep.mubr.msk.f32.mxu0 %vm270_vm10, %v7371_v61 }
 0xa0a   :  { %6455 = vmatprep.subr.bf16.mxu0 %v6454_v6  ;;  %v2479_v15 = vmul.f32 1.442695, %v2476_v44 }
 0xa0c   :  { %6802 = vpow2.f32 %v2479_v15 }
 0xa0d   :  { %6457 = vmatpush3.bf16.msra.mxu0 %v6454_v6  ;;  %6804 = vpow2.f32 %v2477_v18 }
 0xa10   :  { %5932 = vmatmul.mubr.msk.f32.vlgmr.msra.gmra.mrb[20].mxu0 %vm270_vm10, %v7373_v62 }
 0xa16   :  { %v6803_v17 = vpop.eup %6802 }
 0xa17   :  { %v6805_v37 = vpop.eup %6804  ;;  %v2484_v38 = vsel %vm539_vm6, %v6803_v17, 0.0 }
 0xa18   :  { %v2481_v45 = vsel %vm539_vm6, %v6805_v37, 0.0 }
 0xa3b   :  { %v5983_v53 = vpop.f32.mrb[26].mxu1 }
 0xa3c   :  { %v2886_v30 = vpop.f32.mrb[27].mxu1  ;;  %v2892_v60 = vadd.f32 %v5983_v53, %v5254_v56  ;;  %v2657_v53 = vld [vmem:[%s8081_s3 + $0x240] sm:$0xff] }
 0xa3d   :  { %v2887_v2 = vadd.f32 %v5253_v57, %v2886_v30  ;;  %v2658_v30 = vld [vmem:[%s8081_s3 + $0x248] sm:$0xff] }
 0xa3e   :  { %v2898_v11 = vsel %vm539_vm6, %v2892_v60, -inf  ;;  %v6480_v44 = vpack.c.bf16 %v2658_v30, %v2657_v53  ;;  %v3377_v30 = vld [vmem:[%s8081_s3 + $0x310] sm:$0xff] }
 0xa3f   :  { %v2895_v13 = vsel %vm539_vm6, %v2887_v2, -inf }
 0xa43   :  { %v6001_v9 = vpop.f32.mrb[28].mxu1 }
 0xa44   :  { %v3074_v10 = vpop.f32.mrb[29].mxu1 }
 0xa45   :  { %6017 = vmatprep.mubr.msk.f32.mxu1 %vm270_vm10, %v3074_v10 }
 0xa46   :  { %6018 = vmatmul.mubr.msk.f32.vlgmr.msra.gmra.mrb[30].mxu1 %vm270_vm10, %v6001_v9 }
 0xad3   :  { %v7585_v19 = vpop.f32.mrb[16].mxu0 }
 0xad4   :  { %v7587_v36 = vpop.f32.mrb[17].mxu0 }
 0xadb   :  { %v5911_v39 = vpop.f32.mrb[18].mxu0 }
 0xadc   :  { %v2202_v22 = vadd.f32 %v5911_v39, %v5230_v23  ;;  %v2196_v28 = vpop.f32.mrb[19].mxu0 }
 0xadd   :  { %v2197_v29 = vadd.f32 %v5229_v20, %v2196_v28 }
 0xade   :  { %v2208_v33 = vsel %vm539_vm6, %v2202_v22, -inf }
 0xadf   :  { %2209 = vmax.xlane.f32.xlu0 %v2208_v33  ;;  %v2205_v35 = vsel %vm539_vm6, %v2197_v29, -inf  ;;  %v2660_v33 = vld [vmem:[%s8081_s3 + $0x258] sm:$0xff] }
 0xae0   :  { %2206 = vmax.xlane.f32.xlu1 %v2205_v35 }
 0xae3   :  { %2485 = vadd.xlane.f32.xlu0 %v2484_v38  ;;  %v5933_v41 = vpop.f32.mrb[20].mxu0 }
 0xae4   :  { %v2376_v46 = vpop.f32.mrb[21].mxu0  ;;  %2482 = vadd.xlane.f32.xlu1 %v2481_v45  ;;  %v5265_v45 = vld [vmem:[%s8083_s2 + $0x70] sm:$0xff] }
 0xae5   :  { %v6464_v47 = vpack.c.bf16 %v5933_v41, %v2376_v46  ;;  %v5266_v41 = vld [vmem:[%s8083_s2 + $0x78] sm:$0xff] }
 0xae7   :  { %6465 = vmatprep.subr.bf16.mxu0 %v6464_v47 }
 0xae8   :  { %6467 = vmatpush3.bf16.msra.mxu0 %v6464_v47 }
 0xae9   :  { %6469 = vmatprep.subr.bf16.mxu0 %v7444_v42 }
 0xb19   :  { %v7600_v48 = vpop.f32.mrb[30].mxu1 }
 0xb1a   :  { %v7602_v3 = vpop.f32.mrb[31].mxu1 }
 0xb6c   :  { %v2210_v4 = vpop.xlane.xlu0 %2209 }
 0xb6d   :  { %v2212_v26 = vsub.f32 %v2202_v22, %v2210_v4  ;;  %v2207_v49 = vpop.xlane.xlu1 %2206  ;;  %v3239_v4 = vadd.f32 %v7600_v48, %v5266_v41 }
 0xb6e   :  { %v2211_v50 = vsub.f32 %v2197_v29, %v2207_v49  ;;  %v2659_v29 = vld [vmem:[%s8081_s3 + $0x250] sm:$0xff]  ;;  %v3234_v49 = vadd.f32 %v5265_v45, %v7602_v3 }
 0xb6f   :  { %v2215_v51 = vmul.f32 1.442695, %v2212_v26  ;;  %v6484_v38 = vpack.c.bf16 %v2660_v33, %v2659_v29 }
 0xb70   :  { %v2213_v52 = vmul.f32 1.442695, %v2211_v50  ;;  %v2486_v54 = vpop.xlane.xlu0 %2485 }
 0xb71   :  { %6806 = vpow2.f32 %v2215_v51  ;;  %v2483_v55 = vpop.xlane.xlu1 %2482  ;;  %v3245_v51 = vsel %vm539_vm6, %v3239_v4, -inf }
 0xb72   :  { %6808 = vpow2.f32 %v2213_v52  ;;  %v3242_v52 = vsel %vm539_vm6, %v3234_v49, -inf }
 0xb73   :  { %6810 = vrcp.f32 %v2486_v54 }
 0xb74   :  { %6812 = vrcp.f32 %v2483_v55 }
 0xb7b   :  { %v6807_v58 = vpop.eup %6806 }
 0xb7c   :  { %v6809_v59 = vpop.eup %6808  ;;  %v2220_v63 = vsel %vm539_vm6, %v6807_v58, 0.0 }
 0xb7d   :  { %v6811_v0 = vpop.eup %6810  ;;  %2221 = vadd.xlane.f32.xlu0 %v2220_v63  ;;  %v2217_v5 = vsel %vm539_vm6, %v6809_v59, 0.0 }
 0xb7e   :  { %v6813_v6 = vpop.eup %6812  ;;  %2218 = vadd.xlane.f32.xlu1 %v2217_v5  ;;  %v2490_v10 = vmul.f32 %v6811_v0, %v6803_v17  ;;  %v7653_v0 = vadd.f32 %v7585_v19, %v7442_v40 }
 0xb7f   :  { %v2489_v9 = vmul.f32 %v6813_v6, %v6805_v37 }
 0xb81   :  { %5945 = vmatprep.mubr.msk.f32.mxu0 %vm539_vm6, %v2489_v9  ;;  %2899 = vmax.xlane.f32.xlu0 %v2898_v11 }
 0xb82   :  { %5946 = vmatmul.mubr.msk.f32.vlgmr.msra.gmra.mrb[22].mxu0 %vm539_vm6, %v2490_v10  ;;  %2896 = vmax.xlane.f32.xlu1 %v2895_v13  ;;  %v1914_v10 = vmul.f32 %v7653_v0, %v7653_v0  ;;  %v3376_v13 = vld [vmem:[%s8081_s3 + $0x308] sm:$0xff] }
 0xb83   :  { %6471 = vmatpush3.bf16.msra.mxu0 %v7444_v42 }
 0xb84   :  { %6481 = vmatprep.subr.bf16.mxu0 %v6480_v44  ;;  %v1918_v19 = vsel %vm270_vm10, %v1914_v10, 0.0 }
 0xc0a   :  { %v2222_v14 = vpop.xlane.xlu0 %2221 }
 0xc0b   :  { %6814 = vrcp.f32 %v2222_v14  ;;  %v2219_v15 = vpop.xlane.xlu1 %2218 }
 0xc0c   :  { %6816 = vrcp.f32 %v2219_v15  ;;  %v3647_v15 = vld [vmem:[%s8081_s3 + $0x2a0] sm:$0xff] }
 0xc0e   :  { %v2900_v18 = vpop.xlane.xlu0 %2899 }
 0xc0f   :  { %v2902_v23 = vsub.f32 %v2892_v60, %v2900_v18  ;;  %v2897_v20 = vpop.xlane.xlu1 %2896  ;;  %v3648_v18 = vld [vmem:[%s8081_s3 + $0x2a8] sm:$0xff] }
 0xc10   :  { %v2901_v39 = vsub.f32 %v2887_v2, %v2897_v20  ;;  %v7657_v2 = vadd.f32 %v7587_v36, %v7447_v43  ;;  %v3375_v36 = vld [vmem:[%s8081_s3 + $0x300] sm:$0xff] }
 0xc11   :  { %v2905_v22 = vmul.f32 1.442695, %v2902_v23  ;;  %v6532_v53 = vpack.c.bf16 %v3376_v13, %v3375_v36  ;;  %v6546_v23 = vpack.c.bf16 %v3648_v18, %v3647_v15  ;;  %v3004_v20 = vld [vmem:[%s8081_s3 + $0x260] sm:$0xff]  ;;  %v3374_v36 = vld [vmem:[%s8081_s3 + $0x298] sm:$0xff] }
 0xc12   :  { %v2903_v42 = vmul.f32 1.442695, %v2901_v39  ;;  %v1913_v40 = vmul.f32 %v7657_v2, %v7657_v2  ;;  %v3005_v39 = vld [vmem:[%s8081_s3 + $0x268] sm:$0xff] }
 0xc13   :  { %6818 = vpow2.f32 %v2905_v22  ;;  %6533 = vmatprep.subr.bf16.mxu1 %v6532_v53  ;;  %v6506_v29 = vpack.c.bf16 %v3005_v39, %v3004_v20 }
 0xc14   :  { %6820 = vpow2.f32 %v2903_v42  ;;  %v1915_v43 = vsel %vm270_vm10, %v1913_v40, 0.0  ;;  %6535 = vmatpush3.bf16.msra.mxu1 %v6532_v53 }
 0xc15   :  { %v6815_v28 = vpop.eup %6814 }
 0xc16   :  { %v6817_v17 = vpop.eup %6816  ;;  %v2226_v37 = vmul.f32 %v6815_v28, %v6807_v58 }
 0xc17   :  { %v2225_v35 = vmul.f32 %v6817_v17, %v6809_v59  ;;  %v3006_v17 = vld [vmem:[%s8081_s3 + $0x270] sm:$0xff] }
 0xc19   :  { %5952 = vmatprep.mubr.msk.f32.mxu0 %vm539_vm6, %v2225_v35  ;;  %v3007_v35 = vld [vmem:[%s8081_s3 + $0x278] sm:$0xff] }
 0xc1a   :  { %5953 = vmatmul.mubr.msk.f32.vlgmr.msra.gmra.mrb[22].mxu0 %vm539_vm6, %v2226_v37 }
 0xc1b   :  { %6483 = vmatpush3.bf16.msra.mxu0 %v6480_v44  ;;  %5974 = vmatprep.mubr.msk.f32.mxu0 %vm270_vm10, %v7371_v61  ;;  %v3378_v44 = vld [vmem:[%s8081_s3 + $0x318] sm:$0xff] }
 0xc1c   :  { %6485 = vmatprep.subr.bf16.mxu0 %v6484_v38  ;;  %v6536_v14 = vpack.c.bf16 %v3378_v44, %v3377_v30 }
 0xc1d   :  { %v7639_v46 = vpop.eup %6818 }
 0xc1e   :  { %v6821_v47 = vpop.eup %6820  ;;  %v2910_v26 = vsel %vm539_vm6, %v7639_v46, 0.0  ;;  %6537 = vmatprep.subr.bf16.mxu1 %v6536_v14 }
 0xc1f   :  { %6487 = vmatpush3.bf16.msra.mxu0 %v6484_v38  ;;  %2911 = vadd.xlane.f32.xlu0 %v2910_v26  ;;  %v2907_v50 = vsel %vm539_vm6, %v6821_v47, 0.0  ;;  %v6510_v38 = vpack.c.bf16 %v3007_v35, %v3006_v17 }
 0xc20   :  { %2908 = vadd.xlane.f32.xlu1 %v2907_v50  ;;  %6539 = vmatpush3.bf16.msra.mxu1 %v6536_v14 }
 0xc21   :  { %6547 = vmatprep.subr.bf16.mxu1 %v6546_v23 }
 0xc22   :  { %5975 = vmatmul.mubr.msk.f32.vlgmr.msra.gmra.mrb[24].mxu0 %vm270_vm10, %v7373_v62 }
 0xc23   :  { %3246 = vmax.xlane.f32.xlu0 %v3245_v51 }
 0xc24   :  { %3243 = vmax.xlane.f32.xlu1 %v3242_v52 }
 0xcac   :  { %v2912_v48 = vpop.xlane.xlu0 %2911 }
 0xcad   :  { %v2909_v54 = vpop.xlane.xlu1 %2908 }
 0xcae   :  { %6822 = vrcp.f32 %v2909_v54 }
 0xcb0   :  { %v3247_v55 = vpop.xlane.xlu0 %3246 }
 0xcb1   :  { %v3249_v56 = vsub.f32 %v3239_v4, %v3247_v55  ;;  %v3244_v3 = vpop.xlane.xlu1 %3243 }
 0xcb2   :  { %v3248_v57 = vsub.f32 %v3234_v49, %v3244_v3 }
 0xcb3   :  { %v3252_v58 = vmul.f32 1.442695, %v3249_v56 }
 0xcb4   :  { %v3250_v59 = vmul.f32 1.442695, %v3248_v57  ;;  %v3649_v57 = vld [vmem:[%s8081_s3 + $0x2b0] sm:$0xff] }
 0xcb5   :  { %6824 = vpow2.f32 %v3252_v58  ;;  %v3650_v58 = vld [vmem:[%s8081_s3 + $0x2b8] sm:$0xff] }
 0xcb6   :  { %6826 = vpow2.f32 %v3250_v59 }
 0xcb7   :  { %6828 = vrcp.f32 %v2912_v48 }
 0xcb8   :  { %v6823_v60 = vpop.eup %6822 }
 0xcb9   :  { %v2915_v63 = vmul.f32 %v6823_v60, %v6821_v47 }
 0xcbb   :  { %5988 = vmatprep.mubr.msk.f32.mxu0 %vm539_vm6, %v2915_v63  ;;  %v6550_v63 = vpack.c.bf16 %v3650_v58, %v3649_v57 }
 0xcbf   :  { %v7659_v5 = vpop.eup %6824 }
 0xcc0   :  { %v6827_v6 = vpop.eup %6826  ;;  %v3257_v9 = vsel %vm539_vm6, %v7659_v5, 0.0 }
 0xcc1   :  { %3258 = vadd.xlane.f32.xlu0 %v3257_v9  ;;  %v3254_v11 = vsel %vm539_vm6, %v6827_v6, 0.0  ;;  %v6829_v33 = vpop.eup %6828 }
 0xcc2   :  { %3255 = vadd.xlane.f32.xlu1 %v3254_v11  ;;  %v2916_v37 = vmul.f32 %v6829_v33, %v7639_v46 }
 0xcc5   :  { %1919 = vadd.xlane.f32.xlu0 %v1918_v19 }
 0xcc6   :  { %1916 = vadd.xlane.f32.xlu1 %v1915_v43  ;;  %v3373_v43 = vld [vmem:[%s8081_s3 + $0x290] sm:$0xff] }
 0xcc7   :  { %v6528_v53 = vpack.c.bf16 %v3374_v36, %v3373_v43 }
 0xcf5   :  { %v5976_v22 = vpop.f32.mrb[24].mxu0 }
 0xcf6   :  { %v2802_v42 = vpop.f32.mrb[25].mxu0 }
 0xcf7   :  { %v6494_v28 = vpack.c.bf16 %v5976_v22, %v2802_v42 }
 0xcf9   :  { %6495 = vmatprep.subr.bf16.mxu0 %v6494_v28 }
 0xcfa   :  { %6497 = vmatpush3.bf16.msra.mxu0 %v6494_v28 }
 0xcfb   :  { %6507 = vmatprep.subr.bf16.mxu0 %v6506_v29 }
 0xcfd   :  { %5989 = vmatmul.mubr.msk.f32.vlgmr.msra.gmra.mrb[22].mxu0 %vm539_vm6, %v2916_v37 }
 0xcfe   :  { %6509 = vmatpush3.bf16.msra.mxu0 %v6506_v29  ;;  %6010 = vmatprep.mubr.msk.f32.mxu0 %vm270_vm10, %v7371_v61  ;;  %v1931_v61 = vsub.s32 2, %v7117_v1 }
 0xcff   :  { %6511 = vmatprep.subr.bf16.mxu0 %v6510_v38 }
 0xd02   :  { %6513 = vmatpush3.bf16.msra.mxu0 %v6510_v38 }
 0xd05   :  { %6011 = vmatmul.mubr.msk.f32.vlgmr.msra.gmra.mrb[26].mxu0 %vm270_vm10, %v7373_v62  ;;  %v7711_v62 = vld [vmem:[%s8081_s3 + $0x480] sm:$0xff] }
 0xd06   :  { %v1932_v54 = vrot.slane %v7711_v62, %v1931_v61 }
 0xd4e   :  { %v3259_v41 = vpop.xlane.xlu0 %3258 }
 0xd4f   :  { %v3256_v45 = vpop.xlane.xlu1 %3255 }
 0xd50   :  { %6830 = vrcp.f32 %v3256_v45 }
 0xd52   :  { %v1920_v47 = vpop.xlane.xlu0 %1919 }
 0xd53   :  { %v1922_v4 = vmul.f32 0.03125, %v1920_v47  ;;  %v1917_v26 = vpop.xlane.xlu1 %1916 }
 0xd54   :  { %v1921_v46 = vmul.f32 0.03125, %v1917_v26 }
 0xd55   :  { %v1924_v49 = vadd.f32 1e-06, %v1922_v4 }
 0xd56   :  { %v1923_v50 = vadd.f32 1e-06, %v1921_v46  ;;  %v3651_v46 = vld [vmem:[%s8081_s3 + $0x320] sm:$0xff] }
 0xd57   :  { %6832 = vrsqrt.f32 %v1924_v49  ;;  %v3652_v49 = vld [vmem:[%s8081_s3 + $0x328] sm:$0xff] }
 0xd58   :  { %6834 = vrsqrt.f32 %v1923_v50  ;;  %v4070_v50 = vld [vmem:[%s8081_s3 + $0x2c0] sm:$0xff] }
 0xd59   :  { %6836 = vrcp.f32 %v3259_v41 }
 0xd5a   :  { %v6831_v51 = vpop.eup %6830 }
 0xd5b   :  { %v3262_v52 = vmul.f32 %v6831_v51, %v6827_v6  ;;  %v3372_v6 = vld [vmem:[%s8081_s3 + $0x288] sm:$0xff]  ;;  %v6554_v51 = vpack.c.bf16 %v3652_v49, %v3651_v46 }
 0xd5d   :  { %6024 = vmatprep.mubr.msk.f32.mxu0 %vm539_vm6, %v3262_v52  ;;  %v4071_v52 = vld [vmem:[%s8081_s3 + $0x2c8] sm:$0xff] }
 0xd5e   :  { %v6576_v61 = vpack.c.bf16 %v4071_v52, %v4070_v50 }
 0xd61   :  { %v6833_v48 = vpop.eup %6832 }
 0xd62   :  { %v6835_v55 = vpop.eup %6834  ;;  %v1928_v56 = vmul.f32 %v6833_v48, %v7653_v0  ;;  %v3653_v48 = vld [vmem:[%s8081_s3 + $0x330] sm:$0xff] }
 0xd63   :  { %v1927_v3 = vmul.f32 %v6835_v55, %v7657_v2  ;;  %v3371_v2 = vld [vmem:[%s8081_s3 + $0x280] sm:$0xff]  ;;  %v6837_v19 = vpop.eup %6836  ;;  %v4072_v55 = vld [vmem:[%s8081_s3 + $0x2d0] sm:$0xff] }
 0xd64   :  { %v7724_v60 = vmul.f32 %v1932_v54, %v1928_v56  ;;  %v6524_v40 = vpack.c.bf16 %v3372_v6, %v3371_v2  ;;  %v3263_v13 = vmul.f32 %v6837_v19, %v7659_v5  ;;  %v4073_v56 = vld [vmem:[%s8081_s3 + $0x2d8] sm:$0xff]  ;;  %v7846_v19 = vld [vmem:[%s8083_s2 + $0x80] sm:$0xff] }
 0xd65   :  { %v7722_v59 = vmul.f32 %v1932_v54, %v1927_v3  ;;  %v3654_v54 = vld [vmem:[%s8081_s3 + $0x338] sm:$0xff]  ;;  %v6580_v6 = vpack.c.bf16 %v4073_v56, %v4072_v55 }
 0xd66   :  { %v6558_v2 = vpack.c.bf16 %v3654_v54, %v3653_v48 }
 0xd67   :  { %6046 = vmatprep.mubr.msk.f32.mxu1 %vm270_vm10, %v7722_v59  ;;  %v7732_v0 = vpack.c.bf16 %v7724_v60, %v7722_v59 }
 0xd68   :  { %6047 = vmatmul.mubr.msk.f32.vlgmr.msra.gmra.mrb[32].mxu1 %vm270_vm10, %v7724_v60 }
 0xd69   :  { %6549 = vmatpush3.bf16.msra.mxu1 %v6546_v23 }
 0xd6a   :  { %6551 = vmatprep.subr.bf16.mxu1 %v6550_v63 }
 0xd6d   :  { %6553 = vmatpush3.bf16.msra.mxu1 %v6550_v63 }
 0xd6e   :  { %6564 = vmatprep.subr.msk.bf16.mxu1 %vm7146_vm5, %v7732_v0 }
 0xdd8   :  { %v6012_v9 = vpop.f32.mrb[26].mxu0 }
 0xdd9   :  { %v3149_v10 = vpop.f32.mrb[27].mxu0 }
 0xdda   :  { %v6520_v11 = vpack.c.bf16 %v6012_v9, %v3149_v10  ;;  %v4414_v9 = vld [vmem:[%s8081_s3 + $0x2e0] sm:$0xff]  ;;  %v4415_v10 = vld [vmem:[%s8081_s3 + $0x2e8] sm:$0xff] }
 0xddc   :  { %6521 = vmatprep.subr.bf16.mxu0 %v6520_v11 }
 0xddd   :  { %6523 = vmatpush3.bf16.msra.mxu0 %v6520_v11  ;;  %v6602_v11 = vpack.c.bf16 %v4415_v10, %v4414_v9 }
 0xdde   :  { %6525 = vmatprep.subr.bf16.mxu0 %v6524_v40 }
 0xde0   :  { %6025 = vmatmul.mubr.msk.f32.vlgmr.msra.gmra.mrb[22].mxu0 %vm539_vm6, %v3263_v13 }
 0xde1   :  { %6527 = vmatpush3.bf16.msra.mxu0 %v6524_v40  ;;  %v7841_v40 = vld [vmem:[%s8083_s2 + $0x88] sm:$0xff] }
 0xde2   :  { %6529 = vmatprep.subr.bf16.mxu0 %v6528_v53 }
 0xde5   :  { %6531 = vmatpush3.bf16.msra.mxu0 %v6528_v53 }
 0xde6   :  { %6542 = vmatprep.subr.msk.bf16.mxu0 %vm7146_vm5, %v7732_v0 }
 0xe3b   :  { %v6048_v30 = vpop.f32.mrb[32].mxu1 }
 0xe3c   :  { %v3532_v44 = vpop.f32.mrb[33].mxu1 }
 0xe3d   :  { %v7754_v14 = vpack.c.bf16 %v6048_v30, %v3532_v44 }
 0xeb3   :  { %v6026_v15 = vpop.f32.mrb[22].mxu0 }
 0xeb4   :  { %v7757_v18 = vadd.f32 %v6026_v15, %v7179_v32  ;;  %v3336_v5 = vpop.f32.mrb[23].mxu0 }
 0xeb5   :  { %v7760_v23 = vadd.f32 %v3336_v5, %v7181_v34  ;;  %v3367_v34 = vsub.s32 4, %v7117_v1 }
 0xeb6   :  { %v3350_v20 = vmul.f32 %v7757_v18, %v7757_v18 }
 0xeb7   :  { %v3349_v39 = vmul.f32 %v7760_v23, %v7760_v23  ;;  %v3368_v38 = vrot.slane %v7711_v62, %v3367_v34 }
 0xeb8   :  { %v3354_v22 = vsel %vm270_vm10, %v3350_v20, 0.0 }
 0xeb9   :  { %3355 = vadd.xlane.f32.xlu0 %v3354_v22  ;;  %v3351_v42 = vsel %vm270_vm10, %v3349_v39, 0.0 }
 0xeba   :  { %3352 = vadd.xlane.f32.xlu1 %v3351_v42  ;;  %v4416_v42 = vld [vmem:[%s8081_s3 + $0x2f0] sm:$0xff] }
 0xf46   :  { %v3356_v28 = vpop.xlane.xlu0 %3355 }
 0xf47   :  { %v3358_v29 = vmul.f32 0.03125, %v3356_v28  ;;  %v3353_v32 = vpop.xlane.xlu1 %3352  ;;  %v4417_v28 = vld [vmem:[%s8081_s3 + $0x2f8] sm:$0xff] }
 0xf48   :  { %v3357_v33 = vmul.f32 0.03125, %v3353_v32 }
 0xf49   :  { %v3360_v17 = vadd.f32 1e-06, %v3358_v29 }
 0xf4a   :  { %v3359_v35 = vadd.f32 1e-06, %v3357_v33 }
 0xf4b   :  { %6838 = vrsqrt.f32 %v3360_v17 }
 0xf4c   :  { %6840 = vrsqrt.f32 %v3359_v35 }
 0xf55   :  { %v6839_v37 = vpop.eup %6838 }
 0xf56   :  { %v6841_v41 = vpop.eup %6840  ;;  %v3364_v45 = vmul.f32 %v6839_v37, %v7757_v18  ;;  %v6606_v37 = vpack.c.bf16 %v4417_v28, %v4416_v42 }
 0xf57   :  { %v3363_v47 = vmul.f32 %v6841_v41, %v7760_v23 }
 0xf58   :  { %v7774_v26 = vmul.f32 %v3368_v38, %v3364_v45 }
 0xf59   :  { %v7772_v4 = vmul.f32 %v3368_v38, %v3363_v47 }
 0xf5b   :  { %6035 = vmatprep.mubr.msk.f32.mxu0 %vm270_vm10, %v7772_v4  ;;  %6064 = vmatprep.mubr.msk.f32.mxu1 %vm270_vm10, %v7772_v4 }
 0xf5c   :  { %6036 = vmatmul.mubr.msk.f32.vlgmr.msra.gmra.mrb[28].mxu0 %vm270_vm10, %v7774_v26  ;;  %6065 = vmatmul.mubr.msk.f32.vlgmr.msra.gmra.mrb[34].mxu1 %vm270_vm10, %v7774_v26 }
 0xf5d   :  { %6545 = vmatpush3.bf16.xpose.msk.msra.mxu0 %vm7146_vm5, %v7732_v0  ;;  %6567 = vmatpush3.bf16.xpose.msk.msra.mxu1 %vm7146_vm5, %v7732_v0 }
 0xf5e   :  { %6555 = vmatprep.subr.bf16.mxu0 %v6554_v51  ;;  %6577 = vmatprep.subr.bf16.mxu1 %v6576_v61 }
0x102f   :  { %v6037_v3 = vpop.f32.mrb[28].mxu0  ;;  %v6066_v57 = vpop.f32.mrb[34].mxu1 }
0x1030   :  { %v3451_v58 = vpop.f32.mrb[29].mxu0  ;;  %v3721_v63 = vpop.f32.mrb[35].mxu1 }
0x1031   :  { %6053 = vmatprep.mubr.msk.f32.mxu0 %vm270_vm10, %v3451_v58  ;;  %6082 = vmatprep.mubr.msk.f32.mxu1 %vm270_vm10, %v3721_v63 }
0x1032   :  { %6054 = vmatmul.mubr.msk.f32.vlgmr.msra.gmra.mrb[30].mxu0 %vm270_vm10, %v6037_v3  ;;  %6083 = vmatmul.mubr.msk.f32.vlgmr.msra.gmra.mrb[36].mxu1 %vm270_vm10, %v6066_v57 }
0x1033   :  { %6557 = vmatpush3.bf16.msra.mxu0 %v6554_v51  ;;  %6579 = vmatpush3.bf16.msra.mxu1 %v6576_v61 }
0x1034   :  { %6075 = vmatprep.mubr.msk.f32.mxu0 %vm270_vm10, %v7722_v59  ;;  %6107 = vmatprep.mubr.msk.f32.mxu1 %vm270_vm10, %v7772_v4 }
0x1035   :  { %6559 = vmatprep.subr.bf16.mxu0 %v6558_v2  ;;  %6581 = vmatprep.subr.bf16.mxu1 %v6580_v6 }
0x1037   :  { %6561 = vmatpush3.bf16.msra.mxu0 %v6558_v2  ;;  %6583 = vmatpush3.bf16.msra.mxu1 %v6580_v6 }
0x1038   :  { %6594 = vmatprep.subr.msk.bf16.mxu1 %vm7146_vm5, %v7732_v0 }
0x103a   :  { %6076 = vmatmul.mubr.msk.f32.vlgmr.msra.gmra.mrb[32].mxu0 %vm270_vm10, %v7724_v60  ;;  %6108 = vmatmul.mubr.msk.f32.vlgmr.msra.gmra.mrb[38].mxu1 %vm270_vm10, %v7774_v26 }
0x1040   :  { %6597 = vmatpush3.bf16.xpose.msk.msra.mxu1 %vm7146_vm5, %v7732_v0 }
0x1041   :  { %6603 = vmatprep.subr.bf16.mxu1 %v6602_v11 }
0x1105   :  { %v6055_v43 = vpop.f32.mrb[30].mxu0  ;;  %v6084_v36 = vpop.f32.mrb[36].mxu1 }
0x1106   :  { %v3883_v13 = vadd.f32 %v6084_v36, %v7841_v40  ;;  %v3616_v53 = vpop.f32.mrb[31].mxu0  ;;  %v3877_v30 = vpop.f32.mrb[37].mxu1  ;;  %v3622_v15 = vadd.f32 %v6055_v43, %v7841_v40 }
0x1107   :  { %v3878_v44 = vadd.f32 %v7846_v19, %v3877_v30  ;;  %v3617_v20 = vadd.f32 %v7846_v19, %v3616_v53 }
0x1108   :  { %v3889_v5 = vsel %vm539_vm6, %v3883_v13, -inf  ;;  %v3628_v22 = vsel %vm539_vm6, %v3622_v15, -inf }
0x1109   :  { %3890 = vmax.xlane.f32.xlu0 %v3889_v5  ;;  %v3886_v39 = vsel %vm539_vm6, %v3878_v44, -inf  ;;  %v3625_v33 = vsel %vm539_vm6, %v3617_v20, -inf  ;;  %v4074_v5 = vld [vmem:[%s8081_s3 + $0x340] sm:$0xff] }
0x110a   :  { %3887 = vmax.xlane.f32.xlu1 %v3886_v39 }
0x110d   :  { %v6077_v29 = vpop.f32.mrb[32].mxu0  ;;  %v6109_v32 = vpop.f32.mrb[38].mxu1  ;;  %3629 = vmax.xlane.f32.xlu0 %v3628_v22 }
0x110e   :  { %v4144_v17 = vpop.f32.mrb[39].mxu1  ;;  %v3796_v35 = vpop.f32.mrb[33].mxu0  ;;  %3626 = vmax.xlane.f32.xlu1 %v3625_v33 }
0x110f   :  { %v6568_v34 = vpack.c.bf16 %v6077_v29, %v3796_v35  ;;  %6125 = vmatprep.mubr.msk.f32.mxu1 %vm270_vm10, %v4144_v17  ;;  %v4076_v17 = vld [vmem:[%s8081_s3 + $0x350] sm:$0xff]  ;;  %v4077_v35 = vld [vmem:[%s8081_s3 + $0x358] sm:$0xff] }
0x1110   :  { %6126 = vmatmul.mubr.msk.f32.vlgmr.msra.gmra.mrb[40].mxu1 %vm270_vm10, %v6109_v32 }
0x1111   :  { %6605 = vmatpush3.bf16.msra.mxu1 %v6602_v11  ;;  %6569 = vmatprep.subr.bf16.mxu0 %v6568_v34 }
0x1112   :  { %6143 = vmatprep.mubr.msk.f32.mxu1 %vm270_vm10, %v7772_v4  ;;  %6571 = vmatpush3.bf16.msra.mxu0 %v6568_v34 }
0x1113   :  { %6573 = vmatprep.subr.bf16.mxu0 %v7754_v14  ;;  %6607 = vmatprep.subr.bf16.mxu1 %v6606_v37 }
0x1115   :  { %6609 = vmatpush3.bf16.msra.mxu1 %v6606_v37  ;;  %v6588_v37 = vpack.c.bf16 %v4077_v35, %v4076_v17 }
0x1116   :  { %6620 = vmatprep.subr.msk.bf16.mxu1 %vm7146_vm5, %v7732_v0 }
0x1118   :  { %6144 = vmatmul.mubr.msk.f32.vlgmr.msra.gmra.mrb[42].mxu1 %vm270_vm10, %v7774_v26 }
0x111e   :  { %6623 = vmatpush3.bf16.xpose.msk.msra.mxu1 %vm7146_vm5, %v7732_v0 }
0x1196   :  { %v3891_v38 = vpop.xlane.xlu0 %3890 }
0x1197   :  { %v3893_v41 = vsub.f32 %v3883_v13, %v3891_v38  ;;  %v3888_v45 = vpop.xlane.xlu1 %3887 }
0x1198   :  { %v3892_v47 = vsub.f32 %v3878_v44, %v3888_v45 }
0x1199   :  { %v3896_v4 = vmul.f32 1.442695, %v3893_v41 }
0x119a   :  { %v3894_v46 = vmul.f32 1.442695, %v3892_v47  ;;  %v3630_v49 = vpop.xlane.xlu0 %3629 }
0x119b   :  { %6842 = vpow2.f32 %v3896_v4  ;;  %v3632_v50 = vsub.f32 %v3622_v15, %v3630_v49  ;;  %v3627_v51 = vpop.xlane.xlu1 %3626 }
0x119c   :  { %6844 = vpow2.f32 %v3894_v46  ;;  %v3631_v52 = vsub.f32 %v3617_v20, %v3627_v51  ;;  %v4075_v20 = vld [vmem:[%s8081_s3 + $0x348] sm:$0xff] }
0x119d   :  { %v3635_v61 = vmul.f32 1.442695, %v3632_v50  ;;  %v6584_v28 = vpack.c.bf16 %v4075_v20, %v4074_v5 }
0x119e   :  { %v3633_v48 = vmul.f32 1.442695, %v3631_v52 }
0x119f   :  { %6846 = vpow2.f32 %v3635_v61 }
0x11a0   :  { %6848 = vpow2.f32 %v3633_v48 }
0x11a5   :  { %v6843_v26 = vpop.eup %6842 }
0x11a6   :  { %v6845_v54 = vpop.eup %6844  ;;  %v3901_v0 = vsel %vm539_vm6, %v6843_v26, 0.0 }
0x11a7   :  { %3902 = vadd.xlane.f32.xlu0 %v3901_v0  ;;  %v3898_v55 = vsel %vm539_vm6, %v6845_v54, 0.0 }
0x11a8   :  { %3899 = vadd.xlane.f32.xlu1 %v3898_v55 }
0x11a9   :  { %v6847_v56 = vpop.eup %6846 }
0x11aa   :  { %v6849_v3 = vpop.eup %6848  ;;  %v3640_v57 = vsel %vm539_vm6, %v6847_v56, 0.0 }
0x11ab   :  { %3641 = vadd.xlane.f32.xlu0 %v3640_v57  ;;  %v3637_v58 = vsel %vm539_vm6, %v6849_v3, 0.0 }
0x11ac   :  { %3638 = vadd.xlane.f32.xlu1 %v3637_v58 }
0x11e3   :  { %v6127_v63 = vpop.f32.mrb[40].mxu1 }
0x11e4   :  { %v4306_v2 = vadd.f32 %v6127_v63, %v7841_v40  ;;  %v4300_v6 = vpop.f32.mrb[41].mxu1 }
0x11e5   :  { %v4301_v9 = vadd.f32 %v7846_v19, %v4300_v6 }
0x11e6   :  { %v4312_v10 = vsel %vm539_vm6, %v4306_v2, -inf }
0x11e7   :  { %4313 = vmax.xlane.f32.xlu0 %v4312_v10  ;;  %v4309_v11 = vsel %vm539_vm6, %v4301_v9, -inf  ;;  %v4420_v10 = vld [vmem:[%s8081_s3 + $0x370] sm:$0xff] }
0x11e8   :  { %4310 = vmax.xlane.f32.xlu1 %v4309_v11  ;;  %v4421_v11 = vld [vmem:[%s8081_s3 + $0x378] sm:$0xff] }
0x11eb   :  { %v6145_v43 = vpop.f32.mrb[42].mxu1 }
0x11ec   :  { %v4488_v36 = vpop.f32.mrb[43].mxu1 }
0x11ed   :  { %6161 = vmatprep.mubr.msk.f32.mxu1 %vm270_vm10, %v4488_v36  ;;  %v6614_v36 = vpack.c.bf16 %v4421_v11, %v4420_v10 }
0x11ee   :  { %6162 = vmatmul.mubr.msk.f32.vlgmr.msra.gmra.mrb[44].mxu1 %vm270_vm10, %v6145_v43 }
0x1234   :  { %v3903_v13 = vpop.xlane.xlu0 %3902 }
0x1235   :  { %6850 = vrcp.f32 %v3903_v13  ;;  %v3900_v53 = vpop.xlane.xlu1 %3899 }
0x1236   :  { %6852 = vrcp.f32 %v3900_v53 }
0x1238   :  { %v3642_v44 = vpop.xlane.xlu0 %3641 }
0x1239   :  { %v3639_v30 = vpop.xlane.xlu1 %3638 }
0x123a   :  { %6854 = vrcp.f32 %v3639_v30 }
0x123b   :  { %6856 = vrcp.f32 %v3642_v44 }
0x123f   :  { %v6851_v15 = vpop.eup %6850 }
0x1240   :  { %v6853_v39 = vpop.eup %6852  ;;  %v3907_v42 = vmul.f32 %v6851_v15, %v6843_v26 }
0x1241   :  { %v3906_v22 = vmul.f32 %v6853_v39, %v6845_v54 }
0x1243   :  { %6089 = vmatprep.mubr.msk.f32.mxu0 %vm539_vm6, %v3906_v22 }
0x1244   :  { %v6855_v29 = vpop.eup %6854  ;;  %6090 = vmatmul.mubr.msk.f32.vlgmr.msra.gmra.mrb[34].mxu0 %vm539_vm6, %v3907_v42 }
0x1245   :  { %6575 = vmatpush3.bf16.msra.mxu0 %v7754_v14  ;;  %v3645_v32 = vmul.f32 %v6855_v29, %v6849_v3  ;;  %v6857_v33 = vpop.eup %6856 }
0x1246   :  { %6585 = vmatprep.subr.bf16.mxu0 %v6584_v28  ;;  %v3646_v34 = vmul.f32 %v6857_v33, %v6847_v56 }
0x1247   :  { %6096 = vmatprep.mubr.msk.f32.mxu0 %vm539_vm6, %v3645_v32 }
0x124c   :  { %6097 = vmatmul.mubr.msk.f32.vlgmr.msra.gmra.mrb[34].mxu0 %vm539_vm6, %v3646_v34 }
0x124d   :  { %6587 = vmatpush3.bf16.msra.mxu0 %v6584_v28  ;;  %6118 = vmatprep.mubr.msk.f32.mxu0 %vm270_vm10, %v7722_v59 }
0x124e   :  { %6589 = vmatprep.subr.bf16.mxu0 %v6588_v37 }
0x1251   :  { %6591 = vmatpush3.bf16.msra.mxu0 %v6588_v37  ;;  %v4782_v37 = vld [vmem:[%s8081_s3 + $0x3c0] sm:$0xff] }
0x1254   :  { %6119 = vmatmul.mubr.msk.f32.vlgmr.msra.gmra.mrb[36].mxu0 %vm270_vm10, %v7724_v60 }
0x1274   :  { %v4314_v14 = vpop.xlane.xlu0 %4313 }
0x1275   :  { %v4316_v38 = vsub.f32 %v4306_v2, %v4314_v14  ;;  %v4311_v41 = vpop.xlane.xlu1 %4310  ;;  %v4783_v14 = vld [vmem:[%s8081_s3 + $0x3c8] sm:$0xff] }
0x1276   :  { %v4315_v45 = vsub.f32 %v4301_v9, %v4311_v41  ;;  %v6628_v41 = vpack.c.bf16 %v4783_v14, %v4782_v37 }
0x1277   :  { %v4319_v47 = vmul.f32 1.442695, %v4316_v38  ;;  %v4784_v38 = vld [vmem:[%s8081_s3 + $0x3d0] sm:$0xff] }
0x1278   :  { %v4317_v4 = vmul.f32 1.442695, %v4315_v45  ;;  %v4785_v45 = vld [vmem:[%s8081_s3 + $0x3d8] sm:$0xff] }
0x1279   :  { %6858 = vpow2.f32 %v4319_v47  ;;  %v6634_v47 = vpack.c.bf16 %v4785_v45, %v4784_v38  ;;  %v5006_v38 = vsub.s32 6, %v7117_v1 }
0x127a   :  { %6860 = vpow2.f32 %v4317_v4 }
0x1283   :  { %v6859_v46 = vpop.eup %6858 }
0x1284   :  { %v6861_v49 = vpop.eup %6860  ;;  %v4324_v50 = vsel %vm539_vm6, %v6859_v46, 0.0 }
0x1285   :  { %4325 = vadd.xlane.f32.xlu0 %v4324_v50  ;;  %v4321_v51 = vsel %vm539_vm6, %v6861_v49, 0.0 }
0x1286   :  { %4322 = vadd.xlane.f32.xlu1 %v4321_v51 }
0x12c1   :  { %v6163_v52 = vpop.f32.mrb[44].mxu1 }
0x12c2   :  { %v4650_v61 = vadd.f32 %v6163_v52, %v7841_v40  ;;  %v4644_v48 = vpop.f32.mrb[45].mxu1  ;;  %v4418_v40 = vld [vmem:[%s8081_s3 + $0x360] sm:$0xff] }
0x12c3   :  { %v4645_v26 = vadd.f32 %v7846_v19, %v4644_v48  ;;  %v4419_v19 = vld [vmem:[%s8081_s3 + $0x368] sm:$0xff] }
0x12c4   :  { %v4656_v54 = vsel %vm539_vm6, %v4650_v61, -inf  ;;  %v6610_v6 = vpack.c.bf16 %v4419_v19, %v4418_v40  ;;  %v4793_v19 = vld [vmem:[%s8081_s3 + $0x458] sm:$0xff] }
0x12c5   :  { %4657 = vmax.xlane.f32.xlu0 %v4656_v54  ;;  %v4653_v0 = vsel %vm539_vm6, %v4645_v26, -inf  ;;  %v4788_v54 = vld [vmem:[%s8081_s3 + $0x3f0] sm:$0xff] }
0x12c6   :  { %4654 = vmax.xlane.f32.xlu1 %v4653_v0  ;;  %v4789_v0 = vld [vmem:[%s8081_s3 + $0x3f8] sm:$0xff] }
0x1312   :  { %v4326_v56 = vpop.xlane.xlu0 %4325 }
0x1313   :  { %v4323_v55 = vpop.xlane.xlu1 %4322 }
0x1314   :  { %6862 = vrcp.f32 %v4323_v55  ;;  %v6646_v55 = vpack.c.bf16 %v4789_v0, %v4788_v54 }
0x1315   :  { %6864 = vrcp.f32 %v4326_v56  ;;  %v4790_v56 = vld [vmem:[%s8081_s3 + $0x440] sm:$0xff] }
0x131e   :  { %v6863_v3 = vpop.eup %6862 }
0x131f   :  { %v4329_v57 = vmul.f32 %v6863_v3, %v6861_v49  ;;  %v6865_v9 = vpop.eup %6864  ;;  %v4791_v3 = vld [vmem:[%s8081_s3 + $0x448] sm:$0xff] }
0x1320   :  { %v4330_v43 = vmul.f32 %v6865_v9, %v6859_v46  ;;  %v6652_v40 = vpack.c.bf16 %v4791_v3, %v4790_v56 }
0x1321   :  { %6132 = vmatprep.mubr.msk.f32.mxu0 %vm539_vm6, %v4329_v57  ;;  %v4792_v57 = vld [vmem:[%s8081_s3 + $0x450] sm:$0xff] }
0x1322   :  { %6653 = vmatprep.subr.bf16.mxu1 %v6652_v40 }
0x1323   :  { %6655 = vmatpush3.bf16.msra.mxu1 %v6652_v40 }
0x1327   :  { %v6120_v58 = vpop.f32.mrb[36].mxu0 }
0x1328   :  { %v4219_v63 = vpop.f32.mrb[37].mxu0 }
0x1329   :  { %v6598_v2 = vpack.c.bf16 %v6120_v58, %v4219_v63  ;;  %v6656_v58 = vpack.c.bf16 %v4793_v19, %v4792_v57  ;;  %v4794_v63 = vld [vmem:[%s8081_s3 + $0x460] sm:$0xff] }
0x132b   :  { %6599 = vmatprep.subr.bf16.mxu0 %v6598_v2  ;;  %6657 = vmatprep.subr.bf16.mxu1 %v6656_v58 }
0x132c   :  { %6601 = vmatpush3.bf16.msra.mxu0 %v6598_v2  ;;  %v4795_v2 = vld [vmem:[%s8081_s3 + $0x468] sm:$0xff]  ;;  %6659 = vmatpush3.bf16.msra.mxu1 %v6656_v58 }
0x132d   :  { %6611 = vmatprep.subr.bf16.mxu0 %v6610_v6 }
0x132f   :  { %6133 = vmatmul.mubr.msk.f32.vlgmr.msra.gmra.mrb[34].mxu0 %vm539_vm6, %v4330_v43 }
0x1330   :  { %6613 = vmatpush3.bf16.msra.mxu0 %v6610_v6  ;;  %6154 = vmatprep.mubr.msk.f32.mxu0 %vm270_vm10, %v7722_v59  ;;  %v6660_v6 = vpack.c.bf16 %v4795_v2, %v4794_v63 }
0x1331   :  { %6615 = vmatprep.subr.bf16.mxu0 %v6614_v36 }
0x1332   :  { %6661 = vmatprep.subr.bf16.mxu1 %v6660_v6 }
0x1333   :  { %6663 = vmatpush3.bf16.msra.mxu1 %v6660_v6 }
0x1334   :  { %6617 = vmatpush3.bf16.msra.mxu0 %v6614_v36 }
0x1337   :  { %6155 = vmatmul.mubr.msk.f32.vlgmr.msra.gmra.mrb[38].mxu0 %vm270_vm10, %v7724_v60 }
0x1352   :  { %v4658_v13 = vpop.xlane.xlu0 %4657 }
0x1353   :  { %v4660_v53 = vsub.f32 %v4650_v61, %v4658_v13  ;;  %v4655_v30 = vpop.xlane.xlu1 %4654 }
0x1354   :  { %v4659_v44 = vsub.f32 %v4645_v26, %v4655_v30 }
0x1355   :  { %v4663_v15 = vmul.f32 1.442695, %v4660_v53  ;;  %v4778_v53 = vsub.s32 5, %v7117_v1 }
0x1356   :  { %v4661_v5 = vmul.f32 1.442695, %v4659_v44 }
0x1357   :  { %6866 = vpow2.f32 %v4663_v15  ;;  %v4779_v44 = vrot.slane %v7711_v62, %v4778_v53 }
0x1358   :  { %6868 = vpow2.f32 %v4661_v5 }
0x1361   :  { %v6867_v20 = vpop.eup %6866 }
0x1362   :  { %v6869_v39 = vpop.eup %6868  ;;  %v4668_v22 = vsel %vm539_vm6, %v6867_v20, 0.0 }
0x1363   :  { %4669 = vadd.xlane.f32.xlu0 %v4668_v22  ;;  %v4665_v59 = vsel %vm539_vm6, %v6869_v39, 0.0 }
0x1364   :  { %4666 = vadd.xlane.f32.xlu1 %v4665_v59  ;;  %v4796_v59 = vld [vmem:[%s8081_s3 + $0x470] sm:$0xff] }
0x13f0   :  { %v4670_v29 = vpop.xlane.xlu0 %4669 }
0x13f1   :  { %v4667_v42 = vpop.xlane.xlu1 %4666 }
0x13f2   :  { %6870 = vrcp.f32 %v4667_v42  ;;  %v4797_v42 = vld [vmem:[%s8081_s3 + $0x478] sm:$0xff] }
0x13f3   :  { %6872 = vrcp.f32 %v4670_v29 }
0x13fc   :  { %v6871_v28 = vpop.eup %6870 }
0x13fd   :  { %v4673_v60 = vmul.f32 %v6871_v28, %v6869_v39  ;;  %v6873_v35 = vpop.eup %6872  ;;  %v6664_v28 = vpack.c.bf16 %v4797_v42, %v4796_v59 }
0x13fe   :  { %v4674_v34 = vmul.f32 %v6873_v35, %v6867_v20 }
0x13ff   :  { %6168 = vmatprep.mubr.msk.f32.mxu0 %vm539_vm6, %v4673_v60  ;;  %6665 = vmatprep.subr.bf16.mxu1 %v6664_v28 }
0x1400   :  { %6667 = vmatpush3.bf16.msra.mxu1 %v6664_v28 }
0x1401   :  { %6670 = vmatprep.subr.msk.bf16.mxu1 %vm7146_vm5, %v6934_v7 }
0x140a   :  { %v6156_v32 = vpop.f32.mrb[38].mxu0 }
0x140b   :  { %v4563_v33 = vpop.f32.mrb[39].mxu0 }
0x140c   :  { %v6624_v17 = vpack.c.bf16 %v6156_v32, %v4563_v33 }
0x140e   :  { %6625 = vmatprep.subr.bf16.mxu0 %v6624_v17 }
0x140f   :  { %6627 = vmatpush3.bf16.msra.mxu0 %v6624_v17 }
0x1410   :  { %6630 = vmatprep.subr.msk.bf16.mxu0 %vm7146_vm5, %v6628_v41 }
0x1412   :  { %6169 = vmatmul.mubr.msk.f32.vlgmr.msra.gmra.mrb[34].mxu0 %vm539_vm6, %v4674_v34 }
0x1418   :  { %6633 = vmatpush3.bf16.xpose.msk.msra.mxu0 %vm7146_vm5, %v6628_v41  ;;  %v5007_v41 = vrot.slane %v7711_v62, %v5006_v38 }
0x1419   :  { %6636 = vmatprep.subr.msk.bf16.mxu0 %vm7146_vm5, %v6634_v47 }
0x1420   :  { %6639 = vmatpush3.bf16.xpose.msk.msra.mxu0 %vm7146_vm5, %v6634_v47 }
0x14e5   :  { %v6170_v4 = vpop.f32.mrb[34].mxu0 }
0x14e6   :  { %v7955_v46 = vadd.f32 %v6170_v4, %v7757_v18  ;;  %v4747_v49 = vpop.f32.mrb[35].mxu0  ;;  %v4786_v18 = vld [vmem:[%s8081_s3 + $0x3e0] sm:$0xff] }
0x14e7   :  { %v7958_v50 = vadd.f32 %v4747_v49, %v7760_v23  ;;  %v4787_v23 = vld [vmem:[%s8081_s3 + $0x3e8] sm:$0xff] }
0x14e8   :  { %v4761_v51 = vmul.f32 %v7955_v46, %v7955_v46  ;;  %v6640_v26 = vpack.c.bf16 %v4787_v23, %v4786_v18 }
0x14e9   :  { %v4760_v52 = vmul.f32 %v7958_v50, %v7958_v50 }
0x14ea   :  { %v4765_v61 = vsel %vm270_vm10, %v4761_v51, 0.0  ;;  %6642 = vmatprep.subr.msk.bf16.mxu0 %vm7146_vm5, %v6640_v26 }
0x14eb   :  { %4766 = vadd.xlane.f32.xlu0 %v4765_v61  ;;  %v4762_v48 = vsel %vm270_vm10, %v4760_v52, 0.0  ;;  %6645 = vmatpush3.bf16.xpose.msk.msra.mxu0 %vm7146_vm5, %v6640_v26 }
0x14ec   :  { %4763 = vadd.xlane.f32.xlu1 %v4762_v48  ;;  %6648 = vmatprep.subr.msk.bf16.mxu0 %vm7146_vm5, %v6646_v55 }
0x14f3   :  { %6651 = vmatpush3.bf16.xpose.msk.msra.mxu0 %vm7146_vm5, %v6646_v55 }
0x1578   :  { %v4767_v9 = vpop.xlane.xlu0 %4766 }
0x1579   :  { %v4769_v10 = vmul.f32 0.03125, %v4767_v9  ;;  %v4764_v11 = vpop.xlane.xlu1 %4763 }
0x157a   :  { %v4768_v43 = vmul.f32 0.03125, %v4764_v11 }
0x157b   :  { %v4771_v36 = vadd.f32 1e-06, %v4769_v10 }
0x157c   :  { %v4770_v13 = vadd.f32 1e-06, %v4768_v43 }
0x157d   :  { %6874 = vrsqrt.f32 %v4771_v36 }
0x157e   :  { %6876 = vrsqrt.f32 %v4770_v13 }
0x1587   :  { %v6875_v30 = vpop.eup %6874 }
0x1588   :  { %v6877_v15 = vpop.eup %6876  ;;  %v4775_v5 = vmul.f32 %v6875_v30, %v7955_v46 }
0x1589   :  { %v4774_v20 = vmul.f32 %v6877_v15, %v7958_v50 }
0x158a   :  { %v4781_v22 = vmul.f32 %v4779_v44, %v4775_v5 }
0x158b   :  { %v4780_v39 = vmul.f32 %v4779_v44, %v4774_v20 }
0x158d   :  { %6187 = vmatprep.mubr.msk.f32.mxu0 %vm270_vm10, %v4780_v39 }
0x158e   :  { %6188 = vmatmul.mubr.msk.f32.vlgmr.msra.gmra.mrb[40].mxu0 %vm270_vm10, %v4781_v22 }
0x1661   :  { %v6189_v60 = vpop.f32.mrb[40].mxu0 }
0x1662   :  { %v4894_v29 = vpop.f32.mrb[41].mxu0  ;;  %v4904_v33 = vmax.f32 %v6189_v60, 0.0 }
0x1663   :  { %v4903_v32 = vmax.f32 %v4894_v29, 0.0 }
0x1665   :  { %6206 = vmatprep.mubr.msk.f32.mxu1 %vm1829_vm7, %v4903_v32 }
0x1666   :  { %6207 = vmatmul.mubr.msk.f32.vlgmr.msra.gmra.mrb[46].mxu1 %vm1829_vm7, %v4904_v33 }
0x1667   :  { %6673 = vmatpush3.bf16.xpose.msk.msra.mxu1 %vm7146_vm5, %v6934_v7 }
0x1668   :  { %6676 = vmatprep.subr.msk.bf16.mxu1 %vm7146_vm5, %v6937_v8 }
0x166f   :  { %6679 = vmatpush3.bf16.xpose.msk.msra.mxu1 %vm7146_vm5, %v6937_v8 }
0x1670   :  { %6682 = vmatprep.subr.msk.bf16.mxu1 %vm7146_vm5, %v6947_v12 }
0x1677   :  { %6685 = vmatpush3.bf16.xpose.msk.msra.mxu1 %vm7146_vm5, %v6947_v12 }
0x1678   :  { %6688 = vmatprep.subr.msk.bf16.mxu1 %vm7146_vm5, %v6957_v16 }
0x167f   :  { %6691 = vmatpush3.bf16.xpose.msk.msra.mxu1 %vm7146_vm5, %v6957_v16 }
0x1680   :  { %6694 = vmatprep.subr.msk.bf16.mxu1 %vm7146_vm5, %v6968_v21 }
0x1687   :  { %6697 = vmatpush3.bf16.xpose.msk.msra.mxu1 %vm7146_vm5, %v6968_v21 }
0x1688   :  { %6700 = vmatprep.subr.msk.bf16.mxu1 %vm7146_vm5, %v6979_v24 }
0x168f   :  { %6703 = vmatpush3.bf16.xpose.msk.msra.mxu1 %vm7146_vm5, %v6979_v24 }
0x1690   :  { %6706 = vmatprep.subr.msk.bf16.mxu1 %vm7146_vm5, %v6989_v27 }
0x1697   :  { %6709 = vmatpush3.bf16.xpose.msk.msra.mxu1 %vm7146_vm5, %v6989_v27 }
0x1698   :  { %6712 = vmatprep.subr.msk.bf16.mxu1 %vm7146_vm5, %v7004_v31 }
0x169f   :  { %6715 = vmatpush3.bf16.xpose.msk.msra.mxu1 %vm7146_vm5, %v7004_v31 }
0x1739   :  { %v6208_v7 = vpop.f32.mrb[46].mxu1 }
0x173a   :  { %v4987_v8 = vadd.f32 %v6208_v7, %v7955_v46  ;;  %v4977_v12 = vpop.f32.mrb[47].mxu1 }
0x173b   :  { %v4986_v16 = vadd.f32 %v4977_v12, %v7958_v50 }
0x173c   :  { %v4989_v21 = vmul.f32 %v4987_v8, %v4987_v8 }
0x173d   :  { %v4988_v24 = vmul.f32 %v4986_v16, %v4986_v16 }
0x173e   :  { %v4993_v17 = vsel %vm270_vm10, %v4989_v21, 0.0 }
0x173f   :  { %4994 = vadd.xlane.f32.xlu0 %v4993_v17  ;;  %v4990_v27 = vsel %vm270_vm10, %v4988_v24, 0.0 }
0x1740   :  { %4991 = vadd.xlane.f32.xlu1 %v4990_v27 }
0x17cc   :  { %v4995_v35 = vpop.xlane.xlu0 %4994 }
0x17cd   :  { %v4997_v34 = vmul.f32 0.03125, %v4995_v35  ;;  %v4992_v37 = vpop.xlane.xlu1 %4991 }
0x17ce   :  { %v4996_v14 = vmul.f32 0.03125, %v4992_v37 }
0x17cf   :  { %v4999_v25 = vadd.f32 1e-06, %v4997_v34 }
0x17d0   :  { %v4998_v31 = vadd.f32 1e-06, %v4996_v14 }
0x17d1   :  { %6878 = vrsqrt.f32 %v4999_v25 }
0x17d2   :  { %6880 = vrsqrt.f32 %v4998_v31 }
0x17db   :  { %v6879_v45 = vpop.eup %6878 }
0x17dc   :  { %v6881_v47 = vpop.eup %6880  ;;  %v5003_v4 = vmul.f32 %v6879_v45, %v4987_v8 }
0x17dd   :  { %v5002_v46 = vmul.f32 %v6881_v47, %v4986_v16 }
0x17de   :  { %v5009_v49 = vmul.f32 %v5007_v41, %v5003_v4 }
0x17df   :  { %v5008_v50 = vmul.f32 %v5007_v41, %v5002_v46 }
0x17e0   :  { %v5011_v52 = vmul.f32 0.17677669, %v5009_v49 }
0x17e1   :  { %v5010_v51 = vmul.f32 0.17677669, %v5008_v50 }
0x17e3   :  { %6241 = vmatprep.mubr.msk.f32.mxu1 %vm270_vm10, %v5010_v51 }
0x17e4   :  { %6242 = vmatmul.mubr.msk.f32.vlgmr.msra.gmra.mrb[48].mxu1 %vm270_vm10, %v5011_v52 }
0x18b7   :  { %v6243_v61 = vpop.f32.mrb[48].mxu1 }
0x18b8   :  { %5142 = vst [vmem:[%s8084_s4 + $0x8] sm:$0xff] %v6243_v61  ;;  %v5132_v1 = vpop.f32.mrb[49].mxu1 }
0x18b9   :  { %5141 = vst [vmem:[%s8084_s4] sm:$0xff] %v5132_v1 }

</bundles_post_ra>
